<compile_context>
chip_gen: v7x
topology: tpu7x:2x2x1
jax: 0.10.0
libtpu: 0.0.40
codegen_flags: <defaults>
</compile_context>

<pallas_src>
import functools

import numpy as np

import jax
import jax.numpy as jnp
from jax.experimental import pallas as pl
from jax.experimental.pallas import tpu as pltpu


_VMEM = pl.BlockSpec(memory_space=pltpu.MemorySpace.VMEM)

# Static layer configuration (PyTorch hyper-parameters). stride is always 1.
LAYERS = {
    "ec1": dict(ic=1,  oc=16, k=5, p=2, transpose=False),
    "ec2": dict(ic=16, oc=8,  k=3, p=1, transpose=False),
    "dc1": dict(ic=8,  oc=16, k=3, p=1, transpose=True),
    "dc2": dict(ic=16, oc=1,  k=5, p=2, transpose=True),
}

ZDIM = 8 * 7 * 7      # 392 (bottleneck flatten)
LATENT = 32


def _round_up(x, m):
    return ((x + m - 1) // m) * m


Z_PAD = _round_up(ZDIM, 128)        # 512
LAT_PAD = _round_up(LATENT, 128)    # 128


# ----------------------------------------------------------------------------
# Pallas kernels
# ----------------------------------------------------------------------------
def _elu(x):
    # F.elu (alpha=1); exp only evaluated on the non-positive branch.
    return jnp.where(x > 0, x, jnp.exp(jnp.minimum(x, 0.0)) - 1.0)


def _apply_act(x, act):
    if act == "elu":
        return _elu(x)
    if act == "sigmoid":
        # Exact sigmoid: output strictly within [0, 1] (EUP exp + VPU divide).
        return 1.0 / (1.0 + jnp.exp(-x))
    return x


def _conv_pool_kernel(w_ref, b_ref, a_ref, o_ref, *, cols):
    """Fused conv(stride=1) + bias + ELU + maxpool(2,2).

    w: (OCp, Kp) bf16.  a: (Kp, 4*cols) bf16 -- the four 2x2-window-parity patch
    matrices concatenated along lanes (cols is a multiple of 128, so the result
    slices below are free, lane-aligned views).  One long MXU dot amortizes
    fill/drain 4x versus four separate dots.
    """
    z = jnp.dot(w_ref[...], a_ref[...], preferred_element_type=jnp.float32)
    m = jnp.maximum(jnp.maximum(z[:, 0 * cols:1 * cols], z[:, 1 * cols:2 * cols]),
                    jnp.maximum(z[:, 2 * cols:3 * cols], z[:, 3 * cols:4 * cols]))
    o_ref[...] = _elu(m + b_ref[...])


def _conv_kernel(w_ref, b_ref, a_ref, o_ref, *, act):
    """Fused conv(stride=1) + bias + activation.  out: (OCp, colsP) f32."""
    z = jnp.dot(w_ref[...], a_ref[...], preferred_element_type=jnp.float32)
    o_ref[...] = _apply_act(z + b_ref[...], act)


def _bottleneck_kernel(z_ref, w1_ref, b1_ref, w2_ref, b2_ref, o_ref):
    """efc1 (no act) followed by dfc1 + ELU, fused.  All dims padded to 128."""
    lat = jnp.dot(z_ref[...], w1_ref[...], preferred_element_type=jnp.float32)
    lat = lat + b1_ref[...]
    d = jnp.dot(lat.astype(jnp.bfloat16), w2_ref[...],
                preferred_element_type=jnp.float32) + b2_ref[...]
    o_ref[...] = _elu(d)


# ----------------------------------------------------------------------------
# Wrapper-side glue (pure data movement, XLA)
# ----------------------------------------------------------------------------
def _im2col_pool(xc, k, p, k_pad, cols_pad):
    """Four 2x2-pooling-parity patch matrices concatenated along columns.

    xc: (C, N, H, W) lane-dense activation.  Returns (k_pad, 4*cols_pad) bf16.
    Row order (dy, dx, c); column order (parity, n, y, x).
    """
    c, n, h, w = xc.shape
    ho, wo = h // 2, w // 2
    cols = n * ho * wo
    xp = jnp.pad(xc.astype(jnp.bfloat16), ((0, 0), (0, 0), (p, p), (p, p)))
    parts = []
    for py in range(2):
        for px in range(2):
            slabs = []
            for dy in range(k):
                for dx in range(k):
                    slabs.append(
                        xp[:, :,
                           py + dy: py + dy + 2 * ho: 2,
                           px + dx: px + dx + 2 * wo: 2])
            a = jnp.stack(slabs, axis=0).reshape(k * k * c, cols)
            parts.append(jnp.pad(a, ((0, k_pad - k * k * c),
                                     (0, cols_pad - cols))))
    return jnp.concatenate(parts, axis=1)


def _im2col_up(xc, k, p, k_pad, cols_pad):
    """Patch matrix for conv(k, stride=1, pad=p) applied to the 2x nearest
    upsample of xc, WITHOUT materializing the upsample (index // 2 gather).

    xc: (C, N, h, w) -> (k_pad, cols_pad) bf16; rows (dy, dx, c), cols (n, y, x).
    """
    c, n, h, w = xc.shape
    ho, wo = 2 * h, 2 * w
    cols = n * ho * wo
    # Zero halo sized so every gathered source index (incl. conv padding) is in range.
    pad_lo = max(0, -((0 - p) // 2))
    pad_hi = max(0, (ho - 1 + k - 1 - p) // 2 - (h - 1))
    xp = jnp.pad(xc.astype(jnp.bfloat16),
                 ((0, 0), (0, 0), (pad_lo, pad_hi), (pad_lo, pad_hi)))
    slabs = []
    for dy in range(k):
        iy = np.array([(y + dy - p) // 2 for y in range(ho)], np.int32) + pad_lo
        rows = jnp.take(xp, iy, axis=2)
        for dx in range(k):
            ix = np.array([(x + dx - p) // 2 for x in range(wo)], np.int32) + pad_lo
            slabs.append(jnp.take(rows, ix, axis=3))
    a = jnp.stack(slabs, axis=0).reshape(k * k * c, cols)
    return jnp.pad(a, ((0, k_pad - k * k * c), (0, cols_pad - cols)))


def conv_elu_pool(xc, wm, bm, cfg):
    """Conv2d(stride=1,'same') + ELU + MaxPool2d(2,2).  xc: (C,N,H,W) -> (OC,N,H/2,W/2)."""
    c, n, h, w = xc.shape
    k, oc, p = cfg["k"], cfg["oc"], cfg["p"]
    ocp, kpad = wm.shape
    ho, wo = h // 2, w // 2
    cols = n * ho * wo
    cols_pad = _round_up(cols, 128)
    a = _im2col_pool(xc, k, p, kpad, cols_pad)
    out = pl.pallas_call(
        functools.partial(_conv_pool_kernel, cols=cols_pad),
        out_shape=jax.ShapeDtypeStruct((ocp, cols_pad), jnp.float32),
        in_specs=[_VMEM] * 3,
        out_specs=_VMEM,
    )(wm, bm, a)
    return out[:oc, :cols].reshape(oc, n, ho, wo)


def up_conv_act(xc, wm, bm, cfg, act):
    """Upsample(x2, nearest) + Conv(Transpose)2d(stride=1) + bias + act (fused upsample)."""
    c, n, h, w = xc.shape
    k, oc = cfg["k"], cfg["oc"]
    # ConvTranspose2d (stride=1) == Conv2d with flipped/transposed weights, padding k-1-p.
    p = cfg["k"] - 1 - cfg["p"] if cfg["transpose"] else cfg["p"]
    ocp, kpad = wm.shape
    ho, wo = 2 * h, 2 * w
    cols = n * ho * wo
    cols_pad = _round_up(cols, 128)
    a = _im2col_up(xc, k, p, kpad, cols_pad)
    out = pl.pallas_call(
        functools.partial(_conv_kernel, act=act),
        out_shape=jax.ShapeDtypeStruct((ocp, cols_pad), jnp.float32),
        in_specs=[_VMEM] * 3,
        out_specs=_VMEM,
    )(wm, bm, a)
    return out[:oc, :cols].reshape(oc, n, ho, wo)


def bottleneck(h, w1, b1, w2, b2):
    """efc1 + dfc1 + ELU fused.  h: (8, N, 7, 7) lane-dense -> (8, N, 7, 7)."""
    c, n = h.shape[0], h.shape[1]
    s = h.shape[2] * h.shape[3]
    # Tiny (~1.5 KB) reorder to the PyTorch .view(-1, 392) column order; fuses into the pad.
    z = h.reshape(c, n, s).transpose(1, 0, 2).reshape(n, c * s)
    z = jnp.pad(z, ((0, 0), (0, Z_PAD - c * s))).astype(jnp.bfloat16)
    d = pl.pallas_call(
        _bottleneck_kernel,
        out_shape=jax.ShapeDtypeStruct((n, Z_PAD), jnp.float32),
        in_specs=[_VMEM] * 5,
        out_specs=_VMEM,
    )(z, w1, b1, w2, b2)
    return d[:, :c * s].reshape(n, c, s).transpose(1, 0, 2).reshape(c, n, 7, 7)


# ----------------------------------------------------------------------------
# Parameters: PyTorch-layout init + one-time kernel-layout preparation
# ----------------------------------------------------------------------------
def init_params(key):
    keys = jax.random.split(key, 12)

    def w(k, shape, scale=0.1):
        return (scale * jax.random.normal(k, shape)).astype(jnp.float32)

    return {
        "ec1_w": w(keys[0], (16, 1, 5, 5)),    "ec1_b": w(keys[1], (16,), 0.01),
        "ec2_w": w(keys[2], (8, 16, 3, 3)),    "ec2_b": w(keys[3], (8,), 0.01),
        "efc1_w": w(keys[4], (LATENT, ZDIM)),  "efc1_b": w(keys[5], (LATENT,), 0.01),
        "dfc1_w": w(keys[6], (ZDIM, LATENT)),  "dfc1_b": w(keys[7], (ZDIM,), 0.01),
        "dc1_w": w(keys[8], (8, 16, 3, 3)),    "dc1_b": w(keys[9], (16,), 0.01),
        "dc2_w": w(keys[10], (16, 1, 5, 5)),   "dc2_b": w(keys[11], (1,), 0.01),
    }


def prepare_params(p):
    """Fold all weight flips/transposes/reshapes/padding/bf16 casts into init."""
    prep = {}
    for name, cfg in LAYERS.items():
        w = p[name + "_w"]
        b = p[name + "_b"]
        if cfg["transpose"]:
            # ConvTranspose2d weight (IC, OC, k, k) -> equivalent Conv2d weight.
            w = jnp.flip(w, axis=(2, 3)).transpose(1, 0, 2, 3)
        oc, ic, k, _ = w.shape
        kk = k * k * ic
        kpad = _round_up(kk, 16)     # bf16 sublane pack; no 128-multiple needed
        ocp = _round_up(oc, 16)
        # Row order (dy, dx, ic) to match the lane-dense (C,N,H,W) im2col stacks.
        wm = w.transpose(0, 2, 3, 1).reshape(oc, kk)
        wm = jnp.pad(wm, ((0, ocp - oc), (0, kpad - kk))).astype(jnp.bfloat16)
        bm = jnp.pad(b, (0, ocp - oc)).reshape(ocp, 1).astype(jnp.float32)
        prep[name + "_w"] = wm
        prep[name + "_b"] = bm
    # Linear layers: pre-transposed, zero-padded to 128-multiples, bf16 operands.
    w1 = jnp.pad(p["efc1_w"].T, ((0, Z_PAD - ZDIM), (0, LAT_PAD - LATENT)))
    w2 = jnp.pad(p["dfc1_w"].T, ((0, LAT_PAD - LATENT), (0, Z_PAD - ZDIM)))
    prep["efc1_w"] = w1.astype(jnp.bfloat16)                                   # (512, 128)
    prep["efc1_b"] = jnp.pad(p["efc1_b"], (0, LAT_PAD - LATENT)).reshape(1, LAT_PAD).astype(jnp.float32)
    prep["dfc1_w"] = w2.astype(jnp.bfloat16)                                   # (128, 512)
    prep["dfc1_b"] = jnp.pad(p["dfc1_b"], (0, Z_PAD - ZDIM)).reshape(1, Z_PAD).astype(jnp.float32)
    return prep


# ----------------------------------------------------------------------------
# Forward pass
# ----------------------------------------------------------------------------
def conv_autoencoder_forward(x, pp):
    # x: (N, 1, 28, 28) NCHW.  Internally activations stay lane-dense (C, N, H, W);
    # the two boundary transposes only move a size-1 axis (free reshapes).
    h = x.transpose(1, 0, 2, 3)                                            # (1, N,28,28)
    h = conv_elu_pool(h, pp["ec1_w"], pp["ec1_b"], LAYERS["ec1"])          # (16,N,14,14)
    h = conv_elu_pool(h, pp["ec2_w"], pp["ec2_b"], LAYERS["ec2"])          # ( 8,N, 7, 7)
    d = bottleneck(h, pp["efc1_w"], pp["efc1_b"],
                   pp["dfc1_w"], pp["dfc1_b"])                             # ( 8,N, 7, 7)
    d = up_conv_act(d, pp["dc1_w"], pp["dc1_b"], LAYERS["dc1"], "elu")     # (16,N,14,14)
    d = up_conv_act(d, pp["dc2_w"], pp["dc2_b"], LAYERS["dc2"], "sigmoid") # ( 1,N,28,28)
    return d.transpose(1, 0, 2, 3)                                         # (N, 1,28,28)


if __name__ == "__main__":
    key = jax.random.PRNGKey(0)
    kx, kp = jax.random.split(key)
    # MNIST-like input implied by the 8*7*7 bottleneck: (N, 1, 28, 28)
    x = jax.random.uniform(kx, (2, 1, 28, 28), dtype=jnp.float32)
    params = prepare_params(init_params(kp))

    fwd = jax.jit(conv_autoencoder_forward)
    out = fwd(x, params)
    jax.block_until_ready(out)

    assert out.shape == (2, 1, 28, 28), out.shape
    assert out.dtype == jnp.float32
    assert bool(jnp.all(jnp.isfinite(out)))
    # Exact sigmoid output: strictly within [0, 1].
    assert float(out.min()) >= 0.0 and float(out.max()) <= 1.0
    print("KERNEL_OK")
</pallas_src>

<mosaic_0001>
module attributes {stable_mosaic.version = 11 : i64} {
  func.func @_conv_pool_kernel(%arg0: memref<16x32xbf16, #tpu.memory_space<vmem>>, %arg1: memref<16x1xf32, #tpu.memory_space<vmem>>, %arg2: memref<32x2048xbf16, #tpu.memory_space<vmem>>, %arg3: memref<16x512xf32, #tpu.memory_space<vmem>>) attributes {dimension_semantics = [], scalar_prefetch = 0 : i64, scratch_operands = 0 : i64, tpu.core_type = #tpu.core_type<tc>} {
    %c0 = arith.constant 0 : index
    %c0_0 = arith.constant 0 : index
    %0 = vector.load %arg0[%c0, %c0_0] : memref<16x32xbf16, #tpu.memory_space<vmem>>, vector<16x32xbf16>
    %c0_1 = arith.constant 0 : index
    %c0_2 = arith.constant 0 : index
    %1 = vector.load %arg2[%c0_1, %c0_2] : memref<32x2048xbf16, #tpu.memory_space<vmem>>, vector<32x2048xbf16>
    %cst = arith.constant dense<0.000000e+00> : vector<16x2048xf32>
    %2 = tpu.matmul %0, %1, %cst {dimension_numbers = #tpu.dot_dimension_numbers<[1], [0], [0], [1], [0, 0, 1, 1], [], []>} : vector<16x32xbf16>, vector<32x2048xbf16>, vector<16x2048xf32> -> vector<16x2048xf32>
    %3 = vector.extract_strided_slice %2 {offsets = [0, 0], sizes = [16, 512], strides = [1, 1]} : vector<16x2048xf32> to vector<16x512xf32>
    %4 = vector.extract_strided_slice %2 {offsets = [0, 512], sizes = [16, 512], strides = [1, 1]} : vector<16x2048xf32> to vector<16x512xf32>
    %5 = arith.maximumf %3, %4 : vector<16x512xf32>
    %6 = vector.extract_strided_slice %2 {offsets = [0, 1024], sizes = [16, 512], strides = [1, 1]} : vector<16x2048xf32> to vector<16x512xf32>
    %7 = vector.extract_strided_slice %2 {offsets = [0, 1536], sizes = [16, 512], strides = [1, 1]} : vector<16x2048xf32> to vector<16x512xf32>
    %8 = arith.maximumf %6, %7 : vector<16x512xf32>
    %9 = arith.maximumf %5, %8 : vector<16x512xf32>
    %c0_3 = arith.constant 0 : index
    %c0_4 = arith.constant 0 : index
    %10 = vector.load %arg1[%c0_3, %c0_4] : memref<16x1xf32, #tpu.memory_space<vmem>>, vector<16x1xf32>
    %11 = vector.broadcast %10 : vector<16x1xf32> to vector<16x512xf32>
    %12 = arith.addf %9, %11 : vector<16x512xf32>
    %cst_5 = arith.constant 0.000000e+00 : f32
    %13 = vector.broadcast %cst_5 : f32 to vector<16x512xf32>
    %14 = arith.cmpf ogt, %12, %13 : vector<16x512xf32>
    %cst_6 = arith.constant 0.000000e+00 : f32
    %15 = vector.broadcast %cst_6 : f32 to vector<16x512xf32>
    %16 = arith.minimumf %12, %15 : vector<16x512xf32>
    %17 = math.exp %16 : vector<16x512xf32>
    %cst_7 = arith.constant 1.000000e+00 : f32
    %18 = vector.broadcast %cst_7 : f32 to vector<16x512xf32>
    %19 = arith.subf %17, %18 : vector<16x512xf32>
    %20 = arith.select %14, %12, %19 : vector<16x512xi1>, vector<16x512xf32>
    %c0_8 = arith.constant 0 : index
    %c0_9 = arith.constant 0 : index
    %21 = vector.load %arg3[%c0_8, %c0_9] : memref<16x512xf32, #tpu.memory_space<vmem>>, vector<16x512xf32>
    tpu.vector_store %arg3[%c0_8, %c0_9], %20 {strides = array<i32>} : memref<16x512xf32, #tpu.memory_space<vmem>>, vector<16x512xf32>,
    return
  }
}

module attributes {stable_mosaic.version = 11 : i64} {
  func.func @_conv_pool_kernel(%arg0: memref<16x144xbf16, #tpu.memory_space<vmem>>, %arg1: memref<16x1xf32, #tpu.memory_space<vmem>>, %arg2: memref<144x512xbf16, #tpu.memory_space<vmem>>, %arg3: memref<16x128xf32, #tpu.memory_space<vmem>>) attributes {dimension_semantics = [], scalar_prefetch = 0 : i64, scratch_operands = 0 : i64, tpu.core_type = #tpu.core_type<tc>} {
    %c0 = arith.constant 0 : index
    %c0_0 = arith.constant 0 : index
    %0 = vector.load %arg0[%c0, %c0_0] : memref<16x144xbf16, #tpu.memory_space<vmem>>, vector<16x144xbf16>
    %c0_1 = arith.constant 0 : index
    %c0_2 = arith.constant 0 : index
    %1 = vector.load %arg2[%c0_1, %c0_2] : memref<144x512xbf16, #tpu.memory_space<vmem>>, vector<144x512xbf16>
    %cst = arith.constant dense<0.000000e+00> : vector<16x512xf32>
    %2 = tpu.matmul %0, %1, %cst {dimension_numbers = #tpu.dot_dimension_numbers<[1], [0], [0], [1], [0, 0, 1, 1], [], []>} : vector<16x144xbf16>, vector<144x512xbf16>, vector<16x512xf32> -> vector<16x512xf32>
    %3 = vector.extract_strided_slice %2 {offsets = [0, 0], sizes = [16, 128], strides = [1, 1]} : vector<16x512xf32> to vector<16x128xf32>
    %4 = vector.extract_strided_slice %2 {offsets = [0, 128], sizes = [16, 128], strides = [1, 1]} : vector<16x512xf32> to vector<16x128xf32>
    %5 = arith.maximumf %3, %4 : vector<16x128xf32>
    %6 = vector.extract_strided_slice %2 {offsets = [0, 256], sizes = [16, 128], strides = [1, 1]} : vector<16x512xf32> to vector<16x128xf32>
    %7 = vector.extract_strided_slice %2 {offsets = [0, 384], sizes = [16, 128], strides = [1, 1]} : vector<16x512xf32> to vector<16x128xf32>
    %8 = arith.maximumf %6, %7 : vector<16x128xf32>
    %9 = arith.maximumf %5, %8 : vector<16x128xf32>
    %c0_3 = arith.constant 0 : index
    %c0_4 = arith.constant 0 : index
    %10 = vector.load %arg1[%c0_3, %c0_4] : memref<16x1xf32, #tpu.memory_space<vmem>>, vector<16x1xf32>
    %11 = vector.broadcast %10 : vector<16x1xf32> to vector<16x128xf32>
    %12 = arith.addf %9, %11 : vector<16x128xf32>
    %cst_5 = arith.constant 0.000000e+00 : f32
    %13 = vector.broadcast %cst_5 : f32 to vector<16x128xf32>
    %14 = arith.cmpf ogt, %12, %13 : vector<16x128xf32>
    %cst_6 = arith.constant 0.000000e+00 : f32
    %15 = vector.broadcast %cst_6 : f32 to vector<16x128xf32>
    %16 = arith.minimumf %12, %15 : vector<16x128xf32>
    %17 = math.exp %16 : vector<16x128xf32>
    %cst_7 = arith.constant 1.000000e+00 : f32
    %18 = vector.broadcast %cst_7 : f32 to vector<16x128xf32>
    %19 = arith.subf %17, %18 : vector<16x128xf32>
    %20 = arith.select %14, %12, %19 : vector<16x128xi1>, vector<16x128xf32>
    %c0_8 = arith.constant 0 : index
    %c0_9 = arith.constant 0 : index
    %21 = vector.load %arg3[%c0_8, %c0_9] : memref<16x128xf32, #tpu.memory_space<vmem>>, vector<16x128xf32>
    tpu.vector_store %arg3[%c0_8, %c0_9], %20 {strides = array<i32>} : memref<16x128xf32, #tpu.memory_space<vmem>>, vector<16x128xf32>,
    return
  }
}

module attributes {stable_mosaic.version = 11 : i64} {
  func.func @_bottleneck_kernel(%arg0: memref<2x512xbf16, #tpu.memory_space<vmem>>, %arg1: memref<512x128xbf16, #tpu.memory_space<vmem>>, %arg2: memref<1x128xf32, #tpu.memory_space<vmem>>, %arg3: memref<128x512xbf16, #tpu.memory_space<vmem>>, %arg4: memref<1x512xf32, #tpu.memory_space<vmem>>, %arg5: memref<2x512xf32, #tpu.memory_space<vmem>>) attributes {dimension_semantics = [], scalar_prefetch = 0 : i64, scratch_operands = 0 : i64, tpu.core_type = #tpu.core_type<tc>} {
    %c0 = arith.constant 0 : index
    %c0_0 = arith.constant 0 : index
    %0 = vector.load %arg0[%c0, %c0_0] : memref<2x512xbf16, #tpu.memory_space<vmem>>, vector<2x512xbf16>
    %c0_1 = arith.constant 0 : index
    %c0_2 = arith.constant 0 : index
    %1 = vector.load %arg1[%c0_1, %c0_2] : memref<512x128xbf16, #tpu.memory_space<vmem>>, vector<512x128xbf16>
    %cst = arith.constant dense<0.000000e+00> : vector<2x128xf32>
    %2 = tpu.matmul %0, %1, %cst {dimension_numbers = #tpu.dot_dimension_numbers<[1], [0], [0], [1], [0, 0, 1, 1], [], []>} : vector<2x512xbf16>, vector<512x128xbf16>, vector<2x128xf32> -> vector<2x128xf32>
    %c0_3 = arith.constant 0 : index
    %c0_4 = arith.constant 0 : index
    %3 = vector.load %arg2[%c0_3, %c0_4] : memref<1x128xf32, #tpu.memory_space<vmem>>, vector<1x128xf32>
    %4 = vector.broadcast %3 : vector<1x128xf32> to vector<2x128xf32>
    %5 = arith.addf %2, %4 : vector<2x128xf32>
    %6 = arith.truncf %5 : vector<2x128xf32> to vector<2x128xbf16>
    %c0_5 = arith.constant 0 : index
    %c0_6 = arith.constant 0 : index
    %7 = vector.load %arg3[%c0_5, %c0_6] : memref<128x512xbf16, #tpu.memory_space<vmem>>, vector<128x512xbf16>
    %cst_7 = arith.constant dense<0.000000e+00> : vector<2x512xf32>
    %8 = tpu.matmul %6, %7, %cst_7 {dimension_numbers = #tpu.dot_dimension_numbers<[1], [0], [0], [1], [0, 0, 1, 1], [], []>} : vector<2x128xbf16>, vector<128x512xbf16>, vector<2x512xf32> -> vector<2x512xf32>
    %c0_8 = arith.constant 0 : index
    %c0_9 = arith.constant 0 : index
    %9 = vector.load %arg4[%c0_8, %c0_9] : memref<1x512xf32, #tpu.memory_space<vmem>>, vector<1x512xf32>
    %10 = vector.broadcast %9 : vector<1x512xf32> to vector<2x512xf32>
    %11 = arith.addf %8, %10 : vector<2x512xf32>
    %cst_10 = arith.constant 0.000000e+00 : f32
    %12 = vector.broadcast %cst_10 : f32 to vector<2x512xf32>
    %13 = arith.cmpf ogt, %11, %12 : vector<2x512xf32>
    %cst_11 = arith.constant 0.000000e+00 : f32
    %14 = vector.broadcast %cst_11 : f32 to vector<2x512xf32>
    %15 = arith.minimumf %11, %14 : vector<2x512xf32>
    %16 = math.exp %15 : vector<2x512xf32>
    %cst_12 = arith.constant 1.000000e+00 : f32
    %17 = vector.broadcast %cst_12 : f32 to vector<2x512xf32>
    %18 = arith.subf %16, %17 : vector<2x512xf32>
    %19 = arith.select %13, %11, %18 : vector<2x512xi1>, vector<2x512xf32>
    %c0_13 = arith.constant 0 : index
    %c0_14 = arith.constant 0 : index
    %20 = vector.load %arg5[%c0_13, %c0_14] : memref<2x512xf32, #tpu.memory_space<vmem>>, vector<2x512xf32>
    tpu.vector_store %arg5[%c0_13, %c0_14], %19 {strides = array<i32>} : memref<2x512xf32, #tpu.memory_space<vmem>>, vector<2x512xf32>,
    return
  }
}

module attributes {stable_mosaic.version = 11 : i64} {
  func.func @_conv_kernel(%arg0: memref<16x80xbf16, #tpu.memory_space<vmem>>, %arg1: memref<16x1xf32, #tpu.memory_space<vmem>>, %arg2: memref<80x512xbf16, #tpu.memory_space<vmem>>, %arg3: memref<16x512xf32, #tpu.memory_space<vmem>>) attributes {dimension_semantics = [], scalar_prefetch = 0 : i64, scratch_operands = 0 : i64, tpu.core_type = #tpu.core_type<tc>} {
    %c0 = arith.constant 0 : index
    %c0_0 = arith.constant 0 : index
    %0 = vector.load %arg0[%c0, %c0_0] : memref<16x80xbf16, #tpu.memory_space<vmem>>, vector<16x80xbf16>
    %c0_1 = arith.constant 0 : index
    %c0_2 = arith.constant 0 : index
    %1 = vector.load %arg2[%c0_1, %c0_2] : memref<80x512xbf16, #tpu.memory_space<vmem>>, vector<80x512xbf16>
    %cst = arith.constant dense<0.000000e+00> : vector<16x512xf32>
    %2 = tpu.matmul %0, %1, %cst {dimension_numbers = #tpu.dot_dimension_numbers<[1], [0], [0], [1], [0, 0, 1, 1], [], []>} : vector<16x80xbf16>, vector<80x512xbf16>, vector<16x512xf32> -> vector<16x512xf32>
    %c0_3 = arith.constant 0 : index
    %c0_4 = arith.constant 0 : index
    %3 = vector.load %arg1[%c0_3, %c0_4] : memref<16x1xf32, #tpu.memory_space<vmem>>, vector<16x1xf32>
    %4 = vector.broadcast %3 : vector<16x1xf32> to vector<16x512xf32>
    %5 = arith.addf %2, %4 : vector<16x512xf32>
    %cst_5 = arith.constant 0.000000e+00 : f32
    %6 = vector.broadcast %cst_5 : f32 to vector<16x512xf32>
    %7 = arith.cmpf ogt, %5, %6 : vector<16x512xf32>
    %cst_6 = arith.constant 0.000000e+00 : f32
    %8 = vector.broadcast %cst_6 : f32 to vector<16x512xf32>
    %9 = arith.minimumf %5, %8 : vector<16x512xf32>
    %10 = math.exp %9 : vector<16x512xf32>
    %cst_7 = arith.constant 1.000000e+00 : f32
    %11 = vector.broadcast %cst_7 : f32 to vector<16x512xf32>
    %12 = arith.subf %10, %11 : vector<16x512xf32>
    %13 = arith.select %7, %5, %12 : vector<16x512xi1>, vector<16x512xf32>
    %c0_8 = arith.constant 0 : index
    %c0_9 = arith.constant 0 : index
    %14 = vector.load %arg3[%c0_8, %c0_9] : memref<16x512xf32, #tpu.memory_space<vmem>>, vector<16x512xf32>
    tpu.vector_store %arg3[%c0_8, %c0_9], %13 {strides = array<i32>} : memref<16x512xf32, #tpu.memory_space<vmem>>, vector<16x512xf32>,
    return
  }
}

module attributes {stable_mosaic.version = 11 : i64} {
  func.func @_conv_kernel(%arg0: memref<16x400xbf16, #tpu.memory_space<vmem>>, %arg1: memref<16x1xf32, #tpu.memory_space<vmem>>, %arg2: memref<400x1664xbf16, #tpu.memory_space<vmem>>, %arg3: memref<16x1664xf32, #tpu.memory_space<vmem>>) attributes {dimension_semantics = [], scalar_prefetch = 0 : i64, scratch_operands = 0 : i64, tpu.core_type = #tpu.core_type<tc>} {
    %c0 = arith.constant 0 : index
    %c0_0 = arith.constant 0 : index
    %0 = vector.load %arg0[%c0, %c0_0] : memref<16x400xbf16, #tpu.memory_space<vmem>>, vector<16x400xbf16>
    %c0_1 = arith.constant 0 : index
    %c0_2 = arith.constant 0 : index
    %1 = vector.load %arg2[%c0_1, %c0_2] : memref<400x1664xbf16, #tpu.memory_space<vmem>>, vector<400x1664xbf16>
    %cst = arith.constant dense<0.000000e+00> : vector<16x1664xf32>
    %2 = tpu.matmul %0, %1, %cst {dimension_numbers = #tpu.dot_dimension_numbers<[1], [0], [0], [1], [0, 0, 1, 1], [], []>} : vector<16x400xbf16>, vector<400x1664xbf16>, vector<16x1664xf32> -> vector<16x1664xf32>
    %c0_3 = arith.constant 0 : index
    %c0_4 = arith.constant 0 : index
    %3 = vector.load %arg1[%c0_3, %c0_4] : memref<16x1xf32, #tpu.memory_space<vmem>>, vector<16x1xf32>
    %4 = vector.broadcast %3 : vector<16x1xf32> to vector<16x1664xf32>
    %5 = arith.addf %2, %4 : vector<16x1664xf32>
    %cst_5 = arith.constant 0.000000e+00 : f32
    %6 = vector.broadcast %cst_5 : f32 to vector<16x1664xf32>
    %7 = arith.subf %6, %5 : vector<16x1664xf32>
    %8 = math.exp %7 : vector<16x1664xf32>
    %cst_6 = arith.constant 1.000000e+00 : f32
    %9 = vector.broadcast %cst_6 : f32 to vector<16x1664xf32>
    %10 = arith.addf %9, %8 : vector<16x1664xf32>
    %cst_7 = arith.constant 1.000000e+00 : f32
    %11 = vector.broadcast %cst_7 : f32 to vector<16x1664xf32>
    %12 = arith.divf %11, %10 : vector<16x1664xf32>
    %c0_8 = arith.constant 0 : index
    %c0_9 = arith.constant 0 : index
    %13 = vector.load %arg3[%c0_8, %c0_9] : memref<16x1664xf32, #tpu.memory_space<vmem>>, vector<16x1664xf32>
    tpu.vector_store %arg3[%c0_8, %c0_9], %12 {strides = array<i32>} : memref<16x1664xf32, #tpu.memory_space<vmem>>, vector<16x1664xf32>,
    return
  }
}

</mosaic_0001>

<bundles_post_ra>
// kernel: conv_autoencoder_forward.5
= control target key start
LH: loop header
LB: loop body
LE: loop exit
PB: predicated region body
PF: predicated region fallthrough
CT: control target
= control target key end

     0   :  { %8 = vsyncpa [#allocation3], 0  ;;  %s776_s12 = smov [#allocation2]   ;;  %s965_s0 = inlined_call_operand.hbm [shape: bf16[16,32], index: 0, kind: input, shape index: {}]   ;;  %s966_s1 = inlined_call_operand.vmem [shape: f32[16,1], index: 1, kind: input, shape index: {}]   ;;  %s967_s2 = inlined_call_operand.vmem [shape: bf16[32,2048], index: 2, kind: input, shape index: {}]   ;;  %s968_s3 = inlined_call_operand.vmem [shape: f32[16,512], index: 3, kind: output, shape index: {}]  }
   0x1   :  { %s14_s13 = sshll.u32 %s776_s12, 4  ;;  %s752_s16 = scalar_lea.hbm %s965_s0, 128  ;;  %s15_s13 = int_to_ptr.vmem [resolvable:$true] %s14_s13 }
   0x2   :  { %p753_p0 = scmp.ne.s32.totalorder %s965_s0, %s752_s16  ;;  %p756_p1 = scmp.lt.u32.totalorder %s752_s16, %s965_s0 }
   0x4   :  { %p758_p2 = pnand %p756_p1, %p753_p0 }
   0x6   :  { %761 = shalt.err (!%p758_p2)
}
   0x7   :  { %s762_s21 = scalar_lea.vmem %s15_s13, 128  ;;  %p767_p4 = scmp.lt.s32.totalorder %s15_s13, %s15_s13 }
   0x8   :  { %p763_p3 = scmp.ne.s32.totalorder %s15_s13, %s762_s21  ;;  %p768_p5 = scmp.lt.s32.totalorder %s762_s21, %s762_s21 }
   0xa   :  { %p769_p6 = por %p768_p5, %p767_p4 }
   0xc   :  { %p770_p7 = pnand %p769_p6, %p763_p3 }
   0xe   :  { %773 = shalt.err (!%p770_p7)
}
   0xf   :  { %s777_s22 = smov 64   ;;  %s778_s23 = smov 4  }
  0x10   :  { %20 = dma.hbm_to_vmem [thread:$0]  %s965_s0, 128, %s15_s13, [#allocation3], %s777_s22, %s777_s22, %s778_s23  }
  0x11   :  { %774 = dma.done.wait [#allocation3], 128  }
  0x12   :  { %775 = vsyncadd [#allocation3], 4294967168  ;;  %v779_v0 = vmov 0   ;;  %v31_v1 = vld [vmem:[%s967_s2] sm:$0xff]  ;;  %v32_v3 = vld [vmem:[%s967_s2 + $0x8] sm:$0xff]  ;;  %vm228_vm0 = vcmask 261120  }
  0x13   :  { %264 = vmatprep.mubr.bf16.mxu0 %v779_v0  ;;  %307 = vmatprep.mubr.bf16.mxu1 %v779_v0  ;;  %v39_v2 = vld [vmem:[%s967_s2 + $0x40] sm:$0xff]  ;;  %v40_v5 = vld [vmem:[%s967_s2 + $0x48] sm:$0xff]  ;;  %v33_v15 = vld [vmem:[%s967_s2 + $0x10] sm:$0xff] }
  0x14   :  { %734 = vset.pattern.permute.xlu0 %v779_v0  ;;  %v683_v4 = vcombine.high %v31_v1, %v39_v2  ;;  %v682_v6 = vcombine.low %v31_v1, %v39_v2  ;;  %v47_v7 = vld [vmem:[%s967_s2 + $0x80] sm:$0xff]  ;;  %v685_v9 = vcombine.high %v32_v3, %v40_v5  ;;  %v684_v10 = vcombine.low %v32_v3, %v40_v5  ;;  %v48_v12 = vld [vmem:[%s967_s2 + $0x88] sm:$0xff]  ;;  %v41_v17 = vld [vmem:[%s967_s2 + $0x50] sm:$0xff] }
  0x15   :  { %v55_v8 = vld [vmem:[%s967_s2 + $0xc0] sm:$0xff]  ;;  %v56_v13 = vld [vmem:[%s967_s2 + $0xc8] sm:$0xff]  ;;  %v34_v18 = vld [vmem:[%s967_s2 + $0x18] sm:$0xff]  ;;  %v687_v21 = vcombine.high %v33_v15, %v41_v17  ;;  %v686_v28 = vcombine.low %v33_v15, %v41_v17 }
  0x16   :  { %v699_v11 = vcombine.high %v47_v7, %v55_v8  ;;  %232 = vmatprep.subr.bf16.mxu0 %v683_v4  ;;  %v701_v14 = vcombine.high %v48_v12, %v56_v13  ;;  %275 = vmatprep.subr.bf16.mxu1 %v685_v9  ;;  %v698_v16 = vcombine.low %v47_v7, %v55_v8  ;;  %v42_v19 = vld [vmem:[%s967_s2 + $0x58] sm:$0xff]  ;;  %v49_v23 = vld [vmem:[%s967_s2 + $0x90] sm:$0xff]  ;;  %v857_v25 = vld [vmem:[#allocation2] sm:$0xff]  }
  0x17   :  { %233 = vmatpush1.bf16.msra.mxu0 %v682_v6  ;;  %276 = vmatpush1.bf16.msra.mxu1 %v684_v10  ;;  %v700_v20 = vcombine.low %v48_v12, %v56_v13  ;;  %v689_v22 = vcombine.high %v34_v18, %v42_v19  ;;  %v57_v24 = vld [vmem:[%s967_s2 + $0xd0] sm:$0xff]  ;;  %v50_v26 = vld [vmem:[%s967_s2 + $0x98] sm:$0xff]  ;;  %v688_v29 = vcombine.low %v34_v18, %v42_v19  ;;  %v35_v32 = vld [vmem:[%s967_s2 + $0x20] sm:$0xff] }
  0x18   :  { %234 = vmatprep.subr.bf16.mxu0 %v699_v11  ;;  %277 = vmatprep.subr.bf16.mxu1 %v701_v14  ;;  %v58_v27 = vld [vmem:[%s967_s2 + $0xd8] sm:$0xff]  ;;  %v703_v30 = vcombine.high %v49_v23, %v57_v24  ;;  %v43_v33 = vld [vmem:[%s967_s2 + $0x60] sm:$0xff]  ;;  %v36_v34 = vld [vmem:[%s967_s2 + $0x28] sm:$0xff]  ;;  %v702_v36 = vcombine.low %v49_v23, %v57_v24 }
  0x19   :  { %v705_v31 = vcombine.high %v50_v26, %v58_v27  ;;  %v44_v35 = vld [vmem:[%s967_s2 + $0x68] sm:$0xff]  ;;  %v600_v37 = vld [vmem:[%s966_s1] sm:$0xff]  ;;  %v704_v38 = vcombine.low %v50_v26, %v58_v27  ;;  %v691_v39 = vcombine.high %v35_v32, %v43_v33  ;;  %v690_v45 = vcombine.low %v35_v32, %v43_v33  ;;  %v37_v50 = vld [vmem:[%s967_s2 + $0x30] sm:$0xff] }
  0x1a   :  { %v693_v40 = vcombine.high %v36_v34, %v44_v35  ;;  %v51_v41 = vld [vmem:[%s967_s2 + $0xa0] sm:$0xff]  ;;  %v52_v43 = vld [vmem:[%s967_s2 + $0xa8] sm:$0xff]  ;;  %604 = vperm.xlu0 %734, %v600_v37   ;;  %v692_v47 = vcombine.low %v36_v34, %v44_v35  ;;  %v45_v51 = vld [vmem:[%s967_s2 + $0x70] sm:$0xff] }
  0x1b   :  { %235 = vmatpush1.bf16.msra.mxu0 %v698_v16  ;;  %278 = vmatpush1.bf16.msra.mxu1 %v700_v20  ;;  %v59_v42 = vld [vmem:[%s967_s2 + $0xe0] sm:$0xff]  ;;  %v60_v44 = vld [vmem:[%s967_s2 + $0xe8] sm:$0xff]  ;;  %v38_v52 = vld [vmem:[%s967_s2 + $0x38] sm:$0xff]  ;;  %v695_v56 = vcombine.high %v37_v50, %v45_v51  ;;  %v694_v62 = vcombine.low %v37_v50, %v45_v51 }
  0x1c   :  { %318 = vmatprep.subr.bf16.mxu0 %v687_v21  ;;  %361 = vmatprep.subr.bf16.mxu1 %v689_v22  ;;  %v601_v46 = vld [vmem:[%s966_s1 + $0x8] sm:$0xff]  ;;  %v707_v48 = vcombine.high %v51_v41, %v59_v42  ;;  %v709_v49 = vcombine.high %v52_v43, %v60_v44  ;;  %v46_v53 = vld [vmem:[%s967_s2 + $0x78] sm:$0xff]  ;;  %v706_v54 = vcombine.low %v51_v41, %v59_v42  ;;  %v53_v58 = vld [vmem:[%s967_s2 + $0xb0] sm:$0xff] }
  0x1d   :  { %v708_v55 = vcombine.low %v52_v43, %v60_v44  ;;  %v697_v57 = vcombine.high %v38_v52, %v46_v53  ;;  %v61_v59 = vld [vmem:[%s967_s2 + $0xf0] sm:$0xff]  ;;  %v54_v60 = vld [vmem:[%s967_s2 + $0xb8] sm:$0xff]  ;;  %v696_v63 = vcombine.low %v38_v52, %v46_v53 }
  0x1e   :  { %714 = vmatmul.mubr.msk.bf16.vlgmr.msra.gmra.mrb[0].mxu0 %vm228_vm0, %v857_v25  ;;  %715 = vmatmul.mubr.msk.bf16.vlgmr.msra.gmra.mrb[0].mxu1 %vm228_vm0, %v857_v25  ;;  %v62_v61 = vld [vmem:[%s967_s2 + $0xf8] sm:$0xff]  ;;  %v711_v1 = vcombine.high %v53_v58, %v61_v59  ;;  %v710_v3 = vcombine.low %v53_v58, %v61_v59 }
  0x1f   :  { %319 = vmatpush1.bf16.msra.mxu0 %v686_v28  ;;  %362 = vmatpush1.bf16.msra.mxu1 %v688_v29  ;;  %v713_v2 = vcombine.high %v54_v60, %v62_v61  ;;  %v712_v4 = vcombine.low %v54_v60, %v62_v61 }
  0x20   :  { %320 = vmatprep.subr.bf16.mxu0 %v703_v30  ;;  %363 = vmatprep.subr.bf16.mxu1 %v705_v31 }
  0x21   :  { %350 = vmatprep.mubr.bf16.mxu0 %v779_v0  ;;  %393 = vmatprep.mubr.bf16.mxu1 %v779_v0 }
  0x22   :  { %609 = vperm.xlu0 %734, %v601_v46  }
  0x23   :  { %321 = vmatpush1.bf16.msra.mxu0 %v702_v36  ;;  %364 = vmatpush1.bf16.msra.mxu1 %v704_v38 }
  0x24   :  { %404 = vmatprep.subr.bf16.mxu0 %v691_v39  ;;  %447 = vmatprep.subr.bf16.mxu1 %v693_v40 }
  0x26   :  { %716 = vmatmul.mubr.msk.bf16.vlgmr.msra.gmra.mrb[4].mxu0 %vm228_vm0, %v857_v25  ;;  %717 = vmatmul.mubr.msk.bf16.vlgmr.msra.gmra.mrb[4].mxu1 %vm228_vm0, %v857_v25 }
  0x27   :  { %405 = vmatpush1.bf16.msra.mxu0 %v690_v45  ;;  %448 = vmatpush1.bf16.msra.mxu1 %v692_v47 }
  0x28   :  { %406 = vmatprep.subr.bf16.mxu0 %v707_v48  ;;  %449 = vmatprep.subr.bf16.mxu1 %v709_v49 }
  0x29   :  { %436 = vmatprep.mubr.bf16.mxu0 %v779_v0  ;;  %479 = vmatprep.mubr.bf16.mxu1 %v779_v0 }
  0x2b   :  { %407 = vmatpush1.bf16.msra.mxu0 %v706_v54  ;;  %450 = vmatpush1.bf16.msra.mxu1 %v708_v55 }
  0x2c   :  { %490 = vmatprep.subr.bf16.mxu0 %v695_v56  ;;  %533 = vmatprep.subr.bf16.mxu1 %v697_v57 }
  0x2e   :  { %718 = vmatmul.mubr.msk.bf16.vlgmr.msra.gmra.mrb[8].mxu0 %vm228_vm0, %v857_v25  ;;  %719 = vmatmul.mubr.msk.bf16.vlgmr.msra.gmra.mrb[8].mxu1 %vm228_vm0, %v857_v25 }
  0x2f   :  { %491 = vmatpush1.bf16.msra.mxu0 %v694_v62  ;;  %534 = vmatpush1.bf16.msra.mxu1 %v696_v63 }
  0x30   :  { %492 = vmatprep.subr.bf16.mxu0 %v711_v1  ;;  %535 = vmatprep.subr.bf16.mxu1 %v713_v2 }
  0x31   :  { %522 = vmatprep.mubr.bf16.mxu0 %v779_v0  ;;  %565 = vmatprep.mubr.bf16.mxu1 %v779_v0 }
  0x33   :  { %493 = vmatpush1.bf16.msra.mxu0 %v710_v3  ;;  %536 = vmatpush1.bf16.msra.mxu1 %v712_v4 }
  0x36   :  { %720 = vmatmul.mubr.msk.bf16.vlgmr.msra.gmra.mrb[12].mxu0 %vm228_vm0, %v857_v25  ;;  %721 = vmatmul.mubr.msk.bf16.vlgmr.msra.gmra.mrb[12].mxu1 %vm228_vm0, %v857_v25 }
  0x99   :  { %v605_v36 = vpop.permute.xlu0 %604 }
  0xf1   :  { %v266_v5 = vpop.f32.mrb[0].mxu0  ;;  %v309_v6 = vpop.f32.mrb[0].mxu1 }
  0xf2   :  { %v268_v7 = vpop.f32.mrb[1].mxu0  ;;  %v311_v8 = vpop.f32.mrb[1].mxu1 }
  0xf3   :  { %v270_v9 = vpop.f32.mrb[2].mxu0  ;;  %v313_v10 = vpop.f32.mrb[2].mxu1 }
  0xf4   :  { %v272_v11 = vpop.f32.mrb[3].mxu0  ;;  %v315_v12 = vpop.f32.mrb[3].mxu1 }
  0xf9   :  { %v352_v13 = vpop.f32.mrb[4].mxu0  ;;  %v395_v15 = vpop.f32.mrb[4].mxu1 }
  0xfa   :  { %v576_v14 = vmax.f32 %v266_v5, %v352_v13  ;;  %v354_v0 = vpop.f32.mrb[5].mxu0  ;;  %v578_v16 = vmax.f32 %v309_v6, %v395_v15  ;;  %v397_v18 = vpop.f32.mrb[5].mxu1 }
  0xfb   :  { %v577_v17 = vmax.f32 %v268_v7, %v354_v0  ;;  %v356_v19 = vpop.f32.mrb[6].mxu0  ;;  %v579_v20 = vmax.f32 %v311_v8, %v397_v18  ;;  %v399_v22 = vpop.f32.mrb[6].mxu1 }
  0xfc   :  { %v580_v21 = vmax.f32 %v270_v9, %v356_v19  ;;  %v358_v23 = vpop.f32.mrb[7].mxu0  ;;  %v582_v24 = vmax.f32 %v313_v10, %v399_v22  ;;  %v401_v26 = vpop.f32.mrb[7].mxu1 }
  0xfd   :  { %v581_v25 = vmax.f32 %v272_v11, %v358_v23  ;;  %v583_v27 = vmax.f32 %v315_v12, %v401_v26  ;;  %v610_v5 = vpop.permute.xlu0 %609 }
 0x101   :  { %v438_v28 = vpop.f32.mrb[8].mxu0  ;;  %v481_v29 = vpop.f32.mrb[8].mxu1 }
 0x102   :  { %v440_v30 = vpop.f32.mrb[9].mxu0  ;;  %v483_v31 = vpop.f32.mrb[9].mxu1 }
 0x103   :  { %v442_v32 = vpop.f32.mrb[10].mxu0  ;;  %v485_v33 = vpop.f32.mrb[10].mxu1 }
 0x104   :  { %v444_v34 = vpop.f32.mrb[11].mxu0  ;;  %v487_v35 = vpop.f32.mrb[11].mxu1 }
 0x109   :  { %v524_v37 = vpop.f32.mrb[12].mxu0  ;;  %v567_v39 = vpop.f32.mrb[12].mxu1 }
 0x10a   :  { %v584_v38 = vmax.f32 %v438_v28, %v524_v37  ;;  %v526_v40 = vpop.f32.mrb[13].mxu0  ;;  %v586_v41 = vmax.f32 %v481_v29, %v567_v39  ;;  %v569_v43 = vpop.f32.mrb[13].mxu1 }
 0x10b   :  { %v585_v42 = vmax.f32 %v440_v30, %v526_v40  ;;  %v528_v44 = vpop.f32.mrb[14].mxu0  ;;  %v587_v46 = vmax.f32 %v483_v31, %v569_v43  ;;  %v571_v48 = vpop.f32.mrb[14].mxu1 }
 0x10c   :  { %v592_v45 = vmax.f32 %v576_v14, %v584_v38  ;;  %v588_v47 = vmax.f32 %v442_v32, %v528_v44  ;;  %v530_v49 = vpop.f32.mrb[15].mxu0  ;;  %v594_v50 = vmax.f32 %v578_v16, %v586_v41  ;;  %v590_v52 = vmax.f32 %v485_v33, %v571_v48  ;;  %v573_v54 = vpop.f32.mrb[15].mxu1 }
 0x10d   :  { %v593_v51 = vmax.f32 %v577_v17, %v585_v42  ;;  %v589_v53 = vmax.f32 %v444_v34, %v530_v49  ;;  %v595_v56 = vmax.f32 %v579_v20, %v587_v46  ;;  %v591_v58 = vmax.f32 %v487_v35, %v573_v54 }
 0x10e   :  { %v612_v55 = vadd.f32 %v605_v36, %v592_v45  ;;  %v596_v57 = vmax.f32 %v580_v21, %v588_v47  ;;  %v614_v59 = vadd.f32 %v605_v36, %v594_v50  ;;  %v598_v61 = vmax.f32 %v582_v24, %v590_v52 }
 0x10f   :  { %v613_v60 = vadd.f32 %v605_v36, %v593_v51  ;;  %v597_v62 = vmax.f32 %v581_v25, %v589_v53  ;;  %v615_v1 = vadd.f32 %v605_v36, %v595_v56  ;;  %v599_v2 = vmax.f32 %v583_v27, %v591_v58 }
 0x110   :  { %v628_v63 = vmin.f32 %v612_v55, 0.0  ;;  %v630_v3 = vmin.f32 %v614_v59, 0.0  ;;  %v616_v8 = vadd.f32 %v610_v5, %v596_v57  ;;  %v618_v12 = vadd.f32 %v610_v5, %v598_v61 }
 0x111   :  { %v629_v4 = vmin.f32 %v613_v60, 0.0  ;;  %v631_v7 = vmin.f32 %v615_v1, 0.0  ;;  %v617_v11 = vadd.f32 %v610_v5, %v597_v62  ;;  %v619_v14 = vadd.f32 %v610_v5, %v599_v2 }
 0x112   :  { %v636_v6 = vmul.f32 1.442695, %v628_v63  ;;  %v640_v9 = vmul.f32 1.442695, %v630_v3  ;;  %v632_v15 = vmin.f32 %v616_v8, 0.0  ;;  %v634_v16 = vmin.f32 %v618_v12, 0.0 }
 0x113   :  { %v638_v10 = vmul.f32 1.442695, %v629_v4  ;;  %v642_v13 = vmul.f32 1.442695, %v631_v7  ;;  %v633_v0 = vmin.f32 %v617_v11, 0.0  ;;  %v635_v17 = vmin.f32 %v619_v14, 0.0 }
 0x114   :  { %736 = vpow2.f32 %v636_v6  ;;  %v644_v18 = vmul.f32 1.442695, %v632_v15  ;;  %v648_v20 = vmul.f32 1.442695, %v634_v16  ;;  %vm620_vm1 = vcmp.gt.f32.partialorder %v612_v55, 0.0 }
 0x115   :  { %738 = vpow2.f32 %v640_v9  ;;  %v646_v19 = vmul.f32 1.442695, %v633_v0  ;;  %v650_v21 = vmul.f32 1.442695, %v635_v17  ;;  %vm622_vm2 = vcmp.gt.f32.partialorder %v614_v59, 0.0 }
 0x116   :  { %740 = vpow2.f32 %v638_v10  ;;  %vm621_vm3 = vcmp.gt.f32.partialorder %v613_v60, 0.0  ;;  %vm623_vm4 = vcmp.gt.f32.partialorder %v615_v1, 0.0  ;;  %vm624_vm5 = vcmp.gt.f32.partialorder %v616_v8, 0.0 }
 0x117   :  { %742 = vpow2.f32 %v642_v13  ;;  %vm625_vm6 = vcmp.gt.f32.partialorder %v617_v11, 0.0  ;;  %vm626_vm7 = vcmp.gt.f32.partialorder %v618_v12, 0.0  ;;  %vm627_vm8 = vcmp.gt.f32.partialorder %v619_v14, 0.0 }
 0x118   :  { %744 = vpow2.f32 %v644_v18 }
 0x119   :  { %746 = vpow2.f32 %v646_v19 }
 0x11a   :  { %748 = vpow2.f32 %v648_v20 }
 0x11b   :  { %750 = vpow2.f32 %v650_v21 }
 0x11e   :  { %v737_v22 = vpop.eup %736 }
 0x11f   :  { %v739_v23 = vpop.eup %738  ;;  %v722_v24 = vadd.f32 -1.0, %v737_v22 }
 0x120   :  { %v741_v25 = vpop.eup %740  ;;  %v724_v26 = vadd.f32 -1.0, %v739_v23 }
 0x121   :  { %v743_v27 = vpop.eup %742  ;;  %v660_v28 = vsel %vm620_vm1, %v612_v55, %v722_v24  ;;  %v723_v29 = vadd.f32 -1.0, %v741_v25 }
 0x122   :  { %668 = vst [vmem:[%s968_s3] sm:$0xff] %v660_v28  ;;  %v662_v30 = vsel %vm622_vm2, %v614_v59, %v724_v26  ;;  %v725_v31 = vadd.f32 -1.0, %v743_v27  ;;  %v745_v32 = vpop.eup %744 }
 0x123   :  { %670 = vst [vmem:[%s968_s3 + $0x10] sm:$0xff] %v662_v30  ;;  %v661_v33 = vsel %vm621_vm3, %v613_v60, %v723_v29  ;;  %v747_v34 = vpop.eup %746  ;;  %v726_v36 = vadd.f32 -1.0, %v745_v32 }
 0x124   :  { %669 = vst [vmem:[%s968_s3 + $0x8] sm:$0xff] %v661_v33  ;;  %v663_v35 = vsel %vm623_vm4, %v615_v1, %v725_v31  ;;  %v749_v37 = vpop.eup %748  ;;  %v727_v38 = vadd.f32 -1.0, %v747_v34 }
 0x125   :  { %671 = vst [vmem:[%s968_s3 + $0x18] sm:$0xff] %v663_v35  ;;  %v751_v39 = vpop.eup %750  ;;  %v728_v40 = vadd.f32 -1.0, %v749_v37  ;;  %v664_v41 = vsel %vm624_vm5, %v616_v8, %v726_v36 }
 0x126   :  { %v729_v42 = vadd.f32 -1.0, %v751_v39  ;;  %v665_v43 = vsel %vm625_vm6, %v617_v11, %v727_v38  ;;  %672 = vst [vmem:[%s968_s3 + $0x20] sm:$0xff] %v664_v41 }
 0x127   :  { %v666_v44 = vsel %vm626_vm7, %v618_v12, %v728_v40  ;;  %673 = vst [vmem:[%s968_s3 + $0x28] sm:$0xff] %v665_v43 }
 0x128   :  { %v667_v45 = vsel %vm627_vm8, %v619_v14, %v729_v42  ;;  %674 = vst [vmem:[%s968_s3 + $0x30] sm:$0xff] %v666_v44 }
 0x129   :  { %675 = vst [vmem:[%s968_s3 + $0x38] sm:$0xff] %v667_v45 }
 0x12a   :  { %680 = vsyncpa [#allocation3], 1 }

// kernel: conv_autoencoder_forward.6
= control target key start
LH: loop header
LB: loop body
LE: loop exit
PB: predicated region body
PF: predicated region fallthrough
CT: control target
= control target key end

     0   :  { %v475_v1 = vmov 0   ;;  %vm242_vm0 = vcmask 130048   ;;  %s622_s2 = inlined_call_operand.vmem [shape: bf16[144,512], index: 2, kind: input, shape index: {}]   ;;  %s623_s0 = inlined_call_operand.vmem [shape: bf16[16,144], index: 0, kind: input, shape index: {}]   ;;  %s624_s1 = inlined_call_operand.vmem [shape: f32[16,1], index: 1, kind: input, shape index: {}]   ;;  %s625_s3 = inlined_call_operand.vmem [shape: f32[16,128], index: 3, kind: output, shape index: {}]  }
   0x1   :  { %v414_v0 = vld [vmem:[%s622_s2 + $0x4] ss:$16 sps:$4 sm:$0xff]   ;;  %413 = vset.pattern.permute.xlu0 %v475_v1  ;;  %v416_v2 = vld [vmem:[%s622_s2 + $0xc] ss:$16 sps:$4 sm:$0xff]   ;;  %v418_v3 = vld [vmem:[%s622_s2] ss:$16 sps:$4 sm:$0xff]  }
   0x2   :  { %246 = vmatprep.subr.bf16.mxu0 %v414_v0  ;;  %v419_v4 = vld [vmem:[%s622_s2 + $0x8] ss:$16 sps:$4 sm:$0xff]   ;;  %289 = vmatprep.subr.bf16.mxu1 %v416_v2  ;;  %v420_v5 = vld [vmem:[%s622_s2 + $0x24] ss:$16 sps:$4 sm:$0xff]   ;;  %v422_v6 = vld [vmem:[%s622_s2 + $0x2c] ss:$16 sps:$4 sm:$0xff]  }
   0x3   :  { %247 = vmatpush1.bf16.msra.mxu0 %v418_v3  ;;  %290 = vmatpush1.bf16.msra.mxu1 %v419_v4  ;;  %v424_v7 = vld [vmem:[%s622_s2 + $0x20] ss:$16 sps:$4 sm:$0xff]   ;;  %v425_v8 = vld [vmem:[%s622_s2 + $0x28] ss:$16 sps:$4 sm:$0xff]   ;;  %v426_v9 = vld [vmem:[%s622_s2 + $0x44] ss:$16 sps:$4 sm:$0xff]  }
   0x4   :  { %248 = vmatprep.subr.bf16.mxu0 %v420_v5  ;;  %291 = vmatprep.subr.bf16.mxu1 %v422_v6  ;;  %v428_v10 = vld [vmem:[%s622_s2 + $0x4c] ss:$16 sps:$4 sm:$0xff]   ;;  %v430_v11 = vld [vmem:[%s622_s2 + $0x40] ss:$16 sps:$4 sm:$0xff]   ;;  %v431_v12 = vld [vmem:[%s622_s2 + $0x48] ss:$16 sps:$4 sm:$0xff]  }
   0x5   :  { %v432_v13 = vld [vmem:[%s622_s2 + $0x64] ss:$16 sps:$4 sm:$0xff]   ;;  %v434_v14 = vld [vmem:[%s622_s2 + $0x6c] ss:$16 sps:$4 sm:$0xff]   ;;  %v436_v15 = vld [vmem:[%s622_s2 + $0x60] ss:$16 sps:$4 sm:$0xff]  }
   0x6   :  { %v437_v16 = vld [vmem:[%s622_s2 + $0x68] ss:$16 sps:$4 sm:$0xff]   ;;  %v438_v17 = vld [vmem:[%s622_s2 + $0x84] ss:$16 sps:$4 sm:$0xff]   ;;  %v440_v18 = vld [vmem:[%s622_s2 + $0x8c] ss:$16 sps:$4 sm:$0xff]  }
   0x7   :  { %249 = vmatpush1.bf16.msra.mxu0 %v424_v7  ;;  %292 = vmatpush1.bf16.msra.mxu1 %v425_v8  ;;  %v442_v19 = vld [vmem:[%s622_s2 + $0x80] ss:$16 sps:$4 sm:$0xff]   ;;  %v443_v20 = vld [vmem:[%s622_s2 + $0x88] ss:$16 sps:$4 sm:$0xff]   ;;  %v444_v21 = vld [vmem:[%s622_s2 + $0xa4] ss:$16 sps:$4 sm:$0xff]  }
   0x8   :  { %250 = vmatprep.subr.bf16.mxu0 %v426_v9  ;;  %293 = vmatprep.subr.bf16.mxu1 %v428_v10  ;;  %v446_v22 = vld [vmem:[%s622_s2 + $0xac] ss:$16 sps:$4 sm:$0xff]   ;;  %v448_v23 = vld [vmem:[%s622_s2 + $0xa0] ss:$16 sps:$4 sm:$0xff]   ;;  %v449_v24 = vld [vmem:[%s622_s2 + $0xa8] ss:$16 sps:$4 sm:$0xff]  }
   0x9   :  { %v450_v25 = vld [vmem:[%s622_s2 + $0xc4] ss:$16 sps:$4 sm:$0xff]   ;;  %v452_v26 = vld [vmem:[%s622_s2 + $0xcc] ss:$16 sps:$4 sm:$0xff]   ;;  %v454_v27 = vld [vmem:[%s622_s2 + $0xc0] ss:$16 sps:$4 sm:$0xff]  }
   0xa   :  { %v455_v28 = vld [vmem:[%s622_s2 + $0xc8] ss:$16 sps:$4 sm:$0xff]   ;;  %v456_v29 = vld [vmem:[%s622_s2 + $0xe4] ss:$16 sps:$4 sm:$0xff]   ;;  %v458_v30 = vld [vmem:[%s622_s2 + $0xec] ss:$16 sps:$4 sm:$0xff]  }
   0xb   :  { %251 = vmatpush1.bf16.msra.mxu0 %v430_v11  ;;  %294 = vmatpush1.bf16.msra.mxu1 %v431_v12  ;;  %v470_v31 = vld [vmem:[%s623_s0 + $0x4] ss:$8 sps:$4 sm:$0xff]   ;;  %v460_v34 = vld [vmem:[%s622_s2 + $0xe0] ss:$16 sps:$4 sm:$0xff]   ;;  %v461_v35 = vld [vmem:[%s622_s2 + $0xe8] ss:$16 sps:$4 sm:$0xff]  }
   0xc   :  { %252 = vmatprep.subr.bf16.mxu0 %v432_v13  ;;  %295 = vmatprep.subr.bf16.mxu1 %v434_v14  ;;  %v338_v32 = vld [vmem:[%s624_s1] sm:$0xff]  ;;  %v339_v33 = vld [vmem:[%s624_s1 + $0x8] sm:$0xff] }
   0xd   :  { %342 = vperm.xlu0 %413, %v338_v32   ;;  %408 = vmatprep.mubr.msk.bf16.mxu0 %vm242_vm0, %v470_v31  ;;  %v462_v36 = vld [vmem:[%s622_s2 + $0x104] ss:$16 sps:$4 sm:$0xff]   ;;  %v464_v37 = vld [vmem:[%s622_s2 + $0x10c] ss:$16 sps:$4 sm:$0xff]   ;;  %v466_v38 = vld [vmem:[%s622_s2 + $0x100] ss:$16 sps:$4 sm:$0xff]  }
   0xe   :  { %409 = vmatprep.mubr.msk.bf16.mxu1 %vm242_vm0, %v470_v31  ;;  %v467_v39 = vld [vmem:[%s622_s2 + $0x108] ss:$16 sps:$4 sm:$0xff]  }
   0xf   :  { %253 = vmatpush1.bf16.msra.mxu0 %v436_v15  ;;  %296 = vmatpush1.bf16.msra.mxu1 %v437_v16  ;;  %v468_v40 = vld [vmem:[%s623_s0] ss:$8 sps:$4 sm:$0xff]  }
  0x10   :  { %254 = vmatprep.subr.bf16.mxu0 %v438_v17  ;;  %297 = vmatprep.subr.bf16.mxu1 %v440_v18 }
  0x11   :  { %347 = vperm.xlu0 %413, %v339_v33  }
  0x13   :  { %255 = vmatpush1.bf16.msra.mxu0 %v442_v19  ;;  %298 = vmatpush1.bf16.msra.mxu1 %v443_v20 }
  0x14   :  { %256 = vmatprep.subr.bf16.mxu0 %v444_v21  ;;  %299 = vmatprep.subr.bf16.mxu1 %v446_v22 }
  0x17   :  { %257 = vmatpush1.bf16.msra.mxu0 %v448_v23  ;;  %300 = vmatpush1.bf16.msra.mxu1 %v449_v24 }
  0x18   :  { %258 = vmatprep.subr.bf16.mxu0 %v450_v25  ;;  %301 = vmatprep.subr.bf16.mxu1 %v452_v26 }
  0x1b   :  { %259 = vmatpush1.bf16.msra.mxu0 %v454_v27  ;;  %302 = vmatpush1.bf16.msra.mxu1 %v455_v28 }
  0x1c   :  { %260 = vmatprep.subr.bf16.mxu0 %v456_v29  ;;  %303 = vmatprep.subr.bf16.mxu1 %v458_v30 }
  0x1f   :  { %261 = vmatpush1.bf16.msra.mxu0 %v460_v34  ;;  %304 = vmatpush1.bf16.msra.mxu1 %v461_v35 }
  0x20   :  { %262 = vmatprep.subr.bf16.mxu0 %v462_v36  ;;  %305 = vmatprep.subr.bf16.mxu1 %v464_v37 }
  0x23   :  { %263 = vmatpush1.bf16.msra.mxu0 %v466_v38  ;;  %306 = vmatpush1.bf16.msra.mxu1 %v467_v39 }
  0x26   :  { %279 = vmatmul.mubr.bf16.vlgmr.msra.gmra.mrb[0].mxu0 %v468_v40  ;;  %322 = vmatmul.mubr.bf16.vlgmr.msra.gmra.mrb[0].mxu1 %v468_v40 }
  0x8c   :  { %v343_v41 = vpop.permute.xlu0 %342 }
  0x90   :  { %v348_v57 = vpop.permute.xlu0 %347 }
  0xf9   :  { %v280_v42 = vpop.f32.mrb[0].mxu0  ;;  %v323_v43 = vpop.f32.mrb[0].mxu1 }
  0xfa   :  { %v282_v44 = vpop.f32.mrb[1].mxu0  ;;  %v325_v45 = vpop.f32.mrb[1].mxu1 }
  0xfb   :  { %v332_v46 = vmax.f32 %v280_v42, %v282_v44  ;;  %v334_v47 = vmax.f32 %v323_v43, %v325_v45  ;;  %v284_v48 = vpop.f32.mrb[2].mxu0  ;;  %v327_v49 = vpop.f32.mrb[2].mxu1 }
  0xfc   :  { %v286_v50 = vpop.f32.mrb[3].mxu0  ;;  %v329_v51 = vpop.f32.mrb[3].mxu1 }
  0xfd   :  { %v336_v52 = vmax.f32 %v332_v46, %v334_v47  ;;  %v333_v53 = vmax.f32 %v284_v48, %v286_v50  ;;  %v335_v54 = vmax.f32 %v327_v49, %v329_v51 }
  0xff   :  { %v350_v55 = vadd.f32 %v343_v41, %v336_v52  ;;  %v337_v56 = vmax.f32 %v333_v53, %v335_v54 }
 0x101   :  { %v354_v58 = vmin.f32 %v350_v55, 0.0  ;;  %v351_v59 = vadd.f32 %v348_v57, %v337_v56  ;;  %vm352_vm1 = vcmp.gt.f32.partialorder %v350_v55, 0.0 }
 0x103   :  { %v356_v60 = vmul.f32 1.442695, %v354_v58  ;;  %v355_v61 = vmin.f32 %v351_v59, 0.0  ;;  %vm353_vm2 = vcmp.gt.f32.partialorder %v351_v59, 0.0 }
 0x105   :  { %471 = vpow2.f32 %v356_v60  ;;  %v358_v62 = vmul.f32 1.442695, %v355_v61 }
 0x107   :  { %473 = vpow2.f32 %v358_v62 }
 0x10f   :  { %v472_v63 = vpop.eup %471 }
 0x110   :  { %v410_v0 = vadd.f32 -1.0, %v472_v63 }
 0x111   :  { %v474_v1 = vpop.eup %473 }
 0x112   :  { %v362_v2 = vsel %vm352_vm1, %v350_v55, %v410_v0  ;;  %v411_v3 = vadd.f32 -1.0, %v474_v1 }
 0x113   :  { %364 = vst [vmem:[%s625_s3] sm:$0xff] %v362_v2 }
 0x114   :  { %v363_v4 = vsel %vm353_vm2, %v351_v59, %v411_v3 }
 0x115   :  { %365 = vst [vmem:[%s625_s3 + $0x8] sm:$0xff] %v363_v4 }

// kernel: conv_autoencoder_forward.7
= control target key start
LH: loop header
LB: loop body
LE: loop exit
PB: predicated region body
PF: predicated region fallthrough
CT: control target
= control target key end

     0   :  { %v947_v22 = vmov 1966171168   ;;  %v105_v24 = vlaneseq  ;;  %s1192_s1 = inlined_call_operand.vmem [shape: bf16[512,128], index: 1, kind: input, shape index: {}]   ;;  %s1193_s0 = inlined_call_operand.vmem [shape: bf16[2,512], index: 0, kind: input, shape index: {}]   ;;  %s1194_s3 = inlined_call_operand.vmem [shape: bf16[128,512], index: 3, kind: input, shape index: {}]   ;;  %s1195_s2 = inlined_call_operand.vmem [shape: f32[1,128], index: 2, kind: input, shape index: {}]   ;;  %s1196_s4 = inlined_call_operand.vmem [shape: f32[1,512], index: 4, kind: input, shape index: {}]   ;;  %s1197_s5 = inlined_call_operand.vmem [shape: f32[2,512], index: 5, kind: output, shape index: {}]  }
   0x1   :  { %v859_v0 = vld [vmem:[%s1192_s1 + $0x40] sm:$0xff]   ;;  %v863_v4 = vld [vmem:[%s1192_s1 + $0x48] sm:$0xff]   ;;  %v867_v8 = vld [vmem:[%s1192_s1 + $0x50] sm:$0xff]   ;;  %v103_v23 = vunpack.c.l.s4 %v947_v22 }
   0x2   :  { %v860_v1 = vld [vmem:[%s1192_s1 + $0xc0] sm:$0xff]   ;;  %812 = vmatprep.subr.bf16.mxu0 %v859_v0  ;;  %v864_v5 = vld [vmem:[%s1192_s1 + $0xc8] sm:$0xff]   ;;  %v868_v9 = vld [vmem:[%s1192_s1 + $0xd0] sm:$0xff]   ;;  %v1058_v30 = vshrl.u32 %v105_v24, 7 }
   0x3   :  { %v861_v2 = vld [vmem:[%s1192_s1] sm:$0xff]   ;;  %834 = vmatprep.subr.bf16.mxu1 %v860_v1  ;;  %v865_v6 = vld [vmem:[%s1192_s1 + $0x8] sm:$0xff]   ;;  %v869_v10 = vld [vmem:[%s1192_s1 + $0x10] sm:$0xff]   ;;  %v104_v29 = vunpack.c.0.s8 %v103_v23 }
   0x4   :  { %v862_v3 = vld [vmem:[%s1192_s1 + $0x80] sm:$0xff]   ;;  %813 = vmatpush3.bf16.msra.mxu0 %v861_v2  ;;  %v866_v7 = vld [vmem:[%s1192_s1 + $0x88] sm:$0xff]   ;;  %v870_v11 = vld [vmem:[%s1192_s1 + $0x90] sm:$0xff]  }
   0x5   :  { %835 = vmatpush3.bf16.msra.mxu1 %v862_v3  ;;  %814 = vmatprep.subr.bf16.mxu0 %v863_v4  ;;  %v871_v12 = vld [vmem:[%s1192_s1 + $0x58] sm:$0xff]   ;;  %v875_v16 = vld [vmem:[%s1192_s1 + $0x60] sm:$0xff]   ;;  %v879_v20 = vld [vmem:[%s1192_s1 + $0x68] sm:$0xff]   ;;  %v107_v35 = vsub.s32 %v104_v29, %v1058_v30 }
   0x6   :  { %836 = vmatprep.subr.bf16.mxu1 %v864_v5  ;;  %v872_v13 = vld [vmem:[%s1192_s1 + $0xd8] sm:$0xff]   ;;  %v876_v17 = vld [vmem:[%s1192_s1 + $0xe0] sm:$0xff]   ;;  %v880_v21 = vld [vmem:[%s1192_s1 + $0xe8] sm:$0xff]  }
   0x7   :  { %v873_v14 = vld [vmem:[%s1192_s1 + $0x18] sm:$0xff]   ;;  %v877_v18 = vld [vmem:[%s1192_s1 + $0x20] sm:$0xff]   ;;  %v881_v25 = vld [vmem:[%s1192_s1 + $0x28] sm:$0xff]  }
   0x8   :  { %815 = vmatpush3.bf16.msra.mxu0 %v865_v6  ;;  %v874_v15 = vld [vmem:[%s1192_s1 + $0x98] sm:$0xff]   ;;  %v878_v19 = vld [vmem:[%s1192_s1 + $0xa0] sm:$0xff]   ;;  %v882_v26 = vld [vmem:[%s1192_s1 + $0xa8] sm:$0xff]  }
   0x9   :  { %837 = vmatpush3.bf16.msra.mxu1 %v866_v7  ;;  %816 = vmatprep.subr.bf16.mxu0 %v867_v8  ;;  %v883_v27 = vld [vmem:[%s1192_s1 + $0x70] sm:$0xff]   ;;  %v887_v33 = vld [vmem:[%s1192_s1 + $0x78] sm:$0xff]   ;;  %v743_v38 = vld.sshfl [vmem:[%s1193_s0] sm:$0x33 pattern:$0x75316420] }
   0xa   :  { %838 = vmatprep.subr.bf16.mxu1 %v868_v9  ;;  %v884_v28 = vld [vmem:[%s1192_s1 + $0xf0] sm:$0xff]   ;;  %v888_v34 = vld [vmem:[%s1192_s1 + $0xf8] sm:$0xff]   ;;  %v101_v39 = vcombine.high %v743_v38, %v743_v38  ;;  %v108_v40 = vrot.slane %v743_v38, %v107_v35  ;;  %v427_v29 = vld [vmem:[%s1196_s4] sm:$0xf] }
   0xb   :  { %v885_v31 = vld [vmem:[%s1192_s1 + $0x30] sm:$0xff]   ;;  %v889_v36 = vld [vmem:[%s1192_s1 + $0x38] sm:$0xff]  }
   0xc   :  { %817 = vmatpush3.bf16.msra.mxu0 %v869_v10  ;;  %v886_v32 = vld [vmem:[%s1192_s1 + $0xb0] sm:$0xff]   ;;  %v890_v37 = vld [vmem:[%s1192_s1 + $0xb8] sm:$0xff]   ;;  %v115_v43 = vrot.slane %v101_v39, %v107_v35  ;;  %v116_v45 = vcombine.high %v108_v40, %v108_v40 }
   0xd   :  { %839 = vmatpush3.bf16.msra.mxu1 %v870_v11  ;;  %818 = vmatprep.subr.bf16.mxu0 %v871_v12  ;;  %v893_v41 = vld [vmem:[%s1194_s3 + $0x4] ss:$16 sps:$4 sm:$0xff]   ;;  %v896_v42 = vld [vmem:[%s1194_s3 + $0xc] ss:$16 sps:$4 sm:$0xff]   ;;  %v891_v44 = vld [vmem:[%s1194_s3] ss:$16 sps:$4 sm:$0xff]  }
   0xe   :  { %840 = vmatprep.subr.bf16.mxu1 %v872_v13  ;;  %v899_v46 = vld [vmem:[%s1194_s3 + $0x24] ss:$16 sps:$4 sm:$0xff]   ;;  %346 = vmatprep.mubr.bf16.mxu0 %v115_v43  ;;  %v117_v47 = vcombine.high %v115_v43, %v115_v43  ;;  %v894_v48 = vld [vmem:[%s1194_s3 + $0x8] ss:$16 sps:$4 sm:$0xff]   ;;  %v902_v49 = vld [vmem:[%s1194_s3 + $0x2c] ss:$16 sps:$4 sm:$0xff]  }
   0xf   :  { %v897_v50 = vld [vmem:[%s1194_s3 + $0x20] ss:$16 sps:$4 sm:$0xff]   ;;  %v905_v51 = vld [vmem:[%s1194_s3 + $0x44] ss:$16 sps:$4 sm:$0xff]   ;;  %v900_v52 = vld [vmem:[%s1194_s3 + $0x28] ss:$16 sps:$4 sm:$0xff]  }
  0x10   :  { %819 = vmatpush3.bf16.msra.mxu0 %v873_v14  ;;  %386 = vmatprep.mubr.bf16.mxu1 %v117_v47  ;;  %v908_v53 = vld [vmem:[%s1194_s3 + $0x4c] ss:$16 sps:$4 sm:$0xff]   ;;  %v903_v54 = vld [vmem:[%s1194_s3 + $0x40] ss:$16 sps:$4 sm:$0xff]   ;;  %v911_v55 = vld [vmem:[%s1194_s3 + $0x64] ss:$16 sps:$4 sm:$0xff]  }
  0x11   :  { %841 = vmatpush3.bf16.msra.mxu1 %v874_v15  ;;  %820 = vmatprep.subr.bf16.mxu0 %v875_v16  ;;  %v906_v56 = vld [vmem:[%s1194_s3 + $0x48] ss:$16 sps:$4 sm:$0xff]   ;;  %v909_v57 = vld [vmem:[%s1194_s3 + $0x60] ss:$16 sps:$4 sm:$0xff]   ;;  %v914_v58 = vld [vmem:[%s1194_s3 + $0x6c] ss:$16 sps:$4 sm:$0xff]  }
  0x12   :  { %842 = vmatprep.subr.bf16.mxu1 %v876_v17  ;;  %v912_v59 = vld [vmem:[%s1194_s3 + $0x68] ss:$16 sps:$4 sm:$0xff]   ;;  %v917_v60 = vld [vmem:[%s1194_s3 + $0x84] ss:$16 sps:$4 sm:$0xff]   ;;  %v920_v61 = vld [vmem:[%s1194_s3 + $0x8c] ss:$16 sps:$4 sm:$0xff]  }
  0x13   :  { %v915_v62 = vld [vmem:[%s1194_s3 + $0x80] ss:$16 sps:$4 sm:$0xff]   ;;  %v923_v63 = vld [vmem:[%s1194_s3 + $0xa4] ss:$16 sps:$4 sm:$0xff]   ;;  %v918_v0 = vld [vmem:[%s1194_s3 + $0x88] ss:$16 sps:$4 sm:$0xff]  }
  0x14   :  { %821 = vmatpush3.bf16.msra.mxu0 %v877_v18  ;;  %v926_v1 = vld [vmem:[%s1194_s3 + $0xac] ss:$16 sps:$4 sm:$0xff]   ;;  %v921_v2 = vld [vmem:[%s1194_s3 + $0xa0] ss:$16 sps:$4 sm:$0xff]   ;;  %v924_v3 = vld [vmem:[%s1194_s3 + $0xa8] ss:$16 sps:$4 sm:$0xff]  }
  0x15   :  { %843 = vmatpush3.bf16.msra.mxu1 %v878_v19  ;;  %822 = vmatprep.subr.bf16.mxu0 %v879_v20  ;;  %v929_v4 = vld [vmem:[%s1194_s3 + $0xc4] ss:$16 sps:$4 sm:$0xff]   ;;  %v932_v5 = vld [vmem:[%s1194_s3 + $0xcc] ss:$16 sps:$4 sm:$0xff]   ;;  %v927_v6 = vld [vmem:[%s1194_s3 + $0xc0] ss:$16 sps:$4 sm:$0xff]  }
  0x16   :  { %844 = vmatprep.subr.bf16.mxu1 %v880_v21  ;;  %v930_v7 = vld [vmem:[%s1194_s3 + $0xc8] ss:$16 sps:$4 sm:$0xff]   ;;  %v935_v8 = vld [vmem:[%s1194_s3 + $0xe4] ss:$16 sps:$4 sm:$0xff]   ;;  %v938_v9 = vld [vmem:[%s1194_s3 + $0xec] ss:$16 sps:$4 sm:$0xff]  }
  0x17   :  { %v933_v10 = vld [vmem:[%s1194_s3 + $0xe0] ss:$16 sps:$4 sm:$0xff]   ;;  %v936_v11 = vld [vmem:[%s1194_s3 + $0xe8] ss:$16 sps:$4 sm:$0xff]   ;;  %v948_v12 = vmov 0  }
  0x18   :  { %823 = vmatpush3.bf16.msra.mxu0 %v881_v25  ;;  %v742_v14 = vld [vmem:[%s1195_s2] ss:$0 sm:$0xff] }
  0x19   :  { %845 = vmatpush3.bf16.msra.mxu1 %v882_v26  ;;  %824 = vmatprep.subr.bf16.mxu0 %v883_v27  ;;  %v431_v27 = vsub.s32 0, %v1058_v30 }
  0x1a   :  { %846 = vmatprep.subr.bf16.mxu1 %v884_v28  ;;  %v439_v28 = vsub.s32 2, %v1058_v30 }
  0x1c   :  { %825 = vmatpush3.bf16.msra.mxu0 %v885_v31  ;;  %v435_v31 = vsub.s32 1, %v1058_v30 }
  0x1d   :  { %847 = vmatpush3.bf16.msra.mxu1 %v886_v32  ;;  %826 = vmatprep.subr.bf16.mxu0 %v887_v33  ;;  %v443_v32 = vsub.s32 3, %v1058_v30  ;;  %v432_v33 = vrot.slane %v427_v29, %v431_v27 }
  0x1e   :  { %848 = vmatprep.subr.bf16.mxu1 %v888_v34  ;;  %v440_v34 = vrot.slane %v427_v29, %v439_v28  ;;  %v436_v35 = vrot.slane %v427_v29, %v435_v31 }
  0x20   :  { %827 = vmatpush3.bf16.msra.mxu0 %v889_v36  ;;  %v444_v36 = vrot.slane %v427_v29, %v443_v32 }
  0x21   :  { %849 = vmatpush3.bf16.msra.mxu1 %v890_v37  ;;  %609 = vmatprep.subr.bf16.mxu0 %v893_v41 }
  0x22   :  { %650 = vmatprep.subr.bf16.mxu1 %v896_v42 }
  0x23   :  { %347 = vmatmul.mubr.bf16.vlgmr.msra.gmra.mrb[0].mxu0 %v108_v40 }
  0x24   :  { %610 = vmatpush1.bf16.msra.mxu0 %v891_v44  ;;  %387 = vmatmul.mubr.bf16.vlgmr.msra.gmra.mrb[0].mxu1 %v116_v45 }
  0x25   :  { %611 = vmatprep.subr.bf16.mxu0 %v899_v46  ;;  %651 = vmatpush1.bf16.msra.mxu1 %v894_v48 }
  0x26   :  { %652 = vmatprep.subr.bf16.mxu1 %v902_v49  ;;  %641 = vmatprep.mubr.bf16.mxu0 %v948_v12 }
  0x27   :  { %682 = vmatprep.mubr.bf16.mxu1 %v948_v12 }
  0x28   :  { %612 = vmatpush1.bf16.msra.mxu0 %v897_v50 }
  0x29   :  { %613 = vmatprep.subr.bf16.mxu0 %v905_v51  ;;  %653 = vmatpush1.bf16.msra.mxu1 %v900_v52 }
  0x2a   :  { %654 = vmatprep.subr.bf16.mxu1 %v908_v53 }
  0x2c   :  { %614 = vmatpush1.bf16.msra.mxu0 %v903_v54 }
  0x2d   :  { %615 = vmatprep.subr.bf16.mxu0 %v911_v55  ;;  %655 = vmatpush1.bf16.msra.mxu1 %v906_v56 }
  0x2e   :  { %656 = vmatprep.subr.bf16.mxu1 %v914_v58 }
  0x30   :  { %616 = vmatpush1.bf16.msra.mxu0 %v909_v57  ;;  %v949_v57 = vmov 1983009808  }
  0x31   :  { %617 = vmatprep.subr.bf16.mxu0 %v917_v60  ;;  %657 = vmatpush1.bf16.msra.mxu1 %v912_v59  ;;  %v722_v58 = vunpack.c.l.s4 %v949_v57 }
  0x32   :  { %658 = vmatprep.subr.bf16.mxu1 %v920_v61 }
  0x33   :  { %v723_v60 = vunpack.c.0.s8 %v722_v58 }
  0x34   :  { %618 = vmatpush1.bf16.msra.mxu0 %v915_v62 }
  0x35   :  { %619 = vmatprep.subr.bf16.mxu0 %v923_v63  ;;  %659 = vmatpush1.bf16.msra.mxu1 %v918_v0 }
  0x36   :  { %660 = vmatprep.subr.bf16.mxu1 %v926_v1 }
  0x38   :  { %620 = vmatpush1.bf16.msra.mxu0 %v921_v2 }
  0x39   :  { %661 = vmatpush1.bf16.msra.mxu1 %v924_v3  ;;  %621 = vmatprep.subr.bf16.mxu0 %v929_v4 }
  0x3a   :  { %662 = vmatprep.subr.bf16.mxu1 %v932_v5  ;;  %v726_v5 = vsub.s32 %v723_v60, %v1058_v30 }
  0x3c   :  { %622 = vmatpush1.bf16.msra.mxu0 %v927_v6 }
  0x3d   :  { %663 = vmatpush1.bf16.msra.mxu1 %v930_v7  ;;  %623 = vmatprep.subr.bf16.mxu0 %v935_v8 }
  0x3e   :  { %664 = vmatprep.subr.bf16.mxu1 %v938_v9 }
  0x40   :  { %624 = vmatpush1.bf16.msra.mxu0 %v933_v10 }
  0x41   :  { %665 = vmatpush1.bf16.msra.mxu1 %v936_v11 }
  0xf6   :  { %v828_v13 = vpop.f32.mrb[0].mxu0 }
  0xf7   :  { %v829_v15 = vpop.f32.mrb[1].mxu0  ;;  %v850_v16 = vpop.f32.mrb[0].mxu1 }
  0xf8   :  { %v830_v17 = vadd.f32 %v829_v15, %v828_v13  ;;  %v831_v18 = vpop.f32.mrb[2].mxu0  ;;  %v851_v19 = vpop.f32.mrb[1].mxu1 }
  0xf9   :  { %v832_v20 = vpop.f32.mrb[3].mxu0  ;;  %v852_v22 = vadd.f32 %v851_v19, %v850_v16  ;;  %v853_v23 = vpop.f32.mrb[2].mxu1 }
  0xfa   :  { %v349_v21 = vadd.f32 %v830_v17, %v742_v14  ;;  %v854_v24 = vpop.f32.mrb[3].mxu1 }
  0xfc   :  { %v389_v25 = vadd.f32 %v852_v22, %v349_v21 }
  0xfe   :  { %v394_v26 = vpack.c.bf16 %v389_v25, %v389_v25 }
 0x100   :  { %642 = vmatmul.mubr.bf16.vlgmr.msra.gmra.mrb[4].mxu0 %v394_v26  ;;  %683 = vmatmul.mubr.bf16.vlgmr.msra.gmra.mrb[4].mxu1 %v394_v26 }
 0x1d3   :  { %v643_v37 = vpop.f32.mrb[4].mxu0  ;;  %v684_v38 = vpop.f32.mrb[4].mxu1 }
 0x1d4   :  { %v644_v39 = vadd.f32 %v643_v37, %v432_v33  ;;  %v685_v40 = vadd.f32 %v684_v38, %v440_v34  ;;  %v645_v41 = vpop.f32.mrb[5].mxu0  ;;  %v686_v42 = vpop.f32.mrb[5].mxu1 }
 0x1d5   :  { %v646_v43 = vadd.f32 %v645_v41, %v436_v35  ;;  %v687_v44 = vadd.f32 %v686_v42, %v444_v36  ;;  %v647_v45 = vpop.f32.mrb[6].mxu0  ;;  %v688_v46 = vpop.f32.mrb[6].mxu1 }
 0x1d6   :  { %v695_v47 = vmin.f32 %v644_v39, 0.0  ;;  %v697_v48 = vmin.f32 %v685_v40, 0.0  ;;  %v648_v49 = vpop.f32.mrb[7].mxu0  ;;  %v689_v50 = vpop.f32.mrb[7].mxu1  ;;  %vm691_vm0 = vcmp.gt.f32.partialorder %v644_v39, 0.0  ;;  %vm693_vm1 = vcmp.gt.f32.partialorder %v685_v40, 0.0 }
 0x1d7   :  { %v696_v51 = vmin.f32 %v646_v43, 0.0  ;;  %v698_v52 = vmin.f32 %v687_v44, 0.0  ;;  %vm692_vm2 = vcmp.gt.f32.partialorder %v646_v43, 0.0  ;;  %vm694_vm3 = vcmp.gt.f32.partialorder %v687_v44, 0.0 }
 0x1d8   :  { %v699_v53 = vmul.f32 1.442695, %v695_v47  ;;  %v703_v54 = vmul.f32 1.442695, %v697_v48 }
 0x1d9   :  { %v701_v55 = vmul.f32 1.442695, %v696_v51  ;;  %v705_v56 = vmul.f32 1.442695, %v698_v52 }
 0x1da   :  { %939 = vpow2.f32 %v699_v53 }
 0x1db   :  { %941 = vpow2.f32 %v703_v54 }
 0x1dc   :  { %943 = vpow2.f32 %v701_v55 }
 0x1dd   :  { %945 = vpow2.f32 %v705_v56 }
 0x1e4   :  { %v940_v59 = vpop.eup %939 }
 0x1e5   :  { %v942_v61 = vpop.eup %941  ;;  %v808_v62 = vadd.f32 -1.0, %v940_v59 }
 0x1e6   :  { %v944_v63 = vpop.eup %943  ;;  %v810_v0 = vadd.f32 -1.0, %v942_v61 }
 0x1e7   :  { %v946_v1 = vpop.eup %945  ;;  %v711_v2 = vsel %vm691_vm0, %v644_v39, %v808_v62  ;;  %v809_v3 = vadd.f32 -1.0, %v944_v63 }
 0x1e8   :  { %v713_v4 = vsel %vm693_vm1, %v685_v40, %v810_v0  ;;  %v811_v6 = vadd.f32 -1.0, %v946_v1 }
 0x1e9   :  { %v712_v7 = vsel %vm692_vm2, %v646_v43, %v809_v3 }
 0x1ea   :  { %v719_v8 = vcombine.low %v711_v2, %v712_v7  ;;  %v714_v9 = vsel %vm694_vm3, %v687_v44, %v811_v6 }
 0x1eb   :  { %v720_v10 = vcombine.low %v713_v4, %v714_v9 }
 0x1ec   :  { %v727_v11 = vrot.slane %v719_v8, %v726_v5 }
 0x1ed   :  { %v734_v12 = vrot.slane %v720_v10, %v726_v5 }
 0x1ef   :  { %v735_v13 = vcombine.low %v727_v11, %v734_v12 }
 0x1f1   :  { %737 = vst [vmem:[%s1197_s5] sm:$0xff] %v735_v13 }

// kernel: conv_autoencoder_forward.8
= control target key start
LH: loop header
LB: loop body
LE: loop exit
PB: predicated region body
PF: predicated region fallthrough
CT: control target
= control target key end

     0   :  { %v384_v1 = vmov 0   ;;  %vm154_vm0 = vcmask 654336   ;;  %s498_s2 = inlined_call_operand.vmem [shape: bf16[80,512], index: 2, kind: input, shape index: {}]   ;;  %s499_s1 = inlined_call_operand.vmem [shape: f32[16,1], index: 1, kind: input, shape index: {}]   ;;  %s500_s0 = inlined_call_operand.vmem [shape: bf16[16,80], index: 0, kind: input, shape index: {}]   ;;  %s501_s3 = inlined_call_operand.vmem [shape: f32[16,512], index: 3, kind: output, shape index: {}]  }
   0x1   :  { %v337_v0 = vld [vmem:[%s498_s2 + $0x4] ss:$16 sps:$4 sm:$0xff]   ;;  %190 = vmatprep.mubr.bf16.mxu0 %v384_v1  ;;  %233 = vmatprep.mubr.bf16.mxu1 %v384_v1  ;;  %v339_v2 = vld [vmem:[%s498_s2 + $0xc] ss:$16 sps:$4 sm:$0xff]   ;;  %v341_v3 = vld [vmem:[%s498_s2] ss:$16 sps:$4 sm:$0xff]  }
   0x2   :  { %336 = vset.pattern.permute.xlu0 %v384_v1  ;;  %158 = vmatprep.subr.bf16.mxu0 %v337_v0  ;;  %v342_v4 = vld [vmem:[%s498_s2 + $0x8] ss:$16 sps:$4 sm:$0xff]   ;;  %v343_v5 = vld [vmem:[%s498_s2 + $0x24] ss:$16 sps:$4 sm:$0xff]   ;;  %v345_v6 = vld [vmem:[%s498_s2 + $0x2c] ss:$16 sps:$4 sm:$0xff]  }
   0x3   :  { %201 = vmatprep.subr.bf16.mxu1 %v339_v2  ;;  %159 = vmatpush1.bf16.msra.mxu0 %v341_v3  ;;  %v347_v7 = vld [vmem:[%s498_s2 + $0x20] ss:$16 sps:$4 sm:$0xff]   ;;  %v348_v8 = vld [vmem:[%s498_s2 + $0x28] ss:$16 sps:$4 sm:$0xff]   ;;  %v349_v9 = vld [vmem:[%s498_s2 + $0x44] ss:$16 sps:$4 sm:$0xff]  }
   0x4   :  { %202 = vmatpush1.bf16.msra.mxu1 %v342_v4  ;;  %160 = vmatprep.subr.bf16.mxu0 %v343_v5  ;;  %v351_v10 = vld [vmem:[%s498_s2 + $0x4c] ss:$16 sps:$4 sm:$0xff]   ;;  %v353_v11 = vld [vmem:[%s498_s2 + $0x40] ss:$16 sps:$4 sm:$0xff]   ;;  %v354_v12 = vld [vmem:[%s498_s2 + $0x48] ss:$16 sps:$4 sm:$0xff]  }
   0x5   :  { %203 = vmatprep.subr.bf16.mxu1 %v345_v6  ;;  %v355_v13 = vld [vmem:[%s498_s2 + $0x64] ss:$16 sps:$4 sm:$0xff]   ;;  %v357_v14 = vld [vmem:[%s498_s2 + $0x6c] ss:$16 sps:$4 sm:$0xff]   ;;  %v359_v15 = vld [vmem:[%s498_s2 + $0x60] ss:$16 sps:$4 sm:$0xff]  }
   0x6   :  { %v360_v16 = vld [vmem:[%s498_s2 + $0x68] ss:$16 sps:$4 sm:$0xff]   ;;  %v361_v17 = vld [vmem:[%s498_s2 + $0x84] ss:$16 sps:$4 sm:$0xff]   ;;  %v363_v18 = vld [vmem:[%s498_s2 + $0x8c] ss:$16 sps:$4 sm:$0xff]  }
   0x7   :  { %161 = vmatpush1.bf16.msra.mxu0 %v347_v7  ;;  %v37_v19 = vld [vmem:[%s499_s1] sm:$0xff]  ;;  %v366_v21 = vld [vmem:[%s498_s2 + $0x88] ss:$16 sps:$4 sm:$0xff]  }
   0x8   :  { %204 = vmatpush1.bf16.msra.mxu1 %v348_v8  ;;  %162 = vmatprep.subr.bf16.mxu0 %v349_v9  ;;  %v365_v20 = vld [vmem:[%s498_s2 + $0x80] ss:$16 sps:$4 sm:$0xff]   ;;  %v38_v22 = vld [vmem:[%s499_s1 + $0x8] sm:$0xff] }
   0x9   :  { %205 = vmatprep.subr.bf16.mxu1 %v351_v10  ;;  %41 = vperm.xlu0 %336, %v37_v19   ;;  %v367_v23 = vld [vmem:[%s500_s0] sm:$0xff]  }
   0xb   :  { %163 = vmatpush1.bf16.msra.mxu0 %v353_v11 }
   0xc   :  { %206 = vmatpush1.bf16.msra.mxu1 %v354_v12  ;;  %164 = vmatprep.subr.bf16.mxu0 %v355_v13 }
   0xd   :  { %207 = vmatprep.subr.bf16.mxu1 %v357_v14  ;;  %46 = vperm.xlu0 %336, %v38_v22  }
   0xf   :  { %165 = vmatpush1.bf16.msra.mxu0 %v359_v15 }
  0x10   :  { %208 = vmatpush1.bf16.msra.mxu1 %v360_v16  ;;  %166 = vmatprep.subr.bf16.mxu0 %v361_v17 }
  0x11   :  { %209 = vmatprep.subr.bf16.mxu1 %v363_v18 }
  0x13   :  { %167 = vmatpush1.bf16.msra.mxu0 %v365_v20 }
  0x14   :  { %210 = vmatpush1.bf16.msra.mxu1 %v366_v21 }
  0x16   :  { %325 = vmatmul.mubr.msk.bf16.vlgmr.msra.gmra.mrb[0].mxu0 %vm154_vm0, %v367_v23 }
  0x17   :  { %326 = vmatmul.mubr.msk.bf16.vlgmr.msra.gmra.mrb[0].mxu1 %vm154_vm0, %v367_v23 }
  0x88   :  { %v42_v24 = vpop.permute.xlu0 %41 }
  0x8c   :  { %v47_v39 = vpop.permute.xlu0 %46 }
  0xe9   :  { %v192_v25 = vpop.f32.mrb[0].mxu0 }
  0xea   :  { %v235_v26 = vpop.f32.mrb[0].mxu1  ;;  %v193_v27 = vadd.f32 %v192_v25, %v42_v24  ;;  %v194_v29 = vpop.f32.mrb[1].mxu0 }
  0xeb   :  { %v236_v28 = vadd.f32 %v235_v26, %v42_v24  ;;  %v237_v30 = vpop.f32.mrb[1].mxu1  ;;  %v195_v31 = vadd.f32 %v194_v29, %v42_v24  ;;  %v196_v33 = vpop.f32.mrb[2].mxu0 }
  0xec   :  { %v238_v32 = vadd.f32 %v237_v30, %v42_v24  ;;  %v239_v34 = vpop.f32.mrb[2].mxu1  ;;  %v252_v35 = vmin.f32 %v193_v27, 0.0  ;;  %v198_v37 = vpop.f32.mrb[3].mxu0  ;;  %v197_v44 = vadd.f32 %v196_v33, %v47_v39  ;;  %vm244_vm1 = vcmp.gt.f32.partialorder %v193_v27, 0.0 }
  0xed   :  { %v254_v36 = vmin.f32 %v236_v28, 0.0  ;;  %v241_v38 = vpop.f32.mrb[3].mxu1  ;;  %v253_v40 = vmin.f32 %v195_v31, 0.0  ;;  %v240_v45 = vadd.f32 %v239_v34, %v47_v39  ;;  %v199_v48 = vadd.f32 %v198_v37, %v47_v39 }
  0xee   :  { %v255_v41 = vmin.f32 %v238_v32, 0.0  ;;  %v260_v42 = vmul.f32 1.442695, %v252_v35  ;;  %v242_v49 = vadd.f32 %v241_v38, %v47_v39  ;;  %v256_v50 = vmin.f32 %v197_v44, 0.0 }
  0xef   :  { %v264_v43 = vmul.f32 1.442695, %v254_v36  ;;  %v262_v46 = vmul.f32 1.442695, %v253_v40  ;;  %v258_v51 = vmin.f32 %v240_v45, 0.0  ;;  %v257_v52 = vmin.f32 %v199_v48, 0.0 }
  0xf0   :  { %v266_v47 = vmul.f32 1.442695, %v255_v41  ;;  %368 = vpow2.f32 %v260_v42  ;;  %v268_v53 = vmul.f32 1.442695, %v256_v50  ;;  %v259_v54 = vmin.f32 %v242_v49, 0.0 }
  0xf1   :  { %370 = vpow2.f32 %v264_v43  ;;  %v272_v55 = vmul.f32 1.442695, %v258_v51  ;;  %v270_v56 = vmul.f32 1.442695, %v257_v52  ;;  %vm246_vm2 = vcmp.gt.f32.partialorder %v236_v28, 0.0 }
  0xf2   :  { %372 = vpow2.f32 %v262_v46  ;;  %v274_v57 = vmul.f32 1.442695, %v259_v54  ;;  %vm245_vm3 = vcmp.gt.f32.partialorder %v195_v31, 0.0  ;;  %vm247_vm4 = vcmp.gt.f32.partialorder %v238_v32, 0.0 }
  0xf3   :  { %374 = vpow2.f32 %v266_v47  ;;  %vm248_vm5 = vcmp.gt.f32.partialorder %v197_v44, 0.0  ;;  %vm250_vm6 = vcmp.gt.f32.partialorder %v240_v45, 0.0  ;;  %vm249_vm7 = vcmp.gt.f32.partialorder %v199_v48, 0.0 }
  0xf4   :  { %376 = vpow2.f32 %v268_v53  ;;  %vm251_vm8 = vcmp.gt.f32.partialorder %v242_v49, 0.0 }
  0xf5   :  { %378 = vpow2.f32 %v272_v55 }
  0xf6   :  { %380 = vpow2.f32 %v270_v56 }
  0xf7   :  { %382 = vpow2.f32 %v274_v57 }
  0xfa   :  { %v369_v58 = vpop.eup %368 }
  0xfb   :  { %v371_v59 = vpop.eup %370  ;;  %v327_v60 = vadd.f32 -1.0, %v369_v58 }
  0xfc   :  { %v373_v61 = vpop.eup %372  ;;  %v329_v62 = vadd.f32 -1.0, %v371_v59 }
  0xfd   :  { %v375_v63 = vpop.eup %374  ;;  %v284_v0 = vsel %vm244_vm1, %v193_v27, %v327_v60  ;;  %v328_v1 = vadd.f32 -1.0, %v373_v61 }
  0xfe   :  { %v377_v2 = vpop.eup %376  ;;  %292 = vst [vmem:[%s501_s3] sm:$0xff] %v284_v0  ;;  %v286_v3 = vsel %vm246_vm2, %v236_v28, %v329_v62  ;;  %v330_v4 = vadd.f32 -1.0, %v375_v63 }
  0xff   :  { %v379_v5 = vpop.eup %378  ;;  %294 = vst [vmem:[%s501_s3 + $0x10] sm:$0xff] %v286_v3  ;;  %v285_v6 = vsel %vm245_vm3, %v195_v31, %v328_v1  ;;  %v331_v7 = vadd.f32 -1.0, %v377_v2 }
 0x100   :  { %v381_v8 = vpop.eup %380  ;;  %293 = vst [vmem:[%s501_s3 + $0x8] sm:$0xff] %v285_v6  ;;  %v287_v9 = vsel %vm247_vm4, %v238_v32, %v330_v4  ;;  %v333_v10 = vadd.f32 -1.0, %v379_v5 }
 0x101   :  { %v383_v11 = vpop.eup %382  ;;  %295 = vst [vmem:[%s501_s3 + $0x18] sm:$0xff] %v287_v9  ;;  %v288_v12 = vsel %vm248_vm5, %v197_v44, %v331_v7  ;;  %v332_v13 = vadd.f32 -1.0, %v381_v8 }
 0x102   :  { %296 = vst [vmem:[%s501_s3 + $0x20] sm:$0xff] %v288_v12  ;;  %v290_v14 = vsel %vm250_vm6, %v240_v45, %v333_v10  ;;  %v334_v15 = vadd.f32 -1.0, %v383_v11 }
 0x103   :  { %298 = vst [vmem:[%s501_s3 + $0x30] sm:$0xff] %v290_v14  ;;  %v289_v16 = vsel %vm249_vm7, %v199_v48, %v332_v13 }
 0x104   :  { %297 = vst [vmem:[%s501_s3 + $0x28] sm:$0xff] %v289_v16  ;;  %v291_v17 = vsel %vm251_vm8, %v242_v49, %v334_v15 }
 0x105   :  { %299 = vst [vmem:[%s501_s3 + $0x38] sm:$0xff] %v291_v17 }

// kernel: conv_autoencoder_forward.9
= control target key start
LH: loop header
LB: loop body
LE: loop exit
PB: predicated region body
PF: predicated region fallthrough
CT: control target
= control target key end

     0   :  { %v3835_v59 = vmov 0   ;;  %vm2050_vm0 = vcmask 130048   ;;  %s5030_s2 = inlined_call_operand.vmem [shape: bf16[400,1664], index: 2, kind: input, shape index: {}]   ;;  %s5031_s0 = inlined_call_operand.vmem [shape: bf16[16,400], index: 0, kind: input, shape index: {}]   ;;  %s5032_s1 = inlined_call_operand.vmem [shape: f32[16,1], index: 1, kind: input, shape index: {}]   ;;  %s5033_s3 = inlined_call_operand.vmem [shape: f32[16,1664], index: 3, kind: output, shape index: {}]  }
   0x1   :  { %v3246_v0 = vld [vmem:[%s5030_s2 + $0x4] ss:$52 sps:$4 sm:$0xff]   ;;  %v3248_v1 = vld [vmem:[%s5030_s2 + $0xc] ss:$52 sps:$4 sm:$0xff]   ;;  %v3251_v3 = vld [vmem:[%s5030_s2 + $0x8] ss:$52 sps:$4 sm:$0xff]   ;;  %3245 = vset.pattern.permute.xlu0 %v3835_v59 }
   0x2   :  { %2054 = vmatprep.subr.bf16.mxu0 %v3246_v0  ;;  %v3250_v2 = vld [vmem:[%s5030_s2] ss:$52 sps:$4 sm:$0xff]   ;;  %2140 = vmatprep.subr.bf16.mxu1 %v3248_v1  ;;  %v3256_v6 = vld [vmem:[%s5030_s2 + $0x68] ss:$52 sps:$4 sm:$0xff]   ;;  %v3257_v7 = vld [vmem:[%s5030_s2 + $0x70] ss:$52 sps:$4 sm:$0xff]  }
   0x3   :  { %v3252_v4 = vld [vmem:[%s5030_s2 + $0x6c] ss:$52 sps:$4 sm:$0xff]   ;;  %2055 = vmatpush1.bf16.msra.mxu0 %v3250_v2  ;;  %2141 = vmatpush1.bf16.msra.mxu1 %v3251_v3  ;;  %v3254_v5 = vld [vmem:[%s5030_s2 + $0x74] ss:$52 sps:$4 sm:$0xff]   ;;  %v3260_v9 = vld [vmem:[%s5030_s2 + $0xdc] ss:$52 sps:$4 sm:$0xff]  }
   0x4   :  { %2056 = vmatprep.subr.bf16.mxu0 %v3252_v4  ;;  %2142 = vmatprep.subr.bf16.mxu1 %v3254_v5  ;;  %v3258_v8 = vld [vmem:[%s5030_s2 + $0xd4] ss:$52 sps:$4 sm:$0xff]   ;;  %v3262_v10 = vld [vmem:[%s5030_s2 + $0xd0] ss:$52 sps:$4 sm:$0xff]   ;;  %v3263_v11 = vld [vmem:[%s5030_s2 + $0xd8] ss:$52 sps:$4 sm:$0xff]  }
   0x5   :  { %v3264_v12 = vld [vmem:[%s5030_s2 + $0x13c] ss:$52 sps:$4 sm:$0xff]   ;;  %v3266_v13 = vld [vmem:[%s5030_s2 + $0x144] ss:$52 sps:$4 sm:$0xff]   ;;  %v3269_v15 = vld [vmem:[%s5030_s2 + $0x140] ss:$52 sps:$4 sm:$0xff]  }
   0x6   :  { %v3268_v14 = vld [vmem:[%s5030_s2 + $0x138] ss:$52 sps:$4 sm:$0xff]   ;;  %v3274_v18 = vld [vmem:[%s5030_s2 + $0x1a0] ss:$52 sps:$4 sm:$0xff]   ;;  %v3275_v19 = vld [vmem:[%s5030_s2 + $0x1a8] ss:$52 sps:$4 sm:$0xff]  }
   0x7   :  { %2057 = vmatpush1.bf16.msra.mxu0 %v3256_v6  ;;  %2143 = vmatpush1.bf16.msra.mxu1 %v3257_v7  ;;  %v3270_v16 = vld [vmem:[%s5030_s2 + $0x1a4] ss:$52 sps:$4 sm:$0xff]   ;;  %v3272_v17 = vld [vmem:[%s5030_s2 + $0x1ac] ss:$52 sps:$4 sm:$0xff]   ;;  %v3278_v21 = vld [vmem:[%s5030_s2 + $0x214] ss:$52 sps:$4 sm:$0xff]  }
   0x8   :  { %2058 = vmatprep.subr.bf16.mxu0 %v3258_v8  ;;  %2144 = vmatprep.subr.bf16.mxu1 %v3260_v9  ;;  %v3276_v20 = vld [vmem:[%s5030_s2 + $0x20c] ss:$52 sps:$4 sm:$0xff]   ;;  %v3280_v22 = vld [vmem:[%s5030_s2 + $0x208] ss:$52 sps:$4 sm:$0xff]   ;;  %v3281_v23 = vld [vmem:[%s5030_s2 + $0x210] ss:$52 sps:$4 sm:$0xff]  }
   0x9   :  { %v3282_v24 = vld [vmem:[%s5030_s2 + $0x274] ss:$52 sps:$4 sm:$0xff]   ;;  %v3284_v25 = vld [vmem:[%s5030_s2 + $0x27c] ss:$52 sps:$4 sm:$0xff]   ;;  %v3287_v27 = vld [vmem:[%s5030_s2 + $0x278] ss:$52 sps:$4 sm:$0xff]  }
   0xa   :  { %v3286_v26 = vld [vmem:[%s5030_s2 + $0x270] ss:$52 sps:$4 sm:$0xff]   ;;  %v3292_v30 = vld [vmem:[%s5030_s2 + $0x2d8] ss:$52 sps:$4 sm:$0xff]   ;;  %v3293_v31 = vld [vmem:[%s5030_s2 + $0x2e0] ss:$52 sps:$4 sm:$0xff]  }
   0xb   :  { %2059 = vmatpush1.bf16.msra.mxu0 %v3262_v10  ;;  %2145 = vmatpush1.bf16.msra.mxu1 %v3263_v11  ;;  %v3288_v28 = vld [vmem:[%s5030_s2 + $0x2dc] ss:$52 sps:$4 sm:$0xff]   ;;  %v3290_v29 = vld [vmem:[%s5030_s2 + $0x2e4] ss:$52 sps:$4 sm:$0xff]   ;;  %v3296_v33 = vld [vmem:[%s5030_s2 + $0x34c] ss:$52 sps:$4 sm:$0xff]  }
   0xc   :  { %2060 = vmatprep.subr.bf16.mxu0 %v3264_v12  ;;  %2146 = vmatprep.subr.bf16.mxu1 %v3266_v13  ;;  %v3294_v32 = vld [vmem:[%s5030_s2 + $0x344] ss:$52 sps:$4 sm:$0xff]   ;;  %v3298_v34 = vld [vmem:[%s5030_s2 + $0x340] ss:$52 sps:$4 sm:$0xff]   ;;  %v3299_v35 = vld [vmem:[%s5030_s2 + $0x348] ss:$52 sps:$4 sm:$0xff]  }
   0xd   :  { %v3300_v36 = vld [vmem:[%s5030_s2 + $0x3ac] ss:$52 sps:$4 sm:$0xff]   ;;  %v3302_v37 = vld [vmem:[%s5030_s2 + $0x3b4] ss:$52 sps:$4 sm:$0xff]   ;;  %v3305_v39 = vld [vmem:[%s5030_s2 + $0x3b0] ss:$52 sps:$4 sm:$0xff]  }
   0xe   :  { %v3304_v38 = vld [vmem:[%s5030_s2 + $0x3a8] ss:$52 sps:$4 sm:$0xff]   ;;  %v3310_v42 = vld [vmem:[%s5030_s2 + $0x410] ss:$52 sps:$4 sm:$0xff]   ;;  %v3311_v43 = vld [vmem:[%s5030_s2 + $0x418] ss:$52 sps:$4 sm:$0xff]  }
   0xf   :  { %2061 = vmatpush1.bf16.msra.mxu0 %v3268_v14  ;;  %2147 = vmatpush1.bf16.msra.mxu1 %v3269_v15  ;;  %v3306_v40 = vld [vmem:[%s5030_s2 + $0x414] ss:$52 sps:$4 sm:$0xff]   ;;  %v3308_v41 = vld [vmem:[%s5030_s2 + $0x41c] ss:$52 sps:$4 sm:$0xff]   ;;  %v3314_v45 = vld [vmem:[%s5030_s2 + $0x484] ss:$52 sps:$4 sm:$0xff]  }
  0x10   :  { %2062 = vmatprep.subr.bf16.mxu0 %v3270_v16  ;;  %2148 = vmatprep.subr.bf16.mxu1 %v3272_v17  ;;  %v3312_v44 = vld [vmem:[%s5030_s2 + $0x47c] ss:$52 sps:$4 sm:$0xff]   ;;  %v3316_v46 = vld [vmem:[%s5030_s2 + $0x478] ss:$52 sps:$4 sm:$0xff]   ;;  %v4000_v47 = vld [vmem:[%s5031_s0 + $0x4] ss:$16 sps:$4 sm:$0xff]  }
  0x11   :  { %v3317_v48 = vld [vmem:[%s5030_s2 + $0x480] ss:$52 sps:$4 sm:$0xff]   ;;  %v3318_v49 = vld [vmem:[%s5030_s2 + $0x4e4] ss:$52 sps:$4 sm:$0xff]   ;;  %2086 = vmatprep.mubr.bf16.mxu0 %v4000_v47  ;;  %2172 = vmatprep.mubr.bf16.mxu1 %v4000_v47  ;;  %v3323_v52 = vld [vmem:[%s5030_s2 + $0x4e8] ss:$52 sps:$4 sm:$0xff]  }
  0x12   :  { %v3320_v50 = vld [vmem:[%s5030_s2 + $0x4ec] ss:$52 sps:$4 sm:$0xff]   ;;  %v3326_v54 = vld [vmem:[%s5030_s2 + $0x554] ss:$52 sps:$4 sm:$0xff]   ;;  %v3329_v56 = vld [vmem:[%s5030_s2 + $0x550] ss:$52 sps:$4 sm:$0xff]  }
  0x13   :  { %2063 = vmatpush1.bf16.msra.mxu0 %v3274_v18  ;;  %2149 = vmatpush1.bf16.msra.mxu1 %v3275_v19  ;;  %v3322_v51 = vld [vmem:[%s5030_s2 + $0x4e0] ss:$52 sps:$4 sm:$0xff]   ;;  %v3328_v55 = vld [vmem:[%s5030_s2 + $0x548] ss:$52 sps:$4 sm:$0xff]   ;;  %v3334_v60 = vld [vmem:[%s5030_s2 + $0x5b0] ss:$52 sps:$4 sm:$0xff]  }
  0x14   :  { %2064 = vmatprep.subr.bf16.mxu0 %v3276_v20  ;;  %2150 = vmatprep.subr.bf16.mxu1 %v3278_v21  ;;  %v3324_v53 = vld [vmem:[%s5030_s2 + $0x54c] ss:$52 sps:$4 sm:$0xff]   ;;  %v3330_v57 = vld [vmem:[%s5030_s2 + $0x5b4] ss:$52 sps:$4 sm:$0xff]   ;;  %v3332_v58 = vld [vmem:[%s5030_s2 + $0x5bc] ss:$52 sps:$4 sm:$0xff]  }
  0x15   :  { %v3335_v61 = vld [vmem:[%s5030_s2 + $0x5b8] ss:$52 sps:$4 sm:$0xff]   ;;  %v3336_v62 = vld [vmem:[%s5030_s2 + $0x61c] ss:$52 sps:$4 sm:$0xff]   ;;  %v3341_v1 = vld [vmem:[%s5030_s2 + $0x620] ss:$52 sps:$4 sm:$0xff]  }
  0x16   :  { %v3338_v63 = vld [vmem:[%s5030_s2 + $0x624] ss:$52 sps:$4 sm:$0xff]   ;;  %v3349_v3 = vld [vmem:[%s5030_s2 + $0x68c] ss:$52 sps:$4 sm:$0xff]   ;;  %v3347_v5 = vld [vmem:[%s5030_s2 + $0x688] ss:$52 sps:$4 sm:$0xff]  }
  0x17   :  { %2065 = vmatpush1.bf16.msra.mxu0 %v3280_v22  ;;  %2151 = vmatpush1.bf16.msra.mxu1 %v3281_v23  ;;  %v3340_v0 = vld [vmem:[%s5030_s2 + $0x618] ss:$52 sps:$4 sm:$0xff]   ;;  %v3344_v4 = vld [vmem:[%s5030_s2 + $0x680] ss:$52 sps:$4 sm:$0xff]   ;;  %v3351_v9 = vld [vmem:[%s5030_s2 + $0x6e8] ss:$52 sps:$4 sm:$0xff]  }
  0x18   :  { %2066 = vmatprep.subr.bf16.mxu0 %v3282_v24  ;;  %2152 = vmatprep.subr.bf16.mxu1 %v3284_v25  ;;  %v3346_v2 = vld [vmem:[%s5030_s2 + $0x684] ss:$52 sps:$4 sm:$0xff]   ;;  %v4071_v6 = vld [vmem:[%s5031_s0] ss:$16 sps:$4 sm:$0xff]   ;;  %v3356_v8 = vld [vmem:[%s5030_s2 + $0x6f4] ss:$52 sps:$4 sm:$0xff]  }
  0x19   :  { %v3353_v7 = vld [vmem:[%s5030_s2 + $0x6ec] ss:$52 sps:$4 sm:$0xff]   ;;  %v3354_v10 = vld [vmem:[%s5030_s2 + $0x6f0] ss:$52 sps:$4 sm:$0xff]   ;;  %v3359_v11 = vld [vmem:[%s5030_s2 + $0x754] ss:$52 sps:$4 sm:$0xff]  }
  0x1a   :  { %v4093_v12 = vld [vmem:[%s5031_s0 + $0xc] ss:$16 sps:$4 sm:$0xff]   ;;  %v3357_v14 = vld [vmem:[%s5030_s2 + $0x750] ss:$52 sps:$4 sm:$0xff]   ;;  %v3366_v19 = vld [vmem:[%s5030_s2 + $0x7c0] ss:$52 sps:$4 sm:$0xff]  }
  0x1b   :  { %2067 = vmatpush1.bf16.msra.mxu0 %v3286_v26  ;;  %2153 = vmatpush1.bf16.msra.mxu1 %v3287_v27  ;;  %v3362_v13 = vld [vmem:[%s5030_s2 + $0x75c] ss:$52 sps:$4 sm:$0xff]   ;;  %v3360_v15 = vld [vmem:[%s5030_s2 + $0x758] ss:$52 sps:$4 sm:$0xff]   ;;  %v3369_v22 = vld [vmem:[%s5030_s2 + $0x820] ss:$52 sps:$4 sm:$0xff]  }
  0x1c   :  { %2068 = vmatprep.subr.bf16.mxu0 %v3288_v28  ;;  %2154 = vmatprep.subr.bf16.mxu1 %v3290_v29  ;;  %v3365_v16 = vld [vmem:[%s5030_s2 + $0x7bc] ss:$52 sps:$4 sm:$0xff]   ;;  %v3368_v17 = vld [vmem:[%s5030_s2 + $0x7c4] ss:$52 sps:$4 sm:$0xff]   ;;  %v3374_v21 = vld [vmem:[%s5030_s2 + $0x82c] ss:$52 sps:$4 sm:$0xff]  }
  0x1d   :  { %v3363_v18 = vld [vmem:[%s5030_s2 + $0x7b8] ss:$52 sps:$4 sm:$0xff]   ;;  %v3372_v23 = vld [vmem:[%s5030_s2 + $0x828] ss:$52 sps:$4 sm:$0xff]   ;;  %v3378_v27 = vld [vmem:[%s5030_s2 + $0x890] ss:$52 sps:$4 sm:$0xff]  }
  0x1e   :  { %v3371_v20 = vld [vmem:[%s5030_s2 + $0x824] ss:$52 sps:$4 sm:$0xff]   ;;  %v3377_v24 = vld [vmem:[%s5030_s2 + $0x88c] ss:$52 sps:$4 sm:$0xff]   ;;  %v3380_v25 = vld [vmem:[%s5030_s2 + $0x894] ss:$52 sps:$4 sm:$0xff]  }
  0x1f   :  { %2069 = vmatpush1.bf16.msra.mxu0 %v3292_v30  ;;  %2155 = vmatpush1.bf16.msra.mxu1 %v3293_v31  ;;  %v3375_v26 = vld [vmem:[%s5030_s2 + $0x888] ss:$52 sps:$4 sm:$0xff]   ;;  %v3381_v30 = vld [vmem:[%s5030_s2 + $0x8f0] ss:$52 sps:$4 sm:$0xff]   ;;  %v3384_v31 = vld [vmem:[%s5030_s2 + $0x8f8] ss:$52 sps:$4 sm:$0xff]  }
  0x20   :  { %2070 = vmatprep.subr.bf16.mxu0 %v3294_v32  ;;  %2156 = vmatprep.subr.bf16.mxu1 %v3296_v33  ;;  %v3383_v28 = vld [vmem:[%s5030_s2 + $0x8f4] ss:$52 sps:$4 sm:$0xff]   ;;  %v3386_v29 = vld [vmem:[%s5030_s2 + $0x8fc] ss:$52 sps:$4 sm:$0xff]   ;;  %v3392_v33 = vld [vmem:[%s5030_s2 + $0x964] ss:$52 sps:$4 sm:$0xff]  }
  0x21   :  { %v3389_v32 = vld [vmem:[%s5030_s2 + $0x95c] ss:$52 sps:$4 sm:$0xff]  }
  0x23   :  { %2071 = vmatpush1.bf16.msra.mxu0 %v3298_v34  ;;  %2157 = vmatpush1.bf16.msra.mxu1 %v3299_v35  ;;  %v3387_v34 = vld [vmem:[%s5030_s2 + $0x958] ss:$52 sps:$4 sm:$0xff]   ;;  %v3390_v35 = vld [vmem:[%s5030_s2 + $0x960] ss:$52 sps:$4 sm:$0xff]  }
  0x24   :  { %2072 = vmatprep.subr.bf16.mxu0 %v3300_v36  ;;  %2158 = vmatprep.subr.bf16.mxu1 %v3302_v37  ;;  %v3395_v36 = vld [vmem:[%s5030_s2 + $0x9c4] ss:$52 sps:$4 sm:$0xff]   ;;  %v3398_v37 = vld [vmem:[%s5030_s2 + $0x9cc] ss:$52 sps:$4 sm:$0xff]  }
  0x27   :  { %2073 = vmatpush1.bf16.msra.mxu0 %v3304_v38  ;;  %2159 = vmatpush1.bf16.msra.mxu1 %v3305_v39  ;;  %v3393_v38 = vld [vmem:[%s5030_s2 + $0x9c0] ss:$52 sps:$4 sm:$0xff]   ;;  %v3396_v39 = vld [vmem:[%s5030_s2 + $0x9c8] ss:$52 sps:$4 sm:$0xff]  }
  0x28   :  { %2074 = vmatprep.subr.bf16.mxu0 %v3306_v40  ;;  %2160 = vmatprep.subr.bf16.mxu1 %v3308_v41  ;;  %v3404_v40 = vld [vmem:[%s5030_s2 + $0x14] ss:$52 sps:$4 sm:$0xff]   ;;  %v3407_v41 = vld [vmem:[%s5030_s2 + $0x1c] ss:$52 sps:$4 sm:$0xff]  }
  0x2b   :  { %2075 = vmatpush1.bf16.msra.mxu0 %v3310_v42  ;;  %2161 = vmatpush1.bf16.msra.mxu1 %v3311_v43  ;;  %v4189_v42 = vld [vmem:[%s5031_s0 + $0x8] ss:$16 sps:$4 sm:$0xff]   ;;  %v3402_v43 = vld [vmem:[%s5030_s2 + $0x10] ss:$52 sps:$4 sm:$0xff]  }
  0x2c   :  { %2076 = vmatprep.subr.bf16.mxu0 %v3312_v44  ;;  %2162 = vmatprep.subr.bf16.mxu1 %v3314_v45  ;;  %v3405_v44 = vld [vmem:[%s5030_s2 + $0x18] ss:$52 sps:$4 sm:$0xff]   ;;  %v3410_v45 = vld [vmem:[%s5030_s2 + $0x7c] ss:$52 sps:$4 sm:$0xff]  }
  0x2f   :  { %2077 = vmatpush1.bf16.msra.mxu0 %v3316_v46  ;;  %2163 = vmatpush1.bf16.msra.mxu1 %v3317_v48  ;;  %v3413_v46 = vld [vmem:[%s5030_s2 + $0x84] ss:$52 sps:$4 sm:$0xff]  }
  0x30   :  { %2078 = vmatprep.subr.bf16.mxu0 %v3318_v49  ;;  %2164 = vmatprep.subr.bf16.mxu1 %v3320_v50  ;;  %v3408_v48 = vld [vmem:[%s5030_s2 + $0x78] ss:$52 sps:$4 sm:$0xff]   ;;  %v3411_v49 = vld [vmem:[%s5030_s2 + $0x80] ss:$52 sps:$4 sm:$0xff]  }
  0x31   :  { %v3416_v50 = vld [vmem:[%s5030_s2 + $0xe4] ss:$52 sps:$4 sm:$0xff]  }
  0x33   :  { %2079 = vmatpush1.bf16.msra.mxu0 %v3322_v51  ;;  %2165 = vmatpush1.bf16.msra.mxu1 %v3323_v52  ;;  %v3419_v51 = vld [vmem:[%s5030_s2 + $0xec] ss:$52 sps:$4 sm:$0xff]  }
  0x34   :  { %2080 = vmatprep.subr.bf16.mxu0 %v3324_v53  ;;  %2166 = vmatprep.subr.bf16.mxu1 %v3326_v54  ;;  %v3414_v52 = vld [vmem:[%s5030_s2 + $0xe0] ss:$52 sps:$4 sm:$0xff]   ;;  %v3417_v53 = vld [vmem:[%s5030_s2 + $0xe8] ss:$52 sps:$4 sm:$0xff]  }
  0x35   :  { %v3422_v54 = vld [vmem:[%s5030_s2 + $0x14c] ss:$52 sps:$4 sm:$0xff]  }
  0x37   :  { %2081 = vmatpush1.bf16.msra.mxu0 %v3328_v55  ;;  %2167 = vmatpush1.bf16.msra.mxu1 %v3329_v56  ;;  %v3420_v55 = vld [vmem:[%s5030_s2 + $0x148] ss:$52 sps:$4 sm:$0xff]   ;;  %v3423_v56 = vld [vmem:[%s5030_s2 + $0x150] ss:$52 sps:$4 sm:$0xff]  }
  0x38   :  { %2082 = vmatprep.subr.bf16.mxu0 %v3330_v57  ;;  %2168 = vmatprep.subr.bf16.mxu1 %v3332_v58  ;;  %v3428_v57 = vld [vmem:[%s5030_s2 + $0x1b4] ss:$52 sps:$4 sm:$0xff]   ;;  %v3431_v58 = vld [vmem:[%s5030_s2 + $0x1bc] ss:$52 sps:$4 sm:$0xff]  }
  0x3b   :  { %2083 = vmatpush1.bf16.msra.mxu0 %v3334_v60  ;;  %2169 = vmatpush1.bf16.msra.mxu1 %v3335_v61  ;;  %v3426_v60 = vld [vmem:[%s5030_s2 + $0x1b0] ss:$52 sps:$4 sm:$0xff]   ;;  %v3429_v61 = vld [vmem:[%s5030_s2 + $0x1b8] ss:$52 sps:$4 sm:$0xff]  }
  0x3c   :  { %2084 = vmatprep.subr.bf16.mxu0 %v3336_v62  ;;  %2170 = vmatprep.subr.bf16.mxu1 %v3338_v63  ;;  %v3434_v62 = vld [vmem:[%s5030_s2 + $0x21c] ss:$52 sps:$4 sm:$0xff]   ;;  %v3437_v63 = vld [vmem:[%s5030_s2 + $0x224] ss:$52 sps:$4 sm:$0xff]  }
  0x3f   :  { %2085 = vmatpush1.bf16.msra.mxu0 %v3340_v0  ;;  %2171 = vmatpush1.bf16.msra.mxu1 %v3341_v1  ;;  %v3432_v0 = vld [vmem:[%s5030_s2 + $0x218] ss:$52 sps:$4 sm:$0xff]   ;;  %v3435_v1 = vld [vmem:[%s5030_s2 + $0x220] ss:$52 sps:$4 sm:$0xff]  }
  0x40   :  { %2097 = vmatprep.subr.bf16.mxu0 %v3346_v2  ;;  %2183 = vmatprep.subr.bf16.mxu1 %v3349_v3  ;;  %v3440_v2 = vld [vmem:[%s5030_s2 + $0x284] ss:$52 sps:$4 sm:$0xff]   ;;  %v3443_v3 = vld [vmem:[%s5030_s2 + $0x28c] ss:$52 sps:$4 sm:$0xff]  }
  0x42   :  { %2087 = vmatmul.mubr.bf16.vlgmr.msra.gmra.mrb[0].mxu0 %v4071_v6  ;;  %2173 = vmatmul.mubr.bf16.vlgmr.msra.gmra.mrb[0].mxu1 %v4071_v6 }
  0x43   :  { %2098 = vmatpush1.bf16.msra.mxu0 %v3344_v4  ;;  %2184 = vmatpush1.bf16.msra.mxu1 %v3347_v5  ;;  %v3438_v4 = vld [vmem:[%s5030_s2 + $0x280] ss:$52 sps:$4 sm:$0xff]   ;;  %v3441_v5 = vld [vmem:[%s5030_s2 + $0x288] ss:$52 sps:$4 sm:$0xff]  }
  0x44   :  { %2099 = vmatprep.subr.bf16.mxu0 %v3353_v7  ;;  %2185 = vmatprep.subr.bf16.mxu1 %v3356_v8  ;;  %v3446_v7 = vld [vmem:[%s5030_s2 + $0x2ec] ss:$52 sps:$4 sm:$0xff]   ;;  %v3449_v8 = vld [vmem:[%s5030_s2 + $0x2f4] ss:$52 sps:$4 sm:$0xff]  }
  0x45   :  { %3167 = vmatprep.mubr.msk.bf16.mxu0 %vm2050_vm0, %v4093_v12  ;;  %3168 = vmatprep.mubr.msk.bf16.mxu1 %vm2050_vm0, %v4093_v12 }
  0x47   :  { %2100 = vmatpush1.bf16.msra.mxu0 %v3351_v9  ;;  %2186 = vmatpush1.bf16.msra.mxu1 %v3354_v10  ;;  %v369_v9 = vld [vmem:[%s5032_s1] sm:$0xff]  ;;  %v3444_v10 = vld [vmem:[%s5030_s2 + $0x2e8] ss:$52 sps:$4 sm:$0xff]  }
  0x48   :  { %2101 = vmatprep.subr.bf16.mxu0 %v3359_v11  ;;  %2187 = vmatprep.subr.bf16.mxu1 %v3362_v13  ;;  %v3447_v11 = vld [vmem:[%s5030_s2 + $0x2f0] ss:$52 sps:$4 sm:$0xff]   ;;  %v370_v13 = vld [vmem:[%s5032_s1 + $0x8] sm:$0xff] }
  0x49   :  { %373 = vperm.xlu0 %3245, %v369_v9   ;;  %v3534_v9 = vld [vmem:[%s5030_s2 + $0x900] ss:$52 sps:$4 sm:$0xff]  }
  0x4b   :  { %2102 = vmatpush1.bf16.msra.mxu0 %v3357_v14  ;;  %2188 = vmatpush1.bf16.msra.mxu1 %v3360_v15  ;;  %v3452_v14 = vld [vmem:[%s5030_s2 + $0x354] ss:$52 sps:$4 sm:$0xff]   ;;  %v3455_v15 = vld [vmem:[%s5030_s2 + $0x35c] ss:$52 sps:$4 sm:$0xff]  }
  0x4c   :  { %2103 = vmatprep.subr.bf16.mxu0 %v3365_v16  ;;  %2189 = vmatprep.subr.bf16.mxu1 %v3368_v17  ;;  %v3450_v16 = vld [vmem:[%s5030_s2 + $0x350] ss:$52 sps:$4 sm:$0xff]   ;;  %v3453_v17 = vld [vmem:[%s5030_s2 + $0x358] ss:$52 sps:$4 sm:$0xff]  }
  0x4d   :  { %378 = vperm.xlu0 %3245, %v370_v13   ;;  %v3545_v13 = vld [vmem:[%s5030_s2 + $0x974] ss:$52 sps:$4 sm:$0xff]  }
  0x4f   :  { %2104 = vmatpush1.bf16.msra.mxu0 %v3363_v18  ;;  %2190 = vmatpush1.bf16.msra.mxu1 %v3366_v19  ;;  %v3458_v18 = vld [vmem:[%s5030_s2 + $0x3bc] ss:$52 sps:$4 sm:$0xff]   ;;  %v3461_v19 = vld [vmem:[%s5030_s2 + $0x3c4] ss:$52 sps:$4 sm:$0xff]  }
  0x50   :  { %2105 = vmatprep.subr.bf16.mxu0 %v3371_v20  ;;  %2191 = vmatprep.subr.bf16.mxu1 %v3374_v21  ;;  %v3456_v20 = vld [vmem:[%s5030_s2 + $0x3b8] ss:$52 sps:$4 sm:$0xff]   ;;  %v3459_v21 = vld [vmem:[%s5030_s2 + $0x3c0] ss:$52 sps:$4 sm:$0xff]  }
  0x53   :  { %2106 = vmatpush1.bf16.msra.mxu0 %v3369_v22  ;;  %2192 = vmatpush1.bf16.msra.mxu1 %v3372_v23  ;;  %v3464_v22 = vld [vmem:[%s5030_s2 + $0x424] ss:$52 sps:$4 sm:$0xff]   ;;  %v3467_v23 = vld [vmem:[%s5030_s2 + $0x42c] ss:$52 sps:$4 sm:$0xff]  }
  0x54   :  { %2107 = vmatprep.subr.bf16.mxu0 %v3377_v24  ;;  %2193 = vmatprep.subr.bf16.mxu1 %v3380_v25  ;;  %v3462_v24 = vld [vmem:[%s5030_s2 + $0x420] ss:$52 sps:$4 sm:$0xff]   ;;  %v3465_v25 = vld [vmem:[%s5030_s2 + $0x428] ss:$52 sps:$4 sm:$0xff]  }
  0x57   :  { %2108 = vmatpush1.bf16.msra.mxu0 %v3375_v26  ;;  %2194 = vmatpush1.bf16.msra.mxu1 %v3378_v27  ;;  %v3470_v26 = vld [vmem:[%s5030_s2 + $0x48c] ss:$52 sps:$4 sm:$0xff]   ;;  %v3473_v27 = vld [vmem:[%s5030_s2 + $0x494] ss:$52 sps:$4 sm:$0xff]  }
  0x58   :  { %2109 = vmatprep.subr.bf16.mxu0 %v3383_v28  ;;  %2195 = vmatprep.subr.bf16.mxu1 %v3386_v29  ;;  %v3468_v28 = vld [vmem:[%s5030_s2 + $0x488] ss:$52 sps:$4 sm:$0xff]   ;;  %v3471_v29 = vld [vmem:[%s5030_s2 + $0x490] ss:$52 sps:$4 sm:$0xff]  }
  0x5b   :  { %2110 = vmatpush1.bf16.msra.mxu0 %v3381_v30  ;;  %2196 = vmatpush1.bf16.msra.mxu1 %v3384_v31  ;;  %v3476_v30 = vld [vmem:[%s5030_s2 + $0x4f4] ss:$52 sps:$4 sm:$0xff]   ;;  %v3479_v31 = vld [vmem:[%s5030_s2 + $0x4fc] ss:$52 sps:$4 sm:$0xff]  }
  0x5c   :  { %2111 = vmatprep.subr.bf16.mxu0 %v3389_v32  ;;  %2197 = vmatprep.subr.bf16.mxu1 %v3392_v33  ;;  %v3474_v32 = vld [vmem:[%s5030_s2 + $0x4f0] ss:$52 sps:$4 sm:$0xff]   ;;  %v3477_v33 = vld [vmem:[%s5030_s2 + $0x4f8] ss:$52 sps:$4 sm:$0xff]  }
  0x5f   :  { %2112 = vmatpush1.bf16.msra.mxu0 %v3387_v34  ;;  %2198 = vmatpush1.bf16.msra.mxu1 %v3390_v35  ;;  %v3482_v34 = vld [vmem:[%s5030_s2 + $0x55c] ss:$52 sps:$4 sm:$0xff]   ;;  %v3485_v35 = vld [vmem:[%s5030_s2 + $0x564] ss:$52 sps:$4 sm:$0xff]  }
  0x60   :  { %2113 = vmatprep.subr.bf16.mxu0 %v3395_v36  ;;  %2199 = vmatprep.subr.bf16.mxu1 %v3398_v37  ;;  %v3480_v36 = vld [vmem:[%s5030_s2 + $0x558] ss:$52 sps:$4 sm:$0xff]   ;;  %v3483_v37 = vld [vmem:[%s5030_s2 + $0x560] ss:$52 sps:$4 sm:$0xff]  }
  0x63   :  { %2114 = vmatpush1.bf16.msra.mxu0 %v3393_v38  ;;  %2200 = vmatpush1.bf16.msra.mxu1 %v3396_v39  ;;  %v3488_v38 = vld [vmem:[%s5030_s2 + $0x5c4] ss:$52 sps:$4 sm:$0xff]   ;;  %v3491_v39 = vld [vmem:[%s5030_s2 + $0x5cc] ss:$52 sps:$4 sm:$0xff]  }
  0x64   :  { %2226 = vmatprep.subr.bf16.mxu0 %v3404_v40  ;;  %2312 = vmatprep.subr.bf16.mxu1 %v3407_v41  ;;  %v3486_v40 = vld [vmem:[%s5030_s2 + $0x5c0] ss:$52 sps:$4 sm:$0xff]   ;;  %v3489_v41 = vld [vmem:[%s5030_s2 + $0x5c8] ss:$52 sps:$4 sm:$0xff]  }
  0x66   :  { %2130 = vmatmul.mubr.bf16.vlgmr.msra.gmra.mrb[0].mxu0 %v4189_v42  ;;  %2216 = vmatmul.mubr.bf16.vlgmr.msra.gmra.mrb[0].mxu1 %v4189_v42 }
  0x67   :  { %2227 = vmatpush1.bf16.msra.mxu0 %v3402_v43  ;;  %2313 = vmatpush1.bf16.msra.mxu1 %v3405_v44  ;;  %v3494_v43 = vld [vmem:[%s5030_s2 + $0x62c] ss:$52 sps:$4 sm:$0xff]   ;;  %v3497_v44 = vld [vmem:[%s5030_s2 + $0x634] ss:$52 sps:$4 sm:$0xff]  }
  0x68   :  { %2228 = vmatprep.subr.bf16.mxu0 %v3410_v45  ;;  %2314 = vmatprep.subr.bf16.mxu1 %v3413_v46  ;;  %v3492_v45 = vld [vmem:[%s5030_s2 + $0x628] ss:$52 sps:$4 sm:$0xff]   ;;  %v3495_v46 = vld [vmem:[%s5030_s2 + $0x630] ss:$52 sps:$4 sm:$0xff]  }
  0x69   :  { %2258 = vmatprep.mubr.bf16.mxu0 %v4000_v47  ;;  %2344 = vmatprep.mubr.bf16.mxu1 %v4000_v47  ;;  %v3425_v47 = vld [vmem:[%s5030_s2 + $0x154] ss:$52 sps:$4 sm:$0xff]  }
  0x6b   :  { %2229 = vmatpush1.bf16.msra.mxu0 %v3408_v48  ;;  %2315 = vmatpush1.bf16.msra.mxu1 %v3411_v49  ;;  %v3500_v48 = vld [vmem:[%s5030_s2 + $0x694] ss:$52 sps:$4 sm:$0xff]   ;;  %v3503_v49 = vld [vmem:[%s5030_s2 + $0x69c] ss:$52 sps:$4 sm:$0xff]  }
  0x6c   :  { %2230 = vmatprep.subr.bf16.mxu0 %v3416_v50  ;;  %2316 = vmatprep.subr.bf16.mxu1 %v3419_v51  ;;  %v3498_v50 = vld [vmem:[%s5030_s2 + $0x690] ss:$52 sps:$4 sm:$0xff]   ;;  %v3501_v51 = vld [vmem:[%s5030_s2 + $0x698] ss:$52 sps:$4 sm:$0xff]  }
  0x6f   :  { %2231 = vmatpush1.bf16.msra.mxu0 %v3414_v52  ;;  %2317 = vmatpush1.bf16.msra.mxu1 %v3417_v53  ;;  %v3506_v52 = vld [vmem:[%s5030_s2 + $0x6fc] ss:$52 sps:$4 sm:$0xff]   ;;  %v3509_v53 = vld [vmem:[%s5030_s2 + $0x704] ss:$52 sps:$4 sm:$0xff]  }
  0x70   :  { %2232 = vmatprep.subr.bf16.mxu0 %v3422_v54  ;;  %2318 = vmatprep.subr.bf16.mxu1 %v3425_v47  ;;  %v3504_v54 = vld [vmem:[%s5030_s2 + $0x6f8] ss:$52 sps:$4 sm:$0xff]   ;;  %v3507_v47 = vld [vmem:[%s5030_s2 + $0x700] ss:$52 sps:$4 sm:$0xff]  }
  0x73   :  { %2233 = vmatpush1.bf16.msra.mxu0 %v3420_v55  ;;  %2319 = vmatpush1.bf16.msra.mxu1 %v3423_v56  ;;  %v3512_v55 = vld [vmem:[%s5030_s2 + $0x764] ss:$52 sps:$4 sm:$0xff]   ;;  %v3510_v56 = vld [vmem:[%s5030_s2 + $0x760] ss:$52 sps:$4 sm:$0xff]  }
  0x74   :  { %2234 = vmatprep.subr.bf16.mxu0 %v3428_v57  ;;  %2320 = vmatprep.subr.bf16.mxu1 %v3431_v58  ;;  %v3513_v57 = vld [vmem:[%s5030_s2 + $0x768] ss:$52 sps:$4 sm:$0xff]   ;;  %v3518_v58 = vld [vmem:[%s5030_s2 + $0x7cc] ss:$52 sps:$4 sm:$0xff]  }
  0x77   :  { %2235 = vmatpush1.bf16.msra.mxu0 %v3426_v60  ;;  %2321 = vmatpush1.bf16.msra.mxu1 %v3429_v61  ;;  %v3516_v60 = vld [vmem:[%s5030_s2 + $0x7c8] ss:$52 sps:$4 sm:$0xff]   ;;  %v3519_v61 = vld [vmem:[%s5030_s2 + $0x7d0] ss:$52 sps:$4 sm:$0xff]  }
  0x78   :  { %2236 = vmatprep.subr.bf16.mxu0 %v3434_v62  ;;  %2322 = vmatprep.subr.bf16.mxu1 %v3437_v63  ;;  %v3524_v62 = vld [vmem:[%s5030_s2 + $0x834] ss:$52 sps:$4 sm:$0xff]   ;;  %v3527_v63 = vld [vmem:[%s5030_s2 + $0x83c] ss:$52 sps:$4 sm:$0xff]  }
  0x7b   :  { %2237 = vmatpush1.bf16.msra.mxu0 %v3432_v0  ;;  %2323 = vmatpush1.bf16.msra.mxu1 %v3435_v1  ;;  %v3522_v0 = vld [vmem:[%s5030_s2 + $0x830] ss:$52 sps:$4 sm:$0xff]   ;;  %v3525_v1 = vld [vmem:[%s5030_s2 + $0x838] ss:$52 sps:$4 sm:$0xff]  }
  0x7c   :  { %2238 = vmatprep.subr.bf16.mxu0 %v3440_v2  ;;  %2324 = vmatprep.subr.bf16.mxu1 %v3443_v3  ;;  %v3530_v2 = vld [vmem:[%s5030_s2 + $0x89c] ss:$52 sps:$4 sm:$0xff]   ;;  %v3533_v3 = vld [vmem:[%s5030_s2 + $0x8a4] ss:$52 sps:$4 sm:$0xff]  }
  0x7f   :  { %2239 = vmatpush1.bf16.msra.mxu0 %v3438_v4  ;;  %2325 = vmatpush1.bf16.msra.mxu1 %v3441_v5  ;;  %v3528_v4 = vld [vmem:[%s5030_s2 + $0x898] ss:$52 sps:$4 sm:$0xff]   ;;  %v3531_v5 = vld [vmem:[%s5030_s2 + $0x8a0] ss:$52 sps:$4 sm:$0xff]  }
  0x80   :  { %2240 = vmatprep.subr.bf16.mxu0 %v3446_v7  ;;  %2326 = vmatprep.subr.bf16.mxu1 %v3449_v8  ;;  %v3536_v7 = vld [vmem:[%s5030_s2 + $0x904] ss:$52 sps:$4 sm:$0xff]   ;;  %v3539_v8 = vld [vmem:[%s5030_s2 + $0x90c] ss:$52 sps:$4 sm:$0xff]  }
  0x83   :  { %2241 = vmatpush1.bf16.msra.mxu0 %v3444_v10  ;;  %2327 = vmatpush1.bf16.msra.mxu1 %v3447_v11  ;;  %v3537_v10 = vld [vmem:[%s5030_s2 + $0x908] ss:$52 sps:$4 sm:$0xff]   ;;  %v3542_v11 = vld [vmem:[%s5030_s2 + $0x96c] ss:$52 sps:$4 sm:$0xff]  }
  0x84   :  { %2242 = vmatprep.subr.bf16.mxu0 %v3452_v14  ;;  %2328 = vmatprep.subr.bf16.mxu1 %v3455_v15  ;;  %v3540_v14 = vld [vmem:[%s5030_s2 + $0x968] ss:$52 sps:$4 sm:$0xff]   ;;  %v3543_v15 = vld [vmem:[%s5030_s2 + $0x970] ss:$52 sps:$4 sm:$0xff]  }
  0x87   :  { %2243 = vmatpush1.bf16.msra.mxu0 %v3450_v16  ;;  %2329 = vmatpush1.bf16.msra.mxu1 %v3453_v17  ;;  %v3548_v16 = vld [vmem:[%s5030_s2 + $0x9d4] ss:$52 sps:$4 sm:$0xff]   ;;  %v3551_v17 = vld [vmem:[%s5030_s2 + $0x9dc] ss:$52 sps:$4 sm:$0xff]  }
  0x88   :  { %2244 = vmatprep.subr.bf16.mxu0 %v3458_v18  ;;  %2330 = vmatprep.subr.bf16.mxu1 %v3461_v19  ;;  %v3546_v18 = vld [vmem:[%s5030_s2 + $0x9d0] ss:$52 sps:$4 sm:$0xff]   ;;  %v3549_v19 = vld [vmem:[%s5030_s2 + $0x9d8] ss:$52 sps:$4 sm:$0xff]  }
  0x8b   :  { %2245 = vmatpush1.bf16.msra.mxu0 %v3456_v20  ;;  %2331 = vmatpush1.bf16.msra.mxu1 %v3459_v21  ;;  %v3554_v20 = vld [vmem:[%s5030_s2 + $0x24] ss:$52 sps:$4 sm:$0xff]   ;;  %v3557_v21 = vld [vmem:[%s5030_s2 + $0x2c] ss:$52 sps:$4 sm:$0xff]  }
  0x8c   :  { %2246 = vmatprep.subr.bf16.mxu0 %v3464_v22  ;;  %2332 = vmatprep.subr.bf16.mxu1 %v3467_v23  ;;  %v3552_v22 = vld [vmem:[%s5030_s2 + $0x20] ss:$52 sps:$4 sm:$0xff]   ;;  %v3555_v23 = vld [vmem:[%s5030_s2 + $0x28] ss:$52 sps:$4 sm:$0xff]  }
  0x8f   :  { %2247 = vmatpush1.bf16.msra.mxu0 %v3462_v24  ;;  %2333 = vmatpush1.bf16.msra.mxu1 %v3465_v25  ;;  %v3560_v24 = vld [vmem:[%s5030_s2 + $0x8c] ss:$52 sps:$4 sm:$0xff]   ;;  %v3563_v25 = vld [vmem:[%s5030_s2 + $0x94] ss:$52 sps:$4 sm:$0xff]  }
  0x90   :  { %2248 = vmatprep.subr.bf16.mxu0 %v3470_v26  ;;  %2334 = vmatprep.subr.bf16.mxu1 %v3473_v27  ;;  %v3558_v26 = vld [vmem:[%s5030_s2 + $0x88] ss:$52 sps:$4 sm:$0xff]   ;;  %v3561_v27 = vld [vmem:[%s5030_s2 + $0x90] ss:$52 sps:$4 sm:$0xff]  }
  0x93   :  { %2249 = vmatpush1.bf16.msra.mxu0 %v3468_v28  ;;  %2335 = vmatpush1.bf16.msra.mxu1 %v3471_v29  ;;  %v3566_v28 = vld [vmem:[%s5030_s2 + $0xf4] ss:$52 sps:$4 sm:$0xff]   ;;  %v3569_v29 = vld [vmem:[%s5030_s2 + $0xfc] ss:$52 sps:$4 sm:$0xff]  }
  0x94   :  { %2250 = vmatprep.subr.bf16.mxu0 %v3476_v30  ;;  %2336 = vmatprep.subr.bf16.mxu1 %v3479_v31  ;;  %v4539_v30 = vld [vmem:[%s5031_s0 + $0x4] ss:$16 sps:$4 sm:$0xff]   ;;  %v3567_v31 = vld [vmem:[%s5030_s2 + $0xf8] ss:$52 sps:$4 sm:$0xff]  }
  0x97   :  { %2251 = vmatpush1.bf16.msra.mxu0 %v3474_v32  ;;  %2337 = vmatpush1.bf16.msra.mxu1 %v3477_v33  ;;  %v3572_v32 = vld [vmem:[%s5030_s2 + $0x15c] ss:$52 sps:$4 sm:$0xff]   ;;  %v3575_v33 = vld [vmem:[%s5030_s2 + $0x164] ss:$52 sps:$4 sm:$0xff]  }
  0x98   :  { %2252 = vmatprep.subr.bf16.mxu0 %v3482_v34  ;;  %2338 = vmatprep.subr.bf16.mxu1 %v3485_v35  ;;  %v3570_v34 = vld [vmem:[%s5030_s2 + $0x158] ss:$52 sps:$4 sm:$0xff]   ;;  %v3573_v35 = vld [vmem:[%s5030_s2 + $0x160] ss:$52 sps:$4 sm:$0xff]  }
  0x9b   :  { %2253 = vmatpush1.bf16.msra.mxu0 %v3480_v36  ;;  %2339 = vmatpush1.bf16.msra.mxu1 %v3483_v37  ;;  %v3578_v36 = vld [vmem:[%s5030_s2 + $0x1c4] ss:$52 sps:$4 sm:$0xff]   ;;  %v3581_v37 = vld [vmem:[%s5030_s2 + $0x1cc] ss:$52 sps:$4 sm:$0xff]  }
  0x9c   :  { %2254 = vmatprep.subr.bf16.mxu0 %v3488_v38  ;;  %2340 = vmatprep.subr.bf16.mxu1 %v3491_v39  ;;  %v3576_v38 = vld [vmem:[%s5030_s2 + $0x1c0] ss:$52 sps:$4 sm:$0xff]   ;;  %v3579_v39 = vld [vmem:[%s5030_s2 + $0x1c8] ss:$52 sps:$4 sm:$0xff]  }
  0x9f   :  { %2255 = vmatpush1.bf16.msra.mxu0 %v3486_v40  ;;  %2341 = vmatpush1.bf16.msra.mxu1 %v3489_v41  ;;  %v3584_v40 = vld [vmem:[%s5030_s2 + $0x22c] ss:$52 sps:$4 sm:$0xff]   ;;  %v3587_v41 = vld [vmem:[%s5030_s2 + $0x234] ss:$52 sps:$4 sm:$0xff]  }
  0xa0   :  { %2256 = vmatprep.subr.bf16.mxu0 %v3494_v43  ;;  %2342 = vmatprep.subr.bf16.mxu1 %v3497_v44  ;;  %v3582_v43 = vld [vmem:[%s5030_s2 + $0x228] ss:$52 sps:$4 sm:$0xff]   ;;  %v3585_v44 = vld [vmem:[%s5030_s2 + $0x230] ss:$52 sps:$4 sm:$0xff]  }
  0xa3   :  { %2257 = vmatpush1.bf16.msra.mxu0 %v3492_v45  ;;  %2343 = vmatpush1.bf16.msra.mxu1 %v3495_v46  ;;  %v3590_v45 = vld [vmem:[%s5030_s2 + $0x294] ss:$52 sps:$4 sm:$0xff]   ;;  %v3593_v46 = vld [vmem:[%s5030_s2 + $0x29c] ss:$52 sps:$4 sm:$0xff]  }
  0xa4   :  { %2269 = vmatprep.subr.bf16.mxu0 %v3500_v48  ;;  %2355 = vmatprep.subr.bf16.mxu1 %v3503_v49  ;;  %v3588_v48 = vld [vmem:[%s5030_s2 + $0x290] ss:$52 sps:$4 sm:$0xff]   ;;  %v3591_v49 = vld [vmem:[%s5030_s2 + $0x298] ss:$52 sps:$4 sm:$0xff]  }
  0xa6   :  { %2259 = vmatmul.mubr.bf16.vlgmr.msra.gmra.mrb[4].mxu0 %v4071_v6  ;;  %2345 = vmatmul.mubr.bf16.vlgmr.msra.gmra.mrb[4].mxu1 %v4071_v6  ;;  %v3515_v6 = vld [vmem:[%s5030_s2 + $0x76c] ss:$52 sps:$4 sm:$0xff]  }
  0xa7   :  { %2270 = vmatpush1.bf16.msra.mxu0 %v3498_v50  ;;  %2356 = vmatpush1.bf16.msra.mxu1 %v3501_v51  ;;  %v3596_v50 = vld [vmem:[%s5030_s2 + $0x2fc] ss:$52 sps:$4 sm:$0xff]   ;;  %v3599_v51 = vld [vmem:[%s5030_s2 + $0x304] ss:$52 sps:$4 sm:$0xff]  }
  0xa8   :  { %2271 = vmatprep.subr.bf16.mxu0 %v3506_v52  ;;  %2357 = vmatprep.subr.bf16.mxu1 %v3509_v53  ;;  %v3594_v52 = vld [vmem:[%s5030_s2 + $0x2f8] ss:$52 sps:$4 sm:$0xff]   ;;  %v3597_v53 = vld [vmem:[%s5030_s2 + $0x300] ss:$52 sps:$4 sm:$0xff]  }
  0xa9   :  { %3169 = vmatprep.mubr.msk.bf16.mxu0 %vm2050_vm0, %v4093_v12  ;;  %3170 = vmatprep.mubr.msk.bf16.mxu1 %vm2050_vm0, %v4093_v12  ;;  %v3521_v12 = vld [vmem:[%s5030_s2 + $0x7d4] ss:$52 sps:$4 sm:$0xff]  }
  0xab   :  { %2272 = vmatpush1.bf16.msra.mxu0 %v3504_v54  ;;  %2358 = vmatpush1.bf16.msra.mxu1 %v3507_v47  ;;  %v3602_v54 = vld [vmem:[%s5030_s2 + $0x364] ss:$52 sps:$4 sm:$0xff]   ;;  %v3605_v47 = vld [vmem:[%s5030_s2 + $0x36c] ss:$52 sps:$4 sm:$0xff]  }
  0xac   :  { %2273 = vmatprep.subr.bf16.mxu0 %v3512_v55  ;;  %2359 = vmatprep.subr.bf16.mxu1 %v3515_v6  ;;  %v3600_v55 = vld [vmem:[%s5030_s2 + $0x360] ss:$52 sps:$4 sm:$0xff]   ;;  %v3603_v6 = vld [vmem:[%s5030_s2 + $0x368] ss:$52 sps:$4 sm:$0xff]  }
  0xaf   :  { %2274 = vmatpush1.bf16.msra.mxu0 %v3510_v56  ;;  %2360 = vmatpush1.bf16.msra.mxu1 %v3513_v57  ;;  %v3608_v56 = vld [vmem:[%s5030_s2 + $0x3cc] ss:$52 sps:$4 sm:$0xff]   ;;  %v3611_v57 = vld [vmem:[%s5030_s2 + $0x3d4] ss:$52 sps:$4 sm:$0xff]  }
  0xb0   :  { %2275 = vmatprep.subr.bf16.mxu0 %v3518_v58  ;;  %2361 = vmatprep.subr.bf16.mxu1 %v3521_v12  ;;  %v3606_v58 = vld [vmem:[%s5030_s2 + $0x3c8] ss:$52 sps:$4 sm:$0xff]   ;;  %v3609_v12 = vld [vmem:[%s5030_s2 + $0x3d0] ss:$52 sps:$4 sm:$0xff]  }
  0xb3   :  { %2276 = vmatpush1.bf16.msra.mxu0 %v3516_v60  ;;  %2362 = vmatpush1.bf16.msra.mxu1 %v3519_v61  ;;  %v3614_v60 = vld [vmem:[%s5030_s2 + $0x434] ss:$52 sps:$4 sm:$0xff]   ;;  %v3617_v61 = vld [vmem:[%s5030_s2 + $0x43c] ss:$52 sps:$4 sm:$0xff]  }
  0xb4   :  { %2277 = vmatprep.subr.bf16.mxu0 %v3524_v62  ;;  %2363 = vmatprep.subr.bf16.mxu1 %v3527_v63  ;;  %v3612_v62 = vld [vmem:[%s5030_s2 + $0x430] ss:$52 sps:$4 sm:$0xff]   ;;  %v3615_v63 = vld [vmem:[%s5030_s2 + $0x438] ss:$52 sps:$4 sm:$0xff]  }
  0xb7   :  { %2278 = vmatpush1.bf16.msra.mxu0 %v3522_v0  ;;  %2364 = vmatpush1.bf16.msra.mxu1 %v3525_v1  ;;  %v3620_v0 = vld [vmem:[%s5030_s2 + $0x49c] ss:$52 sps:$4 sm:$0xff]   ;;  %v3623_v1 = vld [vmem:[%s5030_s2 + $0x4a4] ss:$52 sps:$4 sm:$0xff]  }
  0xb8   :  { %2279 = vmatprep.subr.bf16.mxu0 %v3530_v2  ;;  %2365 = vmatprep.subr.bf16.mxu1 %v3533_v3  ;;  %v3618_v2 = vld [vmem:[%s5030_s2 + $0x498] ss:$52 sps:$4 sm:$0xff]   ;;  %v3621_v3 = vld [vmem:[%s5030_s2 + $0x4a0] ss:$52 sps:$4 sm:$0xff]  }
  0xbb   :  { %2280 = vmatpush1.bf16.msra.mxu0 %v3528_v4  ;;  %2366 = vmatpush1.bf16.msra.mxu1 %v3531_v5  ;;  %v3626_v4 = vld [vmem:[%s5030_s2 + $0x504] ss:$52 sps:$4 sm:$0xff]   ;;  %v3629_v5 = vld [vmem:[%s5030_s2 + $0x50c] ss:$52 sps:$4 sm:$0xff]  }
  0xbc   :  { %2281 = vmatprep.subr.bf16.mxu0 %v3536_v7  ;;  %2367 = vmatprep.subr.bf16.mxu1 %v3539_v8  ;;  %v3624_v7 = vld [vmem:[%s5030_s2 + $0x500] ss:$52 sps:$4 sm:$0xff]   ;;  %v3627_v8 = vld [vmem:[%s5030_s2 + $0x508] ss:$52 sps:$4 sm:$0xff]  }
  0xbf   :  { %2282 = vmatpush1.bf16.msra.mxu0 %v3534_v9  ;;  %2368 = vmatpush1.bf16.msra.mxu1 %v3537_v10  ;;  %v3632_v9 = vld [vmem:[%s5030_s2 + $0x56c] ss:$52 sps:$4 sm:$0xff]   ;;  %v3635_v10 = vld [vmem:[%s5030_s2 + $0x574] ss:$52 sps:$4 sm:$0xff]  }
  0xc0   :  { %2283 = vmatprep.subr.bf16.mxu0 %v3542_v11  ;;  %2369 = vmatprep.subr.bf16.mxu1 %v3545_v13  ;;  %v3630_v11 = vld [vmem:[%s5030_s2 + $0x568] ss:$52 sps:$4 sm:$0xff]   ;;  %v3633_v13 = vld [vmem:[%s5030_s2 + $0x570] ss:$52 sps:$4 sm:$0xff]  }
  0xc3   :  { %2284 = vmatpush1.bf16.msra.mxu0 %v3540_v14  ;;  %2370 = vmatpush1.bf16.msra.mxu1 %v3543_v15  ;;  %v3638_v14 = vld [vmem:[%s5030_s2 + $0x5d4] ss:$52 sps:$4 sm:$0xff]   ;;  %v3641_v15 = vld [vmem:[%s5030_s2 + $0x5dc] ss:$52 sps:$4 sm:$0xff]  }
  0xc4   :  { %2285 = vmatprep.subr.bf16.mxu0 %v3548_v16  ;;  %2371 = vmatprep.subr.bf16.mxu1 %v3551_v17  ;;  %v3636_v16 = vld [vmem:[%s5030_s2 + $0x5d0] ss:$52 sps:$4 sm:$0xff]   ;;  %v3639_v17 = vld [vmem:[%s5030_s2 + $0x5d8] ss:$52 sps:$4 sm:$0xff]  }
  0xc7   :  { %2286 = vmatpush1.bf16.msra.mxu0 %v3546_v18  ;;  %2372 = vmatpush1.bf16.msra.mxu1 %v3549_v19  ;;  %v3644_v18 = vld [vmem:[%s5030_s2 + $0x63c] ss:$52 sps:$4 sm:$0xff]   ;;  %v3647_v19 = vld [vmem:[%s5030_s2 + $0x644] ss:$52 sps:$4 sm:$0xff]  }
  0xc8   :  { %2398 = vmatprep.subr.bf16.mxu0 %v3554_v20  ;;  %2484 = vmatprep.subr.bf16.mxu1 %v3557_v21  ;;  %v3642_v20 = vld [vmem:[%s5030_s2 + $0x638] ss:$52 sps:$4 sm:$0xff]   ;;  %v3645_v21 = vld [vmem:[%s5030_s2 + $0x640] ss:$52 sps:$4 sm:$0xff]  }
  0xca   :  { %2302 = vmatmul.mubr.bf16.vlgmr.msra.gmra.mrb[4].mxu0 %v4189_v42  ;;  %2388 = vmatmul.mubr.bf16.vlgmr.msra.gmra.mrb[4].mxu1 %v4189_v42  ;;  %v3564_v42 = vld [vmem:[%s5030_s2 + $0xf0] ss:$52 sps:$4 sm:$0xff]  }
  0xcb   :  { %2399 = vmatpush1.bf16.msra.mxu0 %v3552_v22  ;;  %2485 = vmatpush1.bf16.msra.mxu1 %v3555_v23  ;;  %v3650_v22 = vld [vmem:[%s5030_s2 + $0x6a4] ss:$52 sps:$4 sm:$0xff]   ;;  %v3653_v23 = vld [vmem:[%s5030_s2 + $0x6ac] ss:$52 sps:$4 sm:$0xff]  }
  0xcc   :  { %2400 = vmatprep.subr.bf16.mxu0 %v3560_v24  ;;  %2486 = vmatprep.subr.bf16.mxu1 %v3563_v25  ;;  %v3648_v24 = vld [vmem:[%s5030_s2 + $0x6a0] ss:$52 sps:$4 sm:$0xff]   ;;  %v3651_v25 = vld [vmem:[%s5030_s2 + $0x6a8] ss:$52 sps:$4 sm:$0xff]  }
  0xcd   :  { %2430 = vmatprep.mubr.bf16.mxu0 %v4539_v30  ;;  %2516 = vmatprep.mubr.bf16.mxu1 %v4539_v30 }
  0xcf   :  { %2401 = vmatpush1.bf16.msra.mxu0 %v3558_v26  ;;  %2487 = vmatpush1.bf16.msra.mxu1 %v3561_v27  ;;  %v3656_v26 = vld [vmem:[%s5030_s2 + $0x70c] ss:$52 sps:$4 sm:$0xff]   ;;  %v3659_v27 = vld [vmem:[%s5030_s2 + $0x714] ss:$52 sps:$4 sm:$0xff]  }
  0xd0   :  { %2402 = vmatprep.subr.bf16.mxu0 %v3566_v28  ;;  %2488 = vmatprep.subr.bf16.mxu1 %v3569_v29  ;;  %v4723_v28 = vld [vmem:[%s5031_s0] ss:$16 sps:$4 sm:$0xff]   ;;  %v3654_v29 = vld [vmem:[%s5030_s2 + $0x708] ss:$52 sps:$4 sm:$0xff]  }
  0xd3   :  { %2403 = vmatpush1.bf16.msra.mxu0 %v3564_v42  ;;  %2489 = vmatpush1.bf16.msra.mxu1 %v3567_v31  ;;  %v3657_v42 = vld [vmem:[%s5030_s2 + $0x710] ss:$52 sps:$4 sm:$0xff]   ;;  %v3662_v31 = vld [vmem:[%s5030_s2 + $0x774] ss:$52 sps:$4 sm:$0xff]  }
  0xd4   :  { %2404 = vmatprep.subr.bf16.mxu0 %v3572_v32  ;;  %2490 = vmatprep.subr.bf16.mxu1 %v3575_v33  ;;  %v3665_v32 = vld [vmem:[%s5030_s2 + $0x77c] ss:$52 sps:$4 sm:$0xff]  }
  0xd5   :  { %v4742_v33 = vld [vmem:[%s5031_s0 + $0xc] ss:$16 sps:$4 sm:$0xff]  }
  0xd7   :  { %2405 = vmatpush1.bf16.msra.mxu0 %v3570_v34  ;;  %2491 = vmatpush1.bf16.msra.mxu1 %v3573_v35  ;;  %v3660_v34 = vld [vmem:[%s5030_s2 + $0x770] ss:$52 sps:$4 sm:$0xff]   ;;  %v3663_v35 = vld [vmem:[%s5030_s2 + $0x778] ss:$52 sps:$4 sm:$0xff]  }
  0xd8   :  { %2406 = vmatprep.subr.bf16.mxu0 %v3578_v36  ;;  %2492 = vmatprep.subr.bf16.mxu1 %v3581_v37  ;;  %v3668_v36 = vld [vmem:[%s5030_s2 + $0x7dc] ss:$52 sps:$4 sm:$0xff]   ;;  %v3671_v37 = vld [vmem:[%s5030_s2 + $0x7e4] ss:$52 sps:$4 sm:$0xff]  }
  0xdb   :  { %2407 = vmatpush1.bf16.msra.mxu0 %v3576_v38  ;;  %2493 = vmatpush1.bf16.msra.mxu1 %v3579_v39  ;;  %v3666_v38 = vld [vmem:[%s5030_s2 + $0x7d8] ss:$52 sps:$4 sm:$0xff]   ;;  %v3669_v39 = vld [vmem:[%s5030_s2 + $0x7e0] ss:$52 sps:$4 sm:$0xff]  }
  0xdc   :  { %2408 = vmatprep.subr.bf16.mxu0 %v3584_v40  ;;  %2494 = vmatprep.subr.bf16.mxu1 %v3587_v41  ;;  %v3674_v40 = vld [vmem:[%s5030_s2 + $0x844] ss:$52 sps:$4 sm:$0xff]   ;;  %v3677_v41 = vld [vmem:[%s5030_s2 + $0x84c] ss:$52 sps:$4 sm:$0xff]  }
  0xdf   :  { %2409 = vmatpush1.bf16.msra.mxu0 %v3582_v43  ;;  %2495 = vmatpush1.bf16.msra.mxu1 %v3585_v44  ;;  %v3672_v43 = vld [vmem:[%s5030_s2 + $0x840] ss:$52 sps:$4 sm:$0xff]   ;;  %v3675_v44 = vld [vmem:[%s5030_s2 + $0x848] ss:$52 sps:$4 sm:$0xff]  }
  0xe0   :  { %2410 = vmatprep.subr.bf16.mxu0 %v3590_v45  ;;  %2496 = vmatprep.subr.bf16.mxu1 %v3593_v46  ;;  %v3680_v45 = vld [vmem:[%s5030_s2 + $0x8ac] ss:$52 sps:$4 sm:$0xff]   ;;  %v3683_v46 = vld [vmem:[%s5030_s2 + $0x8b4] ss:$52 sps:$4 sm:$0xff]  }
  0xe3   :  { %2411 = vmatpush1.bf16.msra.mxu0 %v3588_v48  ;;  %2497 = vmatpush1.bf16.msra.mxu1 %v3591_v49  ;;  %v3678_v48 = vld [vmem:[%s5030_s2 + $0x8a8] ss:$52 sps:$4 sm:$0xff]   ;;  %v3681_v49 = vld [vmem:[%s5030_s2 + $0x8b0] ss:$52 sps:$4 sm:$0xff]  }
  0xe4   :  { %2412 = vmatprep.subr.bf16.mxu0 %v3596_v50  ;;  %2498 = vmatprep.subr.bf16.mxu1 %v3599_v51  ;;  %v3686_v50 = vld [vmem:[%s5030_s2 + $0x914] ss:$52 sps:$4 sm:$0xff]   ;;  %v3689_v51 = vld [vmem:[%s5030_s2 + $0x91c] ss:$52 sps:$4 sm:$0xff]  }
  0xe7   :  { %2413 = vmatpush1.bf16.msra.mxu0 %v3594_v52  ;;  %2499 = vmatpush1.bf16.msra.mxu1 %v3597_v53  ;;  %v3684_v52 = vld [vmem:[%s5030_s2 + $0x910] ss:$52 sps:$4 sm:$0xff]   ;;  %v3687_v53 = vld [vmem:[%s5030_s2 + $0x918] ss:$52 sps:$4 sm:$0xff]  }
  0xe8   :  { %2414 = vmatprep.subr.bf16.mxu0 %v3602_v54  ;;  %2500 = vmatprep.subr.bf16.mxu1 %v3605_v47  ;;  %v3692_v54 = vld [vmem:[%s5030_s2 + $0x97c] ss:$52 sps:$4 sm:$0xff]   ;;  %v3695_v47 = vld [vmem:[%s5030_s2 + $0x984] ss:$52 sps:$4 sm:$0xff]  }
  0xeb   :  { %2415 = vmatpush1.bf16.msra.mxu0 %v3600_v55  ;;  %2501 = vmatpush1.bf16.msra.mxu1 %v3603_v6  ;;  %v3690_v55 = vld [vmem:[%s5030_s2 + $0x978] ss:$52 sps:$4 sm:$0xff]   ;;  %v3693_v6 = vld [vmem:[%s5030_s2 + $0x980] ss:$52 sps:$4 sm:$0xff]  }
  0xec   :  { %2416 = vmatprep.subr.bf16.mxu0 %v3608_v56  ;;  %2502 = vmatprep.subr.bf16.mxu1 %v3611_v57  ;;  %v3698_v56 = vld [vmem:[%s5030_s2 + $0x9e4] ss:$52 sps:$4 sm:$0xff]   ;;  %v3701_v57 = vld [vmem:[%s5030_s2 + $0x9ec] ss:$52 sps:$4 sm:$0xff]  }
  0xef   :  { %2417 = vmatpush1.bf16.msra.mxu0 %v3606_v58  ;;  %2503 = vmatpush1.bf16.msra.mxu1 %v3609_v12  ;;  %v3696_v58 = vld [vmem:[%s5030_s2 + $0x9e0] ss:$52 sps:$4 sm:$0xff]   ;;  %v3699_v12 = vld [vmem:[%s5030_s2 + $0x9e8] ss:$52 sps:$4 sm:$0xff]  }
  0xf0   :  { %2418 = vmatprep.subr.bf16.mxu0 %v3614_v60  ;;  %2504 = vmatprep.subr.bf16.mxu1 %v3617_v61  ;;  %v3702_v60 = vld [vmem:[%s5030_s2 + $0x370] ss:$52 sps:$4 sm:$0xff]  }
  0xf1   :  { %v3703_v61 = vld [vmem:[%s5030_s2 + $0x30] ss:$52 sps:$4 sm:$0xff]  }
  0xf3   :  { %2419 = vmatpush1.bf16.msra.mxu0 %v3612_v62  ;;  %2505 = vmatpush1.bf16.msra.mxu1 %v3615_v63  ;;  %v3704_v62 = vld [vmem:[%s5030_s2 + $0x6b0] ss:$52 sps:$4 sm:$0xff]   ;;  %v3705_v63 = vld [vmem:[%s5030_s2 + $0x3d8] ss:$52 sps:$4 sm:$0xff]  }
  0xf4   :  { %2420 = vmatprep.subr.bf16.mxu0 %v3620_v0  ;;  %2506 = vmatprep.subr.bf16.mxu1 %v3623_v1  ;;  %v4842_v0 = vld [vmem:[%s5031_s0 + $0x8] ss:$16 sps:$4 sm:$0xff]  }
  0xf5   :  { %v3706_v1 = vld [vmem:[%s5030_s2 + $0x98] ss:$52 sps:$4 sm:$0xff]  }
  0xf7   :  { %2421 = vmatpush1.bf16.msra.mxu0 %v3618_v2  ;;  %2507 = vmatpush1.bf16.msra.mxu1 %v3621_v3  ;;  %v3707_v2 = vld [vmem:[%s5030_s2 + $0x718] ss:$52 sps:$4 sm:$0xff]   ;;  %v3708_v3 = vld [vmem:[%s5030_s2 + $0x440] ss:$52 sps:$4 sm:$0xff]  }
  0xf8   :  { %2422 = vmatprep.subr.bf16.mxu0 %v3626_v4  ;;  %2508 = vmatprep.subr.bf16.mxu1 %v3629_v5  ;;  %v4859_v4 = vpop.permute.xlu0 %373  ;;  %v3709_v5 = vld [vmem:[%s5030_s2 + $0x100] ss:$52 sps:$4 sm:$0xff]  }
  0xfb   :  { %2423 = vmatpush1.bf16.msra.mxu0 %v3624_v7  ;;  %2509 = vmatpush1.bf16.msra.mxu1 %v3627_v8  ;;  %v3710_v7 = vld [vmem:[%s5030_s2 + $0x780] ss:$52 sps:$4 sm:$0xff]   ;;  %v3712_v8 = vld [vmem:[%s5030_s2 + $0x168] ss:$52 sps:$4 sm:$0xff]  }
  0xfc   :  { %2424 = vmatprep.subr.bf16.mxu0 %v3632_v9  ;;  %2510 = vmatprep.subr.bf16.mxu1 %v3635_v10  ;;  %v3713_v9 = vld [vmem:[%s5030_s2 + $0x7e8] ss:$52 sps:$4 sm:$0xff]   ;;  %v4878_v10 = vpop.permute.xlu0 %378 }
  0xff   :  { %2425 = vmatpush1.bf16.msra.mxu0 %v3630_v11  ;;  %2511 = vmatpush1.bf16.msra.mxu1 %v3633_v13  ;;  %v3714_v11 = vld [vmem:[%s5030_s2 + $0x510] ss:$52 sps:$4 sm:$0xff]  }
 0x100   :  { %2426 = vmatprep.subr.bf16.mxu0 %v3638_v14  ;;  %2512 = vmatprep.subr.bf16.mxu1 %v3641_v15 }
 0x103   :  { %2427 = vmatpush1.bf16.msra.mxu0 %v3636_v16  ;;  %2513 = vmatpush1.bf16.msra.mxu1 %v3639_v17 }
 0x104   :  { %2428 = vmatprep.subr.bf16.mxu0 %v3644_v18  ;;  %2514 = vmatprep.subr.bf16.mxu1 %v3647_v19 }
 0x107   :  { %2429 = vmatpush1.bf16.msra.mxu0 %v3642_v20  ;;  %2515 = vmatpush1.bf16.msra.mxu1 %v3645_v21 }
 0x108   :  { %2441 = vmatprep.subr.bf16.mxu0 %v3650_v22  ;;  %2527 = vmatprep.subr.bf16.mxu1 %v3653_v23  ;;  %v3715_v23 = vld [vmem:[%s5030_s2 + $0x1d0] ss:$52 sps:$4 sm:$0xff]  }
 0x10a   :  { %2431 = vmatmul.mubr.bf16.vlgmr.msra.gmra.mrb[8].mxu0 %v4723_v28  ;;  %2517 = vmatmul.mubr.bf16.vlgmr.msra.gmra.mrb[8].mxu1 %v4723_v28 }
 0x10b   :  { %2442 = vmatpush1.bf16.msra.mxu0 %v3648_v24  ;;  %2528 = vmatpush1.bf16.msra.mxu1 %v3651_v25  ;;  %v3716_v24 = vld [vmem:[%s5030_s2 + $0x850] ss:$52 sps:$4 sm:$0xff]  }
 0x10c   :  { %2443 = vmatprep.subr.bf16.mxu0 %v3656_v26  ;;  %2529 = vmatprep.subr.bf16.mxu1 %v3659_v27 }
 0x10d   :  { %3171 = vmatprep.mubr.msk.bf16.mxu0 %vm2050_vm0, %v4742_v33  ;;  %3172 = vmatprep.mubr.msk.bf16.mxu1 %vm2050_vm0, %v4742_v33 }
 0x10f   :  { %2444 = vmatpush1.bf16.msra.mxu0 %v3654_v29  ;;  %2530 = vmatpush1.bf16.msra.mxu1 %v3657_v42 }
 0x110   :  { %2445 = vmatprep.subr.bf16.mxu0 %v3662_v31  ;;  %2531 = vmatprep.subr.bf16.mxu1 %v3665_v32  ;;  %v3717_v32 = vld [vmem:[%s5030_s2 + $0x578] ss:$52 sps:$4 sm:$0xff]  }
 0x113   :  { %2446 = vmatpush1.bf16.msra.mxu0 %v3660_v34  ;;  %2532 = vmatpush1.bf16.msra.mxu1 %v3663_v35 }
 0x114   :  { %2447 = vmatprep.subr.bf16.mxu0 %v3668_v36  ;;  %2533 = vmatprep.subr.bf16.mxu1 %v3671_v37  ;;  %v3718_v37 = vld [vmem:[%s5030_s2 + $0x238] ss:$52 sps:$4 sm:$0xff]  }
 0x117   :  { %2448 = vmatpush1.bf16.msra.mxu0 %v3666_v38  ;;  %2534 = vmatpush1.bf16.msra.mxu1 %v3669_v39  ;;  %v3719_v38 = vld [vmem:[%s5030_s2 + $0x8b8] ss:$52 sps:$4 sm:$0xff]  }
 0x118   :  { %2449 = vmatprep.subr.bf16.mxu0 %v3674_v40  ;;  %2535 = vmatprep.subr.bf16.mxu1 %v3677_v41 }
 0x11b   :  { %2450 = vmatpush1.bf16.msra.mxu0 %v3672_v43  ;;  %2536 = vmatpush1.bf16.msra.mxu1 %v3675_v44 }
 0x11c   :  { %2451 = vmatprep.subr.bf16.mxu0 %v3680_v45  ;;  %2537 = vmatprep.subr.bf16.mxu1 %v3683_v46 }
 0x11f   :  { %2452 = vmatpush1.bf16.msra.mxu0 %v3678_v48  ;;  %2538 = vmatpush1.bf16.msra.mxu1 %v3681_v49 }
 0x120   :  { %2453 = vmatprep.subr.bf16.mxu0 %v3686_v50  ;;  %2539 = vmatprep.subr.bf16.mxu1 %v3689_v51  ;;  %v3720_v50 = vld [vmem:[%s5030_s2 + $0x5e0] ss:$52 sps:$4 sm:$0xff]  }
 0x123   :  { %2454 = vmatpush1.bf16.msra.mxu0 %v3684_v52  ;;  %2540 = vmatpush1.bf16.msra.mxu1 %v3687_v53 }
 0x124   :  { %2455 = vmatprep.subr.bf16.mxu0 %v3692_v54  ;;  %2541 = vmatprep.subr.bf16.mxu1 %v3695_v47  ;;  %v3721_v54 = vld [vmem:[%s5030_s2 + $0x2a0] ss:$52 sps:$4 sm:$0xff]  }
 0x125   :  { %v3722_v47 = vld [vmem:[%s5030_s2 + $0x920] ss:$52 sps:$4 sm:$0xff]  }
 0x127   :  { %2456 = vmatpush1.bf16.msra.mxu0 %v3690_v55  ;;  %2542 = vmatpush1.bf16.msra.mxu1 %v3693_v6  ;;  %v3723_v55 = vld [vmem:[%s5030_s2 + $0x648] ss:$52 sps:$4 sm:$0xff]  }
 0x128   :  { %2457 = vmatprep.subr.bf16.mxu0 %v3698_v56  ;;  %2543 = vmatprep.subr.bf16.mxu1 %v3701_v57  ;;  %v3724_v6 = vld [vmem:[%s5030_s2 + $0x308] ss:$52 sps:$4 sm:$0xff]  }
 0x129   :  { %v3725_v56 = vld [vmem:[%s5030_s2 + $0x988] ss:$52 sps:$4 sm:$0xff]  }
 0x12b   :  { %2458 = vmatpush1.bf16.msra.mxu0 %v3696_v58  ;;  %2544 = vmatpush1.bf16.msra.mxu1 %v3699_v12 }
 0x12c   :  { %3174 = vmatprep.subr.bf16.mxu0 %v3702_v60  ;;  %2611 = vmatprep.subr.bf16.mxu1 %v3835_v59  ;;  %v3726_v60 = vld [vmem:[%s5030_s2 + $0x9f0] ss:$52 sps:$4 sm:$0xff]  }
 0x12e   :  { %2474 = vmatmul.mubr.bf16.vlgmr.msra.gmra.mrb[8].mxu0 %v4842_v0  ;;  %2560 = vmatmul.mubr.bf16.vlgmr.msra.gmra.mrb[8].mxu1 %v4842_v0 }
 0x12f   :  { %3175 = vmatpush3.bf16.msra.mxu0 %v3703_v61  ;;  %2612 = vmatpush1.bf16.msra.mxu1 %v3704_v62 }
 0x130   :  { %3176 = vmatprep.subr.bf16.mxu0 %v3705_v63  ;;  %2613 = vmatprep.subr.bf16.mxu1 %v3835_v59 }
 0x131   :  { %2602 = vmatprep.mubr.bf16.mxu0 %v4539_v30  ;;  %3173 = vmatprep.mubr.msk.bf16.mxu1 %vm2050_vm0, %v4742_v33  ;;  %v3711_v30 = vld [vmem:[%s5030_s2 + $0x4a8] ss:$52 sps:$4 sm:$0xff]  }
 0x133   :  { %3177 = vmatpush3.bf16.msra.mxu0 %v3706_v1  ;;  %2614 = vmatpush1.bf16.msra.mxu1 %v3707_v2 }
 0x134   :  { %3178 = vmatprep.subr.bf16.mxu0 %v3708_v3  ;;  %2615 = vmatprep.subr.bf16.mxu1 %v3835_v59 }
 0x137   :  { %3179 = vmatpush3.bf16.msra.mxu0 %v3709_v5  ;;  %2616 = vmatpush1.bf16.msra.mxu1 %v3710_v7 }
 0x138   :  { %3180 = vmatprep.subr.bf16.mxu0 %v3711_v30  ;;  %2617 = vmatprep.subr.bf16.mxu1 %v3835_v59 }
 0x139   :  { %v2131_v13 = vpop.f32.mrb[0].mxu0  ;;  %v2217_v14 = vpop.f32.mrb[0].mxu1 }
 0x13a   :  { %v3196_v15 = vadd.f32 %v2131_v13, %v4859_v4  ;;  %v3200_v16 = vadd.f32 %v2217_v14, %v4859_v4  ;;  %v2133_v17 = vpop.f32.mrb[1].mxu0  ;;  %v2219_v18 = vpop.f32.mrb[1].mxu1 }
 0x13b   :  { %v3197_v19 = vadd.f32 %v2133_v17, %v4859_v4  ;;  %v3201_v20 = vadd.f32 %v2219_v18, %v4859_v4  ;;  %v2135_v21 = vpop.f32.mrb[2].mxu0  ;;  %v2221_v22 = vpop.f32.mrb[2].mxu1  ;;  %3181 = vmatpush3.bf16.msra.mxu0 %v3712_v8  ;;  %2618 = vmatpush1.bf16.msra.mxu1 %v3713_v9 }
 0x13c   :  { %v2652_v25 = vsub.f32 0.0, %v3196_v15  ;;  %v2654_v26 = vsub.f32 0.0, %v3200_v16  ;;  %v3198_v27 = vadd.f32 %v2135_v21, %v4878_v10  ;;  %v3202_v29 = vadd.f32 %v2221_v22, %v4878_v10  ;;  %v2137_v42 = vpop.f32.mrb[3].mxu0  ;;  %v2223_v31 = vpop.f32.mrb[3].mxu1  ;;  %3182 = vmatprep.subr.bf16.mxu0 %v3714_v11  ;;  %2619 = vmatprep.subr.bf16.mxu1 %v3835_v59 }
 0x13d   :  { %v2653_v33 = vsub.f32 0.0, %v3197_v19  ;;  %v2655_v34 = vsub.f32 0.0, %v3201_v20  ;;  %v3199_v35 = vadd.f32 %v2137_v42, %v4878_v10  ;;  %v3203_v36 = vadd.f32 %v2223_v31, %v4878_v10 }
 0x13e   :  { %v2678_v39 = vmul.f32 1.442695, %v2652_v25  ;;  %v2682_v40 = vmul.f32 1.442695, %v2654_v26  ;;  %v2665_v41 = vsub.f32 0.0, %v3198_v27  ;;  %v2667_v43 = vsub.f32 0.0, %v3202_v29 }
 0x13f   :  { %v2680_v44 = vmul.f32 1.442695, %v2653_v33  ;;  %v2684_v45 = vmul.f32 1.442695, %v2655_v34  ;;  %v2666_v46 = vsub.f32 0.0, %v3199_v35  ;;  %v2668_v48 = vsub.f32 0.0, %v3203_v36  ;;  %3183 = vmatpush3.bf16.msra.mxu0 %v3715_v23  ;;  %2620 = vmatpush1.bf16.msra.mxu1 %v3716_v24 }
 0x140   :  { %3727 = vpow2.f32 %v2678_v39  ;;  %v2704_v49 = vmul.f32 1.442695, %v2665_v41  ;;  %3184 = vmatprep.subr.bf16.mxu0 %v3717_v32  ;;  %2621 = vmatprep.subr.bf16.mxu1 %v3835_v59  ;;  %v2708_v51 = vmul.f32 1.442695, %v2667_v43 }
 0x141   :  { %3729 = vpow2.f32 %v2682_v40  ;;  %v2706_v52 = vmul.f32 1.442695, %v2666_v46  ;;  %v2710_v53 = vmul.f32 1.442695, %v2668_v48 }
 0x142   :  { %3731 = vpow2.f32 %v2680_v44 }
 0x143   :  { %3733 = vpow2.f32 %v2684_v45  ;;  %3185 = vmatpush3.bf16.msra.mxu0 %v3718_v37  ;;  %2622 = vmatpush1.bf16.msra.mxu1 %v3719_v38 }
 0x144   :  { %3735 = vpow2.f32 %v2704_v49  ;;  %3186 = vmatprep.subr.bf16.mxu0 %v3720_v50  ;;  %2623 = vmatprep.subr.bf16.mxu1 %v3835_v59 }
 0x145   :  { %3737 = vpow2.f32 %v2708_v51 }
 0x146   :  { %3739 = vpow2.f32 %v2706_v52 }
 0x147   :  { %3741 = vpow2.f32 %v2710_v53  ;;  %3187 = vmatpush3.bf16.msra.mxu0 %v3721_v54  ;;  %2624 = vmatpush1.bf16.msra.mxu1 %v3722_v47 }
 0x148   :  { %3188 = vmatprep.subr.bf16.mxu0 %v3723_v55  ;;  %2625 = vmatprep.subr.bf16.mxu1 %v3835_v59 }
 0x14a   :  { %v3728_v57 = vpop.eup %3727 }
 0x14b   :  { %v3730_v58 = vpop.eup %3729  ;;  %v2730_v12 = vadd.f32 1.0, %v3728_v57  ;;  %3189 = vmatpush3.bf16.msra.mxu0 %v3724_v6  ;;  %2626 = vmatpush1.bf16.msra.mxu1 %v3725_v56 }
 0x14c   :  { %v3732_v61 = vpop.eup %3731  ;;  %v2732_v62 = vadd.f32 1.0, %v3730_v58  ;;  %2627 = vmatprep.subr.bf16.mxu1 %v3835_v59 }
 0x14d   :  { %v3734_v63 = vpop.eup %3733  ;;  %3743 = vrcp.f32 %v2730_v12  ;;  %v2731_v1 = vadd.f32 1.0, %v3732_v61 }
 0x14e   :  { %v3736_v2 = vpop.eup %3735  ;;  %3745 = vrcp.f32 %v2732_v62  ;;  %v2733_v3 = vadd.f32 1.0, %v3734_v63  ;;  %2603 = vmatmul.mubr.bf16.vlgmr.msra.gmra.mrb[12].mxu0 %v4723_v28 }
 0x14f   :  { %v3738_v5 = vpop.eup %3737  ;;  %3747 = vrcp.f32 %v2731_v1  ;;  %v2743_v7 = vadd.f32 1.0, %v3736_v2  ;;  %2628 = vmatpush1.bf16.msra.mxu1 %v3726_v60 }
 0x150   :  { %v3740_v30 = vpop.eup %3739  ;;  %3749 = vrcp.f32 %v2733_v3  ;;  %v2745_v8 = vadd.f32 1.0, %v3738_v5 }
 0x151   :  { %v3742_v9 = vpop.eup %3741  ;;  %3751 = vrcp.f32 %v2743_v7  ;;  %v2744_v11 = vadd.f32 1.0, %v3740_v30 }
 0x152   :  { %3753 = vrcp.f32 %v2745_v8  ;;  %v2746_v59 = vadd.f32 1.0, %v3742_v9  ;;  %2644 = vmatmul.mubr.bf16.vlgmr.msra.gmra.mrb[12].mxu1 %v4842_v0 }
 0x153   :  { %3755 = vrcp.f32 %v2744_v11 }
 0x154   :  { %3757 = vrcp.f32 %v2746_v59 }
 0x157   :  { %v3744_v13 = vpop.eup %3743 }
 0x158   :  { %v3746_v14 = vpop.eup %3745  ;;  %2808 = vst [vmem:[%s5033_s3] sm:$0xff] %v3744_v13 }
 0x159   :  { %v3748_v28 = vpop.eup %3747  ;;  %2810 = vst [vmem:[%s5033_s3 + $0x10] sm:$0xff] %v3746_v14 }
 0x15a   :  { %v3750_v15 = vpop.eup %3749  ;;  %2809 = vst [vmem:[%s5033_s3 + $0x8] sm:$0xff] %v3748_v28 }
 0x15b   :  { %v3752_v16 = vpop.eup %3751  ;;  %2811 = vst [vmem:[%s5033_s3 + $0x18] sm:$0xff] %v3750_v15 }
 0x15c   :  { %v3754_v0 = vpop.eup %3753  ;;  %2821 = vst [vmem:[%s5033_s3 + $0x68] sm:$0xff] %v3752_v16 }
 0x15d   :  { %v3756_v17 = vpop.eup %3755  ;;  %2823 = vst [vmem:[%s5033_s3 + $0x78] sm:$0xff] %v3754_v0 }
 0x15e   :  { %v3758_v18 = vpop.eup %3757  ;;  %2822 = vst [vmem:[%s5033_s3 + $0x70] sm:$0xff] %v3756_v17 }
 0x15f   :  { %2824 = vst [vmem:[%s5033_s3 + $0x80] sm:$0xff] %v3758_v18 }
 0x19d   :  { %v2303_v19 = vpop.f32.mrb[4].mxu0  ;;  %v2389_v20 = vpop.f32.mrb[4].mxu1 }
 0x19e   :  { %v3204_v21 = vadd.f32 %v2303_v19, %v4859_v4  ;;  %v3208_v22 = vadd.f32 %v2389_v20, %v4859_v4  ;;  %v2305_v23 = vpop.f32.mrb[5].mxu0  ;;  %v2391_v24 = vpop.f32.mrb[5].mxu1 }
 0x19f   :  { %v3205_v25 = vadd.f32 %v2305_v23, %v4859_v4  ;;  %v3209_v26 = vadd.f32 %v2391_v24, %v4859_v4  ;;  %v2307_v27 = vpop.f32.mrb[6].mxu0  ;;  %v2393_v29 = vpop.f32.mrb[6].mxu1 }
 0x1a0   :  { %v2656_v42 = vsub.f32 0.0, %v3204_v21  ;;  %v2658_v31 = vsub.f32 0.0, %v3208_v22  ;;  %v3206_v32 = vadd.f32 %v2307_v27, %v4878_v10  ;;  %v3210_v33 = vadd.f32 %v2393_v29, %v4878_v10  ;;  %v2309_v34 = vpop.f32.mrb[7].mxu0  ;;  %v2395_v35 = vpop.f32.mrb[7].mxu1 }
 0x1a1   :  { %v2657_v36 = vsub.f32 0.0, %v3205_v25  ;;  %v2659_v37 = vsub.f32 0.0, %v3209_v26  ;;  %v3207_v38 = vadd.f32 %v2309_v34, %v4878_v10  ;;  %v3211_v39 = vadd.f32 %v2395_v35, %v4878_v10 }
 0x1a2   :  { %v2686_v40 = vmul.f32 1.442695, %v2656_v42  ;;  %v2690_v41 = vmul.f32 1.442695, %v2658_v31  ;;  %v2669_v43 = vsub.f32 0.0, %v3206_v32  ;;  %v2671_v44 = vsub.f32 0.0, %v3210_v33 }
 0x1a3   :  { %v2688_v45 = vmul.f32 1.442695, %v2657_v36  ;;  %v2692_v46 = vmul.f32 1.442695, %v2659_v37  ;;  %v2670_v48 = vsub.f32 0.0, %v3207_v38  ;;  %v2672_v49 = vsub.f32 0.0, %v3211_v39 }
 0x1a4   :  { %3759 = vpow2.f32 %v2686_v40  ;;  %v2712_v50 = vmul.f32 1.442695, %v2669_v43  ;;  %v2716_v51 = vmul.f32 1.442695, %v2671_v44 }
 0x1a5   :  { %3761 = vpow2.f32 %v2690_v41  ;;  %v2714_v52 = vmul.f32 1.442695, %v2670_v48  ;;  %v2718_v53 = vmul.f32 1.442695, %v2672_v49 }
 0x1a6   :  { %3763 = vpow2.f32 %v2688_v45 }
 0x1a7   :  { %3765 = vpow2.f32 %v2692_v46 }
 0x1a8   :  { %3767 = vpow2.f32 %v2712_v50 }
 0x1a9   :  { %3769 = vpow2.f32 %v2716_v51 }
 0x1aa   :  { %3771 = vpow2.f32 %v2714_v52 }
 0x1ab   :  { %3773 = vpow2.f32 %v2718_v53 }
 0x1ae   :  { %v3760_v54 = vpop.eup %3759 }
 0x1af   :  { %v3762_v47 = vpop.eup %3761  ;;  %v2734_v55 = vadd.f32 1.0, %v3760_v54 }
 0x1b0   :  { %v3764_v6 = vpop.eup %3763  ;;  %v2736_v56 = vadd.f32 1.0, %v3762_v47 }
 0x1b1   :  { %v3766_v57 = vpop.eup %3765  ;;  %3775 = vrcp.f32 %v2734_v55  ;;  %v2735_v58 = vadd.f32 1.0, %v3764_v6 }
 0x1b2   :  { %v3768_v12 = vpop.eup %3767  ;;  %3777 = vrcp.f32 %v2736_v56  ;;  %v2737_v60 = vadd.f32 1.0, %v3766_v57 }
 0x1b3   :  { %v3770_v61 = vpop.eup %3769  ;;  %3779 = vrcp.f32 %v2735_v58  ;;  %v2747_v62 = vadd.f32 1.0, %v3768_v12 }
 0x1b4   :  { %v3772_v63 = vpop.eup %3771  ;;  %3781 = vrcp.f32 %v2737_v60  ;;  %v2749_v1 = vadd.f32 1.0, %v3770_v61 }
 0x1b5   :  { %v3774_v2 = vpop.eup %3773  ;;  %3783 = vrcp.f32 %v2747_v62  ;;  %v2748_v3 = vadd.f32 1.0, %v3772_v63 }
 0x1b6   :  { %3785 = vrcp.f32 %v2749_v1  ;;  %v2750_v5 = vadd.f32 1.0, %v3774_v2 }
 0x1b7   :  { %3787 = vrcp.f32 %v2748_v3 }
 0x1b8   :  { %3789 = vrcp.f32 %v2750_v5 }
 0x1bb   :  { %v3776_v7 = vpop.eup %3775 }
 0x1bc   :  { %v3778_v30 = vpop.eup %3777  ;;  %2812 = vst [vmem:[%s5033_s3 + $0x20] sm:$0xff] %v3776_v7 }
 0x1bd   :  { %v3780_v8 = vpop.eup %3779  ;;  %2814 = vst [vmem:[%s5033_s3 + $0x30] sm:$0xff] %v3778_v30 }
 0x1be   :  { %v3782_v9 = vpop.eup %3781  ;;  %2813 = vst [vmem:[%s5033_s3 + $0x28] sm:$0xff] %v3780_v8 }
 0x1bf   :  { %v3784_v11 = vpop.eup %3783  ;;  %2815 = vst [vmem:[%s5033_s3 + $0x38] sm:$0xff] %v3782_v9 }
 0x1c0   :  { %v3786_v59 = vpop.eup %3785  ;;  %2825 = vst [vmem:[%s5033_s3 + $0x88] sm:$0xff] %v3784_v11 }
 0x1c1   :  { %v3788_v13 = vpop.eup %3787  ;;  %2827 = vst [vmem:[%s5033_s3 + $0x98] sm:$0xff] %v3786_v59 }
 0x1c2   :  { %v3790_v14 = vpop.eup %3789  ;;  %2826 = vst [vmem:[%s5033_s3 + $0x90] sm:$0xff] %v3788_v13 }
 0x1c3   :  { %2828 = vst [vmem:[%s5033_s3 + $0xa0] sm:$0xff] %v3790_v14 }
 0x201   :  { %v2475_v28 = vpop.f32.mrb[8].mxu0  ;;  %v2561_v15 = vpop.f32.mrb[8].mxu1 }
 0x202   :  { %v3212_v16 = vadd.f32 %v2475_v28, %v4859_v4  ;;  %v3216_v0 = vadd.f32 %v2561_v15, %v4859_v4  ;;  %v2477_v17 = vpop.f32.mrb[9].mxu0  ;;  %v2563_v18 = vpop.f32.mrb[9].mxu1 }
 0x203   :  { %v3213_v19 = vadd.f32 %v2477_v17, %v4859_v4  ;;  %v3217_v20 = vadd.f32 %v2563_v18, %v4859_v4  ;;  %v2479_v21 = vpop.f32.mrb[10].mxu0  ;;  %v2565_v22 = vpop.f32.mrb[10].mxu1 }
 0x204   :  { %v2660_v23 = vsub.f32 0.0, %v3212_v16  ;;  %v2662_v24 = vsub.f32 0.0, %v3216_v0  ;;  %v3214_v25 = vadd.f32 %v2479_v21, %v4878_v10  ;;  %v3218_v26 = vadd.f32 %v2565_v22, %v4878_v10  ;;  %v2481_v27 = vpop.f32.mrb[11].mxu0  ;;  %v2567_v29 = vpop.f32.mrb[11].mxu1 }
 0x205   :  { %v2661_v42 = vsub.f32 0.0, %v3213_v19  ;;  %v2663_v31 = vsub.f32 0.0, %v3217_v20  ;;  %v3215_v32 = vadd.f32 %v2481_v27, %v4878_v10  ;;  %v3219_v33 = vadd.f32 %v2567_v29, %v4878_v10 }
 0x206   :  { %v2694_v34 = vmul.f32 1.442695, %v2660_v23  ;;  %v2698_v35 = vmul.f32 1.442695, %v2662_v24  ;;  %v2673_v36 = vsub.f32 0.0, %v3214_v25  ;;  %v2675_v37 = vsub.f32 0.0, %v3218_v26 }
 0x207   :  { %v2696_v38 = vmul.f32 1.442695, %v2661_v42  ;;  %v2700_v39 = vmul.f32 1.442695, %v2663_v31  ;;  %v2674_v40 = vsub.f32 0.0, %v3215_v32  ;;  %v2676_v41 = vsub.f32 0.0, %v3219_v33 }
 0x208   :  { %3791 = vpow2.f32 %v2694_v34  ;;  %v2720_v43 = vmul.f32 1.442695, %v2673_v36  ;;  %v2724_v44 = vmul.f32 1.442695, %v2675_v37 }
 0x209   :  { %3793 = vpow2.f32 %v2698_v35  ;;  %v2722_v45 = vmul.f32 1.442695, %v2674_v40  ;;  %v2726_v46 = vmul.f32 1.442695, %v2676_v41 }
 0x20a   :  { %3795 = vpow2.f32 %v2696_v38 }
 0x20b   :  { %3797 = vpow2.f32 %v2700_v39 }
 0x20c   :  { %3799 = vpow2.f32 %v2720_v43 }
 0x20d   :  { %3801 = vpow2.f32 %v2724_v44 }
 0x20e   :  { %3803 = vpow2.f32 %v2722_v45 }
 0x20f   :  { %3805 = vpow2.f32 %v2726_v46 }
 0x212   :  { %v3792_v48 = vpop.eup %3791 }
 0x213   :  { %v3794_v49 = vpop.eup %3793  ;;  %v2738_v50 = vadd.f32 1.0, %v3792_v48 }
 0x214   :  { %v3796_v51 = vpop.eup %3795  ;;  %v2740_v52 = vadd.f32 1.0, %v3794_v49 }
 0x215   :  { %v3798_v53 = vpop.eup %3797  ;;  %3807 = vrcp.f32 %v2738_v50  ;;  %v2739_v54 = vadd.f32 1.0, %v3796_v51 }
 0x216   :  { %v3800_v47 = vpop.eup %3799  ;;  %3809 = vrcp.f32 %v2740_v52  ;;  %v2741_v55 = vadd.f32 1.0, %v3798_v53 }
 0x217   :  { %v3802_v6 = vpop.eup %3801  ;;  %3811 = vrcp.f32 %v2739_v54  ;;  %v2751_v56 = vadd.f32 1.0, %v3800_v47 }
 0x218   :  { %v3804_v57 = vpop.eup %3803  ;;  %3813 = vrcp.f32 %v2741_v55  ;;  %v2753_v58 = vadd.f32 1.0, %v3802_v6 }
 0x219   :  { %v3806_v12 = vpop.eup %3805  ;;  %3815 = vrcp.f32 %v2751_v56  ;;  %v2752_v60 = vadd.f32 1.0, %v3804_v57 }
 0x21a   :  { %3817 = vrcp.f32 %v2753_v58  ;;  %v2754_v61 = vadd.f32 1.0, %v3806_v12 }
 0x21b   :  { %3819 = vrcp.f32 %v2752_v60 }
 0x21c   :  { %3821 = vrcp.f32 %v2754_v61 }
 0x21f   :  { %v3808_v62 = vpop.eup %3807 }
 0x220   :  { %v3810_v63 = vpop.eup %3809  ;;  %2816 = vst [vmem:[%s5033_s3 + $0x40] sm:$0xff] %v3808_v62 }
 0x221   :  { %v3812_v1 = vpop.eup %3811  ;;  %2818 = vst [vmem:[%s5033_s3 + $0x50] sm:$0xff] %v3810_v63  ;;  %v3190_v2 = vpop.f32.mrb[12].mxu0 }
 0x222   :  { %v3814_v3 = vpop.eup %3813  ;;  %2817 = vst [vmem:[%s5033_s3 + $0x48] sm:$0xff] %v3812_v1  ;;  %v3191_v5 = vpop.f32.mrb[13].mxu0 }
 0x223   :  { %v3816_v7 = vpop.eup %3815  ;;  %2819 = vst [vmem:[%s5033_s3 + $0x58] sm:$0xff] %v3814_v3  ;;  %v3192_v30 = vadd.f32 %v3191_v5, %v3190_v2  ;;  %v3193_v8 = vpop.f32.mrb[14].mxu0 }
 0x224   :  { %v3818_v9 = vpop.eup %3817  ;;  %2829 = vst [vmem:[%s5033_s3 + $0xa8] sm:$0xff] %v3816_v7  ;;  %v3194_v11 = vpop.f32.mrb[15].mxu0 }
 0x225   :  { %v3820_v59 = vpop.eup %3819  ;;  %2831 = vst [vmem:[%s5033_s3 + $0xb8] sm:$0xff] %v3818_v9  ;;  %v3195_v13 = vadd.f32 %v3194_v11, %v3193_v8  ;;  %v2605_v14 = vadd.f32 %v3192_v30, %v4859_v4  ;;  %v2645_v28 = vpop.f32.mrb[12].mxu1 }
 0x226   :  { %v3822_v15 = vpop.eup %3821  ;;  %2830 = vst [vmem:[%s5033_s3 + $0xb0] sm:$0xff] %v3820_v59  ;;  %v2647_v16 = vpop.f32.mrb[13].mxu1 }
 0x227   :  { %2832 = vst [vmem:[%s5033_s3 + $0xc0] sm:$0xff] %v3822_v15  ;;  %v2646_v0 = vadd.f32 %v2645_v28, %v2605_v14  ;;  %v2608_v17 = vadd.f32 %v3195_v13, %v4878_v10  ;;  %v2648_v18 = vpop.f32.mrb[14].mxu1 }
 0x228   :  { %v2650_v19 = vpop.f32.mrb[15].mxu1 }
 0x229   :  { %v2664_v20 = vsub.f32 0.0, %v2646_v0  ;;  %v2649_v21 = vadd.f32 %v2648_v18, %v2608_v17 }
 0x22b   :  { %v2702_v22 = vmul.f32 1.442695, %v2664_v20  ;;  %v2677_v4 = vsub.f32 0.0, %v2649_v21 }
 0x22d   :  { %3823 = vpow2.f32 %v2702_v22  ;;  %v2728_v23 = vmul.f32 1.442695, %v2677_v4 }
 0x22f   :  { %3825 = vpow2.f32 %v2728_v23 }
 0x237   :  { %v3824_v24 = vpop.eup %3823 }
 0x238   :  { %v2742_v25 = vadd.f32 1.0, %v3824_v24 }
 0x239   :  { %v3826_v26 = vpop.eup %3825 }
 0x23a   :  { %3827 = vrcp.f32 %v2742_v25  ;;  %v2755_v27 = vadd.f32 1.0, %v3826_v26 }
 0x23c   :  { %3829 = vrcp.f32 %v2755_v27 }
 0x244   :  { %v3828_v29 = vpop.eup %3827 }
 0x245   :  { %2820 = vst [vmem:[%s5033_s3 + $0x60] sm:$0xff] %v3828_v29 }
 0x246   :  { %v3830_v10 = vpop.eup %3829 }
 0x247   :  { %2833 = vst [vmem:[%s5033_s3 + $0xc8] sm:$0xff] %v3830_v10 }

</bundles_post_ra>
